<compile_context>
chip_gen: v7x
topology: tpu7x:2x2x1
jax: 0.10.0
libtpu: 0.0.40
codegen_flags: <defaults>
</compile_context>

<pallas_src>
import functools

import jax
import jax.numpy as jnp
import numpy as np
from jax.experimental import pallas as pl
from jax.experimental.pallas import tpu as pltpu


# -------------------- fused CBAM kernel (NB batches per grid step) ------------------
def _cbam_kernel(x_ref, w1_ref, b1_ref, w2_ref, b2_ref, wbd_ref, bbd_ref,
                 wbig_ref, hm_ref, vm_ref, ba_ref, o_ref, *, NB, C, C2, H, W):
    HW = H * W

    # ---- channel attention (SE): pool every batch, run the shared MLP once ----------
    cols = []
    for n in range(NB):
        cols.append(jnp.mean(x_ref[n], axis=1, keepdims=True))     # AdaptiveAvgPool -> (C,1)
    for n in range(NB):
        cols.append(jnp.max(x_ref[n], axis=1, keepdims=True))      # AdaptiveMaxPool -> (C,1)
    v = jnp.concatenate(cols, axis=1)                              # (C, 2*NB)
    h = jnp.dot(w1_ref[...], v, preferred_element_type=jnp.float32) + b1_ref[...]
    h = jnp.maximum(h, 0.0)                                        # ReLU
    z = jnp.dot(w2_ref[...], h, preferred_element_type=jnp.float32) + b2_ref[...]
    y = jax.nn.sigmoid(z[:, :NB] + z[:, NB:])                      # (C, NB) channel attention

    # ---- SE scale + 1x1 combine conv: all NB batches in ONE block-diagonal matmul ---
    xs_rows = [x_ref[n] * y[:, n:n + 1] for n in range(NB)]        # NB x (C, HW)
    xcat = jnp.concatenate(xs_rows, axis=0)                        # (NB*C, HW)
    x2 = jnp.dot(wbd_ref[...], xcat,
                 preferred_element_type=jnp.float32) + bbd_ref[...]   # (NB*C2, HW)

    # ---- spatial attention: channel mean/max + 7x7 conv (pad=3), batches on sublanes -
    a_rows = [jnp.mean(x2[n * C2:(n + 1) * C2], axis=0, keepdims=True) for n in range(NB)]
    m_rows = [jnp.max(x2[n * C2:(n + 1) * C2], axis=0, keepdims=True) for n in range(NB)]
    p = jnp.concatenate(a_rows + m_rows, axis=0)                   # (2*NB, HW): avg rows, max rows

    # 7 horizontal lane-rolls (XLU) on the whole stack, boundary overruns zeroed by hmask
    g_list = []
    for dj in range(7):
        g = pltpu.roll(p, (3 - dj) % HW, axis=1)                   # g[.,q] = p[., q + dj - 3]
        g_list.append(g * hm_ref[dj:dj + 1, :])
    gall = jnp.concatenate(g_list, axis=0)                         # (14*NB, HW)

    # one MXU matmul replaces the 98-tap unrolled VALU FMA chain
    t_all = jnp.dot(wbig_ref[...], gall,
                    preferred_element_type=jnp.float32)            # (7*NB, HW), rows = (di, n)

    acc = jnp.zeros((NB, HW), jnp.float32)
    for di in range(7):
        t = t_all[di * NB:(di + 1) * NB]                           # (NB, HW)
        t = pltpu.roll(t, ((3 - di) * W) % HW, axis=1)             # t'[.,q] = t[., q + (di-3)*W]
        acc = acc + t * vm_ref[di:di + 1, :]                       # zero vertical overruns

    y_sp = jax.nn.sigmoid(acc + ba_ref[0])                         # (NB, HW) spatial attention

    for n in range(NB):                                            # lane-dense (C2, HW) stores
        o_ref[n] = (x2[n * C2:(n + 1) * C2] * y_sp[n:n + 1, :]).astype(o_ref.dtype)


# -------------------- wrapper -------------------------------------------------------
@functools.partial(jax.jit, static_argnames=("block_batch",))
def cbam_forward(x, params, block_batch=8):
    w1, b1, w2, b2, wc, bc, wa, ba = params
    B, C, H, W = x.shape
    hidden = w1.shape[0]
    C2 = wc.shape[0]
    HW = H * W

    NB = min(block_batch, B)                       # batches folded per grid step
    Bp = ((B + NB - 1) // NB) * NB                 # pad batch to a multiple of NB
    x_flat = x.reshape(B, C, HW)
    if Bp != B:
        x_flat = jnp.pad(x_flat, ((0, Bp - B), (0, 0), (0, 0)))

    b1c = b1.reshape(hidden, 1)
    b2c = b2.reshape(C, 1)

    eye = jnp.eye(NB, dtype=wc.dtype)
    # block-diagonal combine weight: applies the (C2, C) 1x1 conv per folded batch
    wbd = jnp.kron(eye, wc)                        # (NB*C2, NB*C)
    bbd = jnp.tile(bc, NB).reshape(NB * C2, 1)     # (NB*C2, 1)

    # 7x7 conv taps as a matmul over the stacked shifted planes:
    #   W_small[di, dj*2 + c] = wa[0, c, di, dj]; W_big = kron(W_small, I_NB)
    wsmall = jnp.transpose(wa[0], (1, 2, 0)).reshape(7, 14)
    wbig = jnp.kron(wsmall, eye)                   # (7*NB, 14*NB)

    # Static boundary masks for the padded 7x7 conv in flat p = i*W + j coordinates.
    jj = np.arange(HW, dtype=np.int32) % W
    ii = np.arange(HW, dtype=np.int32) // W
    hmask = jnp.asarray(np.stack(
        [((jj >= 3 - dj) & (jj <= W + 2 - dj)).astype(np.float32) for dj in range(7)]))
    vmask = jnp.asarray(np.stack(
        [((ii >= 3 - di) & (ii <= H + 2 - di)).astype(np.float32) for di in range(7)]))

    kernel = functools.partial(_cbam_kernel, NB=NB, C=C, C2=C2, H=H, W=W)

    out_flat = pl.pallas_call(
        kernel,
        out_shape=jax.ShapeDtypeStruct((Bp, C2, HW), jnp.float32),
        grid=(Bp // NB,),
        in_specs=[
            pl.BlockSpec((NB, C, HW), lambda g: (g, 0, 0)),        # x (NB batches / step)
            pl.BlockSpec((hidden, C), lambda g: (0, 0)),           # w1
            pl.BlockSpec((hidden, 1), lambda g: (0, 0)),           # b1
            pl.BlockSpec((C, hidden), lambda g: (0, 0)),           # w2
            pl.BlockSpec((C, 1), lambda g: (0, 0)),                # b2
            pl.BlockSpec((NB * C2, NB * C), lambda g: (0, 0)),     # block-diag combine weight
            pl.BlockSpec((NB * C2, 1), lambda g: (0, 0)),          # combine bias (tiled)
            pl.BlockSpec((7 * NB, 14 * NB), lambda g: (0, 0)),     # 7x7 taps as matmul weight
            pl.BlockSpec((7, HW), lambda g: (0, 0)),               # horizontal masks
            pl.BlockSpec((7, HW), lambda g: (0, 0)),               # vertical masks
            pl.BlockSpec(memory_space=pltpu.MemorySpace.SMEM),     # 7x7 conv bias (scalar)
        ],
        out_specs=pl.BlockSpec((NB, C2, HW), lambda g: (g, 0, 0)),
        compiler_params=pltpu.CompilerParams(
            dimension_semantics=("parallel",)),
    )(x_flat, w1, b1c, w2, b2c, wbd, bbd, wbig, hmask, vmask, ba)

    return out_flat[:B].reshape(B, C2, H, W)


# -------------------- pure-JAX reference (for correctness check) -------------------
def cbam_reference(x, params):
    w1, b1, w2, b2, wc, bc, wa, ba = params
    avg = jnp.mean(x, axis=(2, 3))
    mx = jnp.max(x, axis=(2, 3))

    def fc(v):
        h = jnp.maximum(v @ w1.T + b1, 0.0)
        return h @ w2.T + b2

    y = jax.nn.sigmoid(fc(avg) + fc(mx))[:, :, None, None]
    xs = x * y
    x2 = jnp.einsum("oc,bchw->bohw", wc, xs,
                    precision=jax.lax.Precision.HIGHEST) + bc[None, :, None, None]
    a2 = jnp.mean(x2, axis=1, keepdims=True)
    m2 = jnp.max(x2, axis=1, keepdims=True)
    y2 = jnp.concatenate([a2, m2], axis=1)
    conv = jax.lax.conv_general_dilated(
        y2, wa, window_strides=(1, 1), padding=((3, 3), (3, 3)),
        dimension_numbers=("NCHW", "OIHW", "NCHW"),
        precision=jax.lax.Precision.HIGHEST)
    s2 = jax.nn.sigmoid(conv + ba[None, :, None, None])
    return x2 * s2


if __name__ == "__main__":
    B, C, H, W = 16, 32, 16, 16      # B=16 with NB=8 -> grid=(2,), both v7x cores busy
    reduction = 16
    hidden = C // reduction          # 2
    C2 = C // 2                      # 16

    key = jax.random.PRNGKey(0)
    ks = jax.random.split(key, 9)
    s = 0.1
    w1 = s * jax.random.normal(ks[0], (hidden, C), jnp.float32)   # Linear(C, C//r).weight
    b1 = s * jax.random.normal(ks[1], (hidden,), jnp.float32)
    w2 = s * jax.random.normal(ks[2], (C, hidden), jnp.float32)   # Linear(C//r, C).weight
    b2 = s * jax.random.normal(ks[3], (C,), jnp.float32)
    wc = s * jax.random.normal(ks[4], (C2, C), jnp.float32)       # Conv2d(C, C//2, 1) weight
    bc = s * jax.random.normal(ks[5], (C2,), jnp.float32)
    wa = s * jax.random.normal(ks[6], (1, 2, 7, 7), jnp.float32)  # Conv2d(2, 1, 7, pad=3) weight
    ba = s * jax.random.normal(ks[7], (1,), jnp.float32)
    x = jax.random.normal(ks[8], (B, C, H, W), jnp.float32)

    params = (w1, b1, w2, b2, wc, bc, wa, ba)

    out = jax.block_until_ready(cbam_forward(x, params))
    ref = cbam_reference(x, params)

    assert out.shape == (B, C2, H, W), out.shape
    if not jnp.allclose(out, ref, atol=5e-3, rtol=5e-3):
        raise AssertionError(
            f"mismatch, max abs err = {float(jnp.max(jnp.abs(out - ref)))}")
    print("KERNEL_OK")
</pallas_src>

<mosaic_0001>
module attributes {stable_mosaic.version = 11 : i64} {
  func.func @_cbam_kernel(%arg0: i32, %arg1: memref<8x32x256xf32, #tpu.memory_space<vmem>>, %arg2: memref<2x32xf32, #tpu.memory_space<vmem>>, %arg3: memref<2x1xf32, #tpu.memory_space<vmem>>, %arg4: memref<32x2xf32, #tpu.memory_space<vmem>>, %arg5: memref<32x1xf32, #tpu.memory_space<vmem>>, %arg6: memref<128x256xf32, #tpu.memory_space<vmem>>, %arg7: memref<128x1xf32, #tpu.memory_space<vmem>>, %arg8: memref<56x112xf32, #tpu.memory_space<vmem>>, %arg9: memref<7x256xf32, #tpu.memory_space<vmem>>, %arg10: memref<7x256xf32, #tpu.memory_space<vmem>>, %arg11: memref<1xf32, #tpu.memory_space<smem>>, %arg12: memref<8x16x256xf32, #tpu.memory_space<vmem>>) attributes {dimension_semantics = [#tpu.dimension_semantics<parallel>], iteration_bounds = array<i64: 2>, scalar_prefetch = 0 : i64, scratch_operands = 0 : i64, tpu.core_type = #tpu.core_type<tc>, window_params = [{transform_indices = @transform_0, window_bounds = array<i64: 8, 32, 256>}, {pipeline_mode = #tpu.pipeline_mode<synchronous>, transform_indices = @transform_1, window_bounds = array<i64: 2, 32>}, {pipeline_mode = #tpu.pipeline_mode<synchronous>, transform_indices = @transform_2, window_bounds = array<i64: 2, 1>}, {pipeline_mode = #tpu.pipeline_mode<synchronous>, transform_indices = @transform_3, window_bounds = array<i64: 32, 2>}, {pipeline_mode = #tpu.pipeline_mode<synchronous>, transform_indices = @transform_4, window_bounds = array<i64: 32, 1>}, {pipeline_mode = #tpu.pipeline_mode<synchronous>, transform_indices = @transform_5, window_bounds = array<i64: 128, 256>}, {pipeline_mode = #tpu.pipeline_mode<synchronous>, transform_indices = @transform_6, window_bounds = array<i64: 128, 1>}, {pipeline_mode = #tpu.pipeline_mode<synchronous>, transform_indices = @transform_7, window_bounds = array<i64: 56, 112>}, {pipeline_mode = #tpu.pipeline_mode<synchronous>, transform_indices = @transform_8, window_bounds = array<i64: 7, 256>}, {pipeline_mode = #tpu.pipeline_mode<synchronous>, transform_indices = @transform_9, window_bounds = array<i64: 7, 256>}, {transform_indices = @transform_10, window_bounds = array<i64: 1>}, {transform_indices = @transform_11, window_bounds = array<i64: 8, 16, 256>}]} {
    %c0 = arith.constant 0 : index
    %c0_0 = arith.constant 0 : index
    %c0_1 = arith.constant 0 : index
    %0 = vector.load %arg1[%c0, %c0_0, %c0_1] : memref<8x32x256xf32, #tpu.memory_space<vmem>>, vector<1x32x256xf32>
    %1 = vector.shape_cast %0 : vector<1x32x256xf32> to vector<32x256xf32>
    %cst = arith.constant dense<0.000000e+00> : vector<32xf32>
    %2 = vector.multi_reduction <add>, %1, %cst [1] : vector<32x256xf32> to vector<32xf32>
    %3 = vector.shape_cast %2 : vector<32xf32> to vector<32x1xf32>
    %cst_2 = arith.constant 2.560000e+02 : f32
    %4 = vector.broadcast %cst_2 : f32 to vector<32x1xf32>
    %5 = arith.divf %3, %4 : vector<32x1xf32>
    %c1 = arith.constant 1 : index
    %c0_3 = arith.constant 0 : index
    %c0_4 = arith.constant 0 : index
    %6 = vector.load %arg1[%c1, %c0_3, %c0_4] : memref<8x32x256xf32, #tpu.memory_space<vmem>>, vector<1x32x256xf32>
    %7 = vector.shape_cast %6 : vector<1x32x256xf32> to vector<32x256xf32>
    %cst_5 = arith.constant dense<0.000000e+00> : vector<32xf32>
    %8 = vector.multi_reduction <add>, %7, %cst_5 [1] : vector<32x256xf32> to vector<32xf32>
    %9 = vector.shape_cast %8 : vector<32xf32> to vector<32x1xf32>
    %cst_6 = arith.constant 2.560000e+02 : f32
    %10 = vector.broadcast %cst_6 : f32 to vector<32x1xf32>
    %11 = arith.divf %9, %10 : vector<32x1xf32>
    %c2 = arith.constant 2 : index
    %c0_7 = arith.constant 0 : index
    %c0_8 = arith.constant 0 : index
    %12 = vector.load %arg1[%c2, %c0_7, %c0_8] : memref<8x32x256xf32, #tpu.memory_space<vmem>>, vector<1x32x256xf32>
    %13 = vector.shape_cast %12 : vector<1x32x256xf32> to vector<32x256xf32>
    %cst_9 = arith.constant dense<0.000000e+00> : vector<32xf32>
    %14 = vector.multi_reduction <add>, %13, %cst_9 [1] : vector<32x256xf32> to vector<32xf32>
    %15 = vector.shape_cast %14 : vector<32xf32> to vector<32x1xf32>
    %cst_10 = arith.constant 2.560000e+02 : f32
    %16 = vector.broadcast %cst_10 : f32 to vector<32x1xf32>
    %17 = arith.divf %15, %16 : vector<32x1xf32>
    %c3 = arith.constant 3 : index
    %c0_11 = arith.constant 0 : index
    %c0_12 = arith.constant 0 : index
    %18 = vector.load %arg1[%c3, %c0_11, %c0_12] : memref<8x32x256xf32, #tpu.memory_space<vmem>>, vector<1x32x256xf32>
    %19 = vector.shape_cast %18 : vector<1x32x256xf32> to vector<32x256xf32>
    %cst_13 = arith.constant dense<0.000000e+00> : vector<32xf32>
    %20 = vector.multi_reduction <add>, %19, %cst_13 [1] : vector<32x256xf32> to vector<32xf32>
    %21 = vector.shape_cast %20 : vector<32xf32> to vector<32x1xf32>
    %cst_14 = arith.constant 2.560000e+02 : f32
    %22 = vector.broadcast %cst_14 : f32 to vector<32x1xf32>
    %23 = arith.divf %21, %22 : vector<32x1xf32>
    %c4 = arith.constant 4 : index
    %c0_15 = arith.constant 0 : index
    %c0_16 = arith.constant 0 : index
    %24 = vector.load %arg1[%c4, %c0_15, %c0_16] : memref<8x32x256xf32, #tpu.memory_space<vmem>>, vector<1x32x256xf32>
    %25 = vector.shape_cast %24 : vector<1x32x256xf32> to vector<32x256xf32>
    %cst_17 = arith.constant dense<0.000000e+00> : vector<32xf32>
    %26 = vector.multi_reduction <add>, %25, %cst_17 [1] : vector<32x256xf32> to vector<32xf32>
    %27 = vector.shape_cast %26 : vector<32xf32> to vector<32x1xf32>
    %cst_18 = arith.constant 2.560000e+02 : f32
    %28 = vector.broadcast %cst_18 : f32 to vector<32x1xf32>
    %29 = arith.divf %27, %28 : vector<32x1xf32>
    %c5 = arith.constant 5 : index
    %c0_19 = arith.constant 0 : index
    %c0_20 = arith.constant 0 : index
    %30 = vector.load %arg1[%c5, %c0_19, %c0_20] : memref<8x32x256xf32, #tpu.memory_space<vmem>>, vector<1x32x256xf32>
    %31 = vector.shape_cast %30 : vector<1x32x256xf32> to vector<32x256xf32>
    %cst_21 = arith.constant dense<0.000000e+00> : vector<32xf32>
    %32 = vector.multi_reduction <add>, %31, %cst_21 [1] : vector<32x256xf32> to vector<32xf32>
    %33 = vector.shape_cast %32 : vector<32xf32> to vector<32x1xf32>
    %cst_22 = arith.constant 2.560000e+02 : f32
    %34 = vector.broadcast %cst_22 : f32 to vector<32x1xf32>
    %35 = arith.divf %33, %34 : vector<32x1xf32>
    %c6 = arith.constant 6 : index
    %c0_23 = arith.constant 0 : index
    %c0_24 = arith.constant 0 : index
    %36 = vector.load %arg1[%c6, %c0_23, %c0_24] : memref<8x32x256xf32, #tpu.memory_space<vmem>>, vector<1x32x256xf32>
    %37 = vector.shape_cast %36 : vector<1x32x256xf32> to vector<32x256xf32>
    %cst_25 = arith.constant dense<0.000000e+00> : vector<32xf32>
    %38 = vector.multi_reduction <add>, %37, %cst_25 [1] : vector<32x256xf32> to vector<32xf32>
    %39 = vector.shape_cast %38 : vector<32xf32> to vector<32x1xf32>
    %cst_26 = arith.constant 2.560000e+02 : f32
    %40 = vector.broadcast %cst_26 : f32 to vector<32x1xf32>
    %41 = arith.divf %39, %40 : vector<32x1xf32>
    %c7 = arith.constant 7 : index
    %c0_27 = arith.constant 0 : index
    %c0_28 = arith.constant 0 : index
    %42 = vector.load %arg1[%c7, %c0_27, %c0_28] : memref<8x32x256xf32, #tpu.memory_space<vmem>>, vector<1x32x256xf32>
    %43 = vector.shape_cast %42 : vector<1x32x256xf32> to vector<32x256xf32>
    %cst_29 = arith.constant dense<0.000000e+00> : vector<32xf32>
    %44 = vector.multi_reduction <add>, %43, %cst_29 [1] : vector<32x256xf32> to vector<32xf32>
    %45 = vector.shape_cast %44 : vector<32xf32> to vector<32x1xf32>
    %cst_30 = arith.constant 2.560000e+02 : f32
    %46 = vector.broadcast %cst_30 : f32 to vector<32x1xf32>
    %47 = arith.divf %45, %46 : vector<32x1xf32>
    %c0_31 = arith.constant 0 : index
    %c0_32 = arith.constant 0 : index
    %c0_33 = arith.constant 0 : index
    %48 = vector.load %arg1[%c0_31, %c0_32, %c0_33] : memref<8x32x256xf32, #tpu.memory_space<vmem>>, vector<1x32x256xf32>
    %49 = vector.shape_cast %48 : vector<1x32x256xf32> to vector<32x256xf32>
    %cst_34 = arith.constant dense<0xFF800000> : vector<32xf32>
    %50 = vector.multi_reduction <maximumf>, %49, %cst_34 [1] : vector<32x256xf32> to vector<32xf32>
    %51 = vector.shape_cast %50 : vector<32xf32> to vector<32x1xf32>
    %c1_35 = arith.constant 1 : index
    %c0_36 = arith.constant 0 : index
    %c0_37 = arith.constant 0 : index
    %52 = vector.load %arg1[%c1_35, %c0_36, %c0_37] : memref<8x32x256xf32, #tpu.memory_space<vmem>>, vector<1x32x256xf32>
    %53 = vector.shape_cast %52 : vector<1x32x256xf32> to vector<32x256xf32>
    %cst_38 = arith.constant dense<0xFF800000> : vector<32xf32>
    %54 = vector.multi_reduction <maximumf>, %53, %cst_38 [1] : vector<32x256xf32> to vector<32xf32>
    %55 = vector.shape_cast %54 : vector<32xf32> to vector<32x1xf32>
    %c2_39 = arith.constant 2 : index
    %c0_40 = arith.constant 0 : index
    %c0_41 = arith.constant 0 : index
    %56 = vector.load %arg1[%c2_39, %c0_40, %c0_41] : memref<8x32x256xf32, #tpu.memory_space<vmem>>, vector<1x32x256xf32>
    %57 = vector.shape_cast %56 : vector<1x32x256xf32> to vector<32x256xf32>
    %cst_42 = arith.constant dense<0xFF800000> : vector<32xf32>
    %58 = vector.multi_reduction <maximumf>, %57, %cst_42 [1] : vector<32x256xf32> to vector<32xf32>
    %59 = vector.shape_cast %58 : vector<32xf32> to vector<32x1xf32>
    %c3_43 = arith.constant 3 : index
    %c0_44 = arith.constant 0 : index
    %c0_45 = arith.constant 0 : index
    %60 = vector.load %arg1[%c3_43, %c0_44, %c0_45] : memref<8x32x256xf32, #tpu.memory_space<vmem>>, vector<1x32x256xf32>
    %61 = vector.shape_cast %60 : vector<1x32x256xf32> to vector<32x256xf32>
    %cst_46 = arith.constant dense<0xFF800000> : vector<32xf32>
    %62 = vector.multi_reduction <maximumf>, %61, %cst_46 [1] : vector<32x256xf32> to vector<32xf32>
    %63 = vector.shape_cast %62 : vector<32xf32> to vector<32x1xf32>
    %c4_47 = arith.constant 4 : index
    %c0_48 = arith.constant 0 : index
    %c0_49 = arith.constant 0 : index
    %64 = vector.load %arg1[%c4_47, %c0_48, %c0_49] : memref<8x32x256xf32, #tpu.memory_space<vmem>>, vector<1x32x256xf32>
    %65 = vector.shape_cast %64 : vector<1x32x256xf32> to vector<32x256xf32>
    %cst_50 = arith.constant dense<0xFF800000> : vector<32xf32>
    %66 = vector.multi_reduction <maximumf>, %65, %cst_50 [1] : vector<32x256xf32> to vector<32xf32>
    %67 = vector.shape_cast %66 : vector<32xf32> to vector<32x1xf32>
    %c5_51 = arith.constant 5 : index
    %c0_52 = arith.constant 0 : index
    %c0_53 = arith.constant 0 : index
    %68 = vector.load %arg1[%c5_51, %c0_52, %c0_53] : memref<8x32x256xf32, #tpu.memory_space<vmem>>, vector<1x32x256xf32>
    %69 = vector.shape_cast %68 : vector<1x32x256xf32> to vector<32x256xf32>
    %cst_54 = arith.constant dense<0xFF800000> : vector<32xf32>
    %70 = vector.multi_reduction <maximumf>, %69, %cst_54 [1] : vector<32x256xf32> to vector<32xf32>
    %71 = vector.shape_cast %70 : vector<32xf32> to vector<32x1xf32>
    %c6_55 = arith.constant 6 : index
    %c0_56 = arith.constant 0 : index
    %c0_57 = arith.constant 0 : index
    %72 = vector.load %arg1[%c6_55, %c0_56, %c0_57] : memref<8x32x256xf32, #tpu.memory_space<vmem>>, vector<1x32x256xf32>
    %73 = vector.shape_cast %72 : vector<1x32x256xf32> to vector<32x256xf32>
    %cst_58 = arith.constant dense<0xFF800000> : vector<32xf32>
    %74 = vector.multi_reduction <maximumf>, %73, %cst_58 [1] : vector<32x256xf32> to vector<32xf32>
    %75 = vector.shape_cast %74 : vector<32xf32> to vector<32x1xf32>
    %c7_59 = arith.constant 7 : index
    %c0_60 = arith.constant 0 : index
    %c0_61 = arith.constant 0 : index
    %76 = vector.load %arg1[%c7_59, %c0_60, %c0_61] : memref<8x32x256xf32, #tpu.memory_space<vmem>>, vector<1x32x256xf32>
    %77 = vector.shape_cast %76 : vector<1x32x256xf32> to vector<32x256xf32>
    %cst_62 = arith.constant dense<0xFF800000> : vector<32xf32>
    %78 = vector.multi_reduction <maximumf>, %77, %cst_62 [1] : vector<32x256xf32> to vector<32xf32>
    %79 = vector.shape_cast %78 : vector<32xf32> to vector<32x1xf32>
    %80 = tpu.concatenate %5, %11, %17, %23, %29, %35, %41, %47, %51, %55, %59, %63, %67, %71, %75, %79 in 1 : vector<32x1xf32>, vector<32x1xf32>, vector<32x1xf32>, vector<32x1xf32>, vector<32x1xf32>, vector<32x1xf32>, vector<32x1xf32>, vector<32x1xf32>, vector<32x1xf32>, vector<32x1xf32>, vector<32x1xf32>, vector<32x1xf32>, vector<32x1xf32>, vector<32x1xf32>, vector<32x1xf32>, vector<32x1xf32> -> vector<32x16xf32>
    %c0_63 = arith.constant 0 : index
    %c0_64 = arith.constant 0 : index
    %81 = vector.load %arg2[%c0_63, %c0_64] : memref<2x32xf32, #tpu.memory_space<vmem>>, vector<2x32xf32>
    %cst_65 = arith.constant dense<0.000000e+00> : vector<2x16xf32>
    %82 = tpu.matmul %81, %80, %cst_65 {dimension_numbers = #tpu.dot_dimension_numbers<[1], [0], [0], [1], [0, 0, 1, 1], [], []>} : vector<2x32xf32>, vector<32x16xf32>, vector<2x16xf32> -> vector<2x16xf32>
    %c0_66 = arith.constant 0 : index
    %c0_67 = arith.constant 0 : index
    %83 = vector.load %arg3[%c0_66, %c0_67] : memref<2x1xf32, #tpu.memory_space<vmem>>, vector<2x1xf32>
    %84 = vector.broadcast %83 : vector<2x1xf32> to vector<2x16xf32>
    %85 = arith.addf %82, %84 : vector<2x16xf32>
    %cst_68 = arith.constant 0.000000e+00 : f32
    %86 = vector.broadcast %cst_68 : f32 to vector<2x16xf32>
    %87 = arith.maximumf %85, %86 : vector<2x16xf32>
    %c0_69 = arith.constant 0 : index
    %c0_70 = arith.constant 0 : index
    %88 = vector.load %arg4[%c0_69, %c0_70] : memref<32x2xf32, #tpu.memory_space<vmem>>, vector<32x2xf32>
    %cst_71 = arith.constant dense<0.000000e+00> : vector<32x16xf32>
    %89 = tpu.matmul %88, %87, %cst_71 {dimension_numbers = #tpu.dot_dimension_numbers<[1], [0], [0], [1], [0, 0, 1, 1], [], []>} : vector<32x2xf32>, vector<2x16xf32>, vector<32x16xf32> -> vector<32x16xf32>
    %c0_72 = arith.constant 0 : index
    %c0_73 = arith.constant 0 : index
    %90 = vector.load %arg5[%c0_72, %c0_73] : memref<32x1xf32, #tpu.memory_space<vmem>>, vector<32x1xf32>
    %91 = vector.broadcast %90 : vector<32x1xf32> to vector<32x16xf32>
    %92 = arith.addf %89, %91 : vector<32x16xf32>
    %93 = vector.extract_strided_slice %92 {offsets = [0, 0], sizes = [32, 8], strides = [1, 1]} : vector<32x16xf32> to vector<32x8xf32>
    %94 = vector.extract_strided_slice %92 {offsets = [0, 8], sizes = [32, 8], strides = [1, 1]} : vector<32x16xf32> to vector<32x8xf32>
    %95 = arith.addf %93, %94 : vector<32x8xf32>
    %96 = arith.negf %95 : vector<32x8xf32>
    %97 = math.exp %96 : vector<32x8xf32>
    %cst_74 = arith.constant 1.000000e+00 : f32
    %98 = vector.broadcast %cst_74 : f32 to vector<32x8xf32>
    %99 = arith.addf %98, %97 : vector<32x8xf32>
    %100 = arith.divf %98, %99 : vector<32x8xf32>
    %c0_75 = arith.constant 0 : index
    %c0_76 = arith.constant 0 : index
    %c0_77 = arith.constant 0 : index
    %101 = vector.load %arg1[%c0_75, %c0_76, %c0_77] : memref<8x32x256xf32, #tpu.memory_space<vmem>>, vector<1x32x256xf32>
    %102 = vector.shape_cast %101 : vector<1x32x256xf32> to vector<32x256xf32>
    %103 = vector.extract_strided_slice %100 {offsets = [0, 0], sizes = [32, 1], strides = [1, 1]} : vector<32x8xf32> to vector<32x1xf32>
    %104 = vector.broadcast %103 : vector<32x1xf32> to vector<32x256xf32>
    %105 = arith.mulf %102, %104 : vector<32x256xf32>
    %c1_78 = arith.constant 1 : index
    %c0_79 = arith.constant 0 : index
    %c0_80 = arith.constant 0 : index
    %106 = vector.load %arg1[%c1_78, %c0_79, %c0_80] : memref<8x32x256xf32, #tpu.memory_space<vmem>>, vector<1x32x256xf32>
    %107 = vector.shape_cast %106 : vector<1x32x256xf32> to vector<32x256xf32>
    %108 = vector.extract_strided_slice %100 {offsets = [0, 1], sizes = [32, 1], strides = [1, 1]} : vector<32x8xf32> to vector<32x1xf32>
    %109 = vector.broadcast %108 : vector<32x1xf32> to vector<32x256xf32>
    %110 = arith.mulf %107, %109 : vector<32x256xf32>
    %c2_81 = arith.constant 2 : index
    %c0_82 = arith.constant 0 : index
    %c0_83 = arith.constant 0 : index
    %111 = vector.load %arg1[%c2_81, %c0_82, %c0_83] : memref<8x32x256xf32, #tpu.memory_space<vmem>>, vector<1x32x256xf32>
    %112 = vector.shape_cast %111 : vector<1x32x256xf32> to vector<32x256xf32>
    %113 = vector.extract_strided_slice %100 {offsets = [0, 2], sizes = [32, 1], strides = [1, 1]} : vector<32x8xf32> to vector<32x1xf32>
    %114 = vector.broadcast %113 : vector<32x1xf32> to vector<32x256xf32>
    %115 = arith.mulf %112, %114 : vector<32x256xf32>
    %c3_84 = arith.constant 3 : index
    %c0_85 = arith.constant 0 : index
    %c0_86 = arith.constant 0 : index
    %116 = vector.load %arg1[%c3_84, %c0_85, %c0_86] : memref<8x32x256xf32, #tpu.memory_space<vmem>>, vector<1x32x256xf32>
    %117 = vector.shape_cast %116 : vector<1x32x256xf32> to vector<32x256xf32>
    %118 = vector.extract_strided_slice %100 {offsets = [0, 3], sizes = [32, 1], strides = [1, 1]} : vector<32x8xf32> to vector<32x1xf32>
    %119 = vector.broadcast %118 : vector<32x1xf32> to vector<32x256xf32>
    %120 = arith.mulf %117, %119 : vector<32x256xf32>
    %c4_87 = arith.constant 4 : index
    %c0_88 = arith.constant 0 : index
    %c0_89 = arith.constant 0 : index
    %121 = vector.load %arg1[%c4_87, %c0_88, %c0_89] : memref<8x32x256xf32, #tpu.memory_space<vmem>>, vector<1x32x256xf32>
    %122 = vector.shape_cast %121 : vector<1x32x256xf32> to vector<32x256xf32>
    %123 = vector.extract_strided_slice %100 {offsets = [0, 4], sizes = [32, 1], strides = [1, 1]} : vector<32x8xf32> to vector<32x1xf32>
    %124 = vector.broadcast %123 : vector<32x1xf32> to vector<32x256xf32>
    %125 = arith.mulf %122, %124 : vector<32x256xf32>
    %c5_90 = arith.constant 5 : index
    %c0_91 = arith.constant 0 : index
    %c0_92 = arith.constant 0 : index
    %126 = vector.load %arg1[%c5_90, %c0_91, %c0_92] : memref<8x32x256xf32, #tpu.memory_space<vmem>>, vector<1x32x256xf32>
    %127 = vector.shape_cast %126 : vector<1x32x256xf32> to vector<32x256xf32>
    %128 = vector.extract_strided_slice %100 {offsets = [0, 5], sizes = [32, 1], strides = [1, 1]} : vector<32x8xf32> to vector<32x1xf32>
    %129 = vector.broadcast %128 : vector<32x1xf32> to vector<32x256xf32>
    %130 = arith.mulf %127, %129 : vector<32x256xf32>
    %c6_93 = arith.constant 6 : index
    %c0_94 = arith.constant 0 : index
    %c0_95 = arith.constant 0 : index
    %131 = vector.load %arg1[%c6_93, %c0_94, %c0_95] : memref<8x32x256xf32, #tpu.memory_space<vmem>>, vector<1x32x256xf32>
    %132 = vector.shape_cast %131 : vector<1x32x256xf32> to vector<32x256xf32>
    %133 = vector.extract_strided_slice %100 {offsets = [0, 6], sizes = [32, 1], strides = [1, 1]} : vector<32x8xf32> to vector<32x1xf32>
    %134 = vector.broadcast %133 : vector<32x1xf32> to vector<32x256xf32>
    %135 = arith.mulf %132, %134 : vector<32x256xf32>
    %c7_96 = arith.constant 7 : index
    %c0_97 = arith.constant 0 : index
    %c0_98 = arith.constant 0 : index
    %136 = vector.load %arg1[%c7_96, %c0_97, %c0_98] : memref<8x32x256xf32, #tpu.memory_space<vmem>>, vector<1x32x256xf32>
    %137 = vector.shape_cast %136 : vector<1x32x256xf32> to vector<32x256xf32>
    %138 = vector.extract_strided_slice %100 {offsets = [0, 7], sizes = [32, 1], strides = [1, 1]} : vector<32x8xf32> to vector<32x1xf32>
    %139 = vector.broadcast %138 : vector<32x1xf32> to vector<32x256xf32>
    %140 = arith.mulf %137, %139 : vector<32x256xf32>
    %141 = tpu.concatenate %105, %110, %115, %120, %125, %130, %135, %140 in 0 : vector<32x256xf32>, vector<32x256xf32>, vector<32x256xf32>, vector<32x256xf32>, vector<32x256xf32>, vector<32x256xf32>, vector<32x256xf32>, vector<32x256xf32> -> vector<256x256xf32>
    %c0_99 = arith.constant 0 : index
    %c0_100 = arith.constant 0 : index
    %142 = vector.load %arg6[%c0_99, %c0_100] : memref<128x256xf32, #tpu.memory_space<vmem>>, vector<128x256xf32>
    %cst_101 = arith.constant dense<0.000000e+00> : vector<128x256xf32>
    %143 = tpu.matmul %142, %141, %cst_101 {dimension_numbers = #tpu.dot_dimension_numbers<[1], [0], [0], [1], [0, 0, 1, 1], [], []>} : vector<128x256xf32>, vector<256x256xf32>, vector<128x256xf32> -> vector<128x256xf32>
    %c0_102 = arith.constant 0 : index
    %c0_103 = arith.constant 0 : index
    %144 = vector.load %arg7[%c0_102, %c0_103] : memref<128x1xf32, #tpu.memory_space<vmem>>, vector<128x1xf32>
    %145 = vector.broadcast %144 : vector<128x1xf32> to vector<128x256xf32>
    %146 = arith.addf %143, %145 : vector<128x256xf32>
    %147 = vector.extract_strided_slice %146 {offsets = [0, 0], sizes = [16, 256], strides = [1, 1]} : vector<128x256xf32> to vector<16x256xf32>
    %cst_104 = arith.constant dense<0.000000e+00> : vector<256xf32>
    %148 = vector.multi_reduction <add>, %147, %cst_104 [0] : vector<16x256xf32> to vector<256xf32>
    %149 = vector.shape_cast %148 : vector<256xf32> to vector<1x256xf32>
    %cst_105 = arith.constant 1.600000e+01 : f32
    %150 = vector.broadcast %cst_105 : f32 to vector<1x256xf32>
    %151 = arith.divf %149, %150 : vector<1x256xf32>
    %152 = vector.extract_strided_slice %146 {offsets = [16, 0], sizes = [16, 256], strides = [1, 1]} : vector<128x256xf32> to vector<16x256xf32>
    %cst_106 = arith.constant dense<0.000000e+00> : vector<256xf32>
    %153 = vector.multi_reduction <add>, %152, %cst_106 [0] : vector<16x256xf32> to vector<256xf32>
    %154 = vector.shape_cast %153 : vector<256xf32> to vector<1x256xf32>
    %cst_107 = arith.constant 1.600000e+01 : f32
    %155 = vector.broadcast %cst_107 : f32 to vector<1x256xf32>
    %156 = arith.divf %154, %155 : vector<1x256xf32>
    %157 = vector.extract_strided_slice %146 {offsets = [32, 0], sizes = [16, 256], strides = [1, 1]} : vector<128x256xf32> to vector<16x256xf32>
    %cst_108 = arith.constant dense<0.000000e+00> : vector<256xf32>
    %158 = vector.multi_reduction <add>, %157, %cst_108 [0] : vector<16x256xf32> to vector<256xf32>
    %159 = vector.shape_cast %158 : vector<256xf32> to vector<1x256xf32>
    %cst_109 = arith.constant 1.600000e+01 : f32
    %160 = vector.broadcast %cst_109 : f32 to vector<1x256xf32>
    %161 = arith.divf %159, %160 : vector<1x256xf32>
    %162 = vector.extract_strided_slice %146 {offsets = [48, 0], sizes = [16, 256], strides = [1, 1]} : vector<128x256xf32> to vector<16x256xf32>
    %cst_110 = arith.constant dense<0.000000e+00> : vector<256xf32>
    %163 = vector.multi_reduction <add>, %162, %cst_110 [0] : vector<16x256xf32> to vector<256xf32>
    %164 = vector.shape_cast %163 : vector<256xf32> to vector<1x256xf32>
    %cst_111 = arith.constant 1.600000e+01 : f32
    %165 = vector.broadcast %cst_111 : f32 to vector<1x256xf32>
    %166 = arith.divf %164, %165 : vector<1x256xf32>
    %167 = vector.extract_strided_slice %146 {offsets = [64, 0], sizes = [16, 256], strides = [1, 1]} : vector<128x256xf32> to vector<16x256xf32>
    %cst_112 = arith.constant dense<0.000000e+00> : vector<256xf32>
    %168 = vector.multi_reduction <add>, %167, %cst_112 [0] : vector<16x256xf32> to vector<256xf32>
    %169 = vector.shape_cast %168 : vector<256xf32> to vector<1x256xf32>
    %cst_113 = arith.constant 1.600000e+01 : f32
    %170 = vector.broadcast %cst_113 : f32 to vector<1x256xf32>
    %171 = arith.divf %169, %170 : vector<1x256xf32>
    %172 = vector.extract_strided_slice %146 {offsets = [80, 0], sizes = [16, 256], strides = [1, 1]} : vector<128x256xf32> to vector<16x256xf32>
    %cst_114 = arith.constant dense<0.000000e+00> : vector<256xf32>
    %173 = vector.multi_reduction <add>, %172, %cst_114 [0] : vector<16x256xf32> to vector<256xf32>
    %174 = vector.shape_cast %173 : vector<256xf32> to vector<1x256xf32>
    %cst_115 = arith.constant 1.600000e+01 : f32
    %175 = vector.broadcast %cst_115 : f32 to vector<1x256xf32>
    %176 = arith.divf %174, %175 : vector<1x256xf32>
    %177 = vector.extract_strided_slice %146 {offsets = [96, 0], sizes = [16, 256], strides = [1, 1]} : vector<128x256xf32> to vector<16x256xf32>
    %cst_116 = arith.constant dense<0.000000e+00> : vector<256xf32>
    %178 = vector.multi_reduction <add>, %177, %cst_116 [0] : vector<16x256xf32> to vector<256xf32>
    %179 = vector.shape_cast %178 : vector<256xf32> to vector<1x256xf32>
    %cst_117 = arith.constant 1.600000e+01 : f32
    %180 = vector.broadcast %cst_117 : f32 to vector<1x256xf32>
    %181 = arith.divf %179, %180 : vector<1x256xf32>
    %182 = vector.extract_strided_slice %146 {offsets = [112, 0], sizes = [16, 256], strides = [1, 1]} : vector<128x256xf32> to vector<16x256xf32>
    %cst_118 = arith.constant dense<0.000000e+00> : vector<256xf32>
    %183 = vector.multi_reduction <add>, %182, %cst_118 [0] : vector<16x256xf32> to vector<256xf32>
    %184 = vector.shape_cast %183 : vector<256xf32> to vector<1x256xf32>
    %cst_119 = arith.constant 1.600000e+01 : f32
    %185 = vector.broadcast %cst_119 : f32 to vector<1x256xf32>
    %186 = arith.divf %184, %185 : vector<1x256xf32>
    %187 = vector.extract_strided_slice %146 {offsets = [0, 0], sizes = [16, 256], strides = [1, 1]} : vector<128x256xf32> to vector<16x256xf32>
    %cst_120 = arith.constant dense<0xFF800000> : vector<256xf32>
    %188 = vector.multi_reduction <maximumf>, %187, %cst_120 [0] : vector<16x256xf32> to vector<256xf32>
    %189 = vector.shape_cast %188 : vector<256xf32> to vector<1x256xf32>
    %190 = vector.extract_strided_slice %146 {offsets = [16, 0], sizes = [16, 256], strides = [1, 1]} : vector<128x256xf32> to vector<16x256xf32>
    %cst_121 = arith.constant dense<0xFF800000> : vector<256xf32>
    %191 = vector.multi_reduction <maximumf>, %190, %cst_121 [0] : vector<16x256xf32> to vector<256xf32>
    %192 = vector.shape_cast %191 : vector<256xf32> to vector<1x256xf32>
    %193 = vector.extract_strided_slice %146 {offsets = [32, 0], sizes = [16, 256], strides = [1, 1]} : vector<128x256xf32> to vector<16x256xf32>
    %cst_122 = arith.constant dense<0xFF800000> : vector<256xf32>
    %194 = vector.multi_reduction <maximumf>, %193, %cst_122 [0] : vector<16x256xf32> to vector<256xf32>
    %195 = vector.shape_cast %194 : vector<256xf32> to vector<1x256xf32>
    %196 = vector.extract_strided_slice %146 {offsets = [48, 0], sizes = [16, 256], strides = [1, 1]} : vector<128x256xf32> to vector<16x256xf32>
    %cst_123 = arith.constant dense<0xFF800000> : vector<256xf32>
    %197 = vector.multi_reduction <maximumf>, %196, %cst_123 [0] : vector<16x256xf32> to vector<256xf32>
    %198 = vector.shape_cast %197 : vector<256xf32> to vector<1x256xf32>
    %199 = vector.extract_strided_slice %146 {offsets = [64, 0], sizes = [16, 256], strides = [1, 1]} : vector<128x256xf32> to vector<16x256xf32>
    %cst_124 = arith.constant dense<0xFF800000> : vector<256xf32>
    %200 = vector.multi_reduction <maximumf>, %199, %cst_124 [0] : vector<16x256xf32> to vector<256xf32>
    %201 = vector.shape_cast %200 : vector<256xf32> to vector<1x256xf32>
    %202 = vector.extract_strided_slice %146 {offsets = [80, 0], sizes = [16, 256], strides = [1, 1]} : vector<128x256xf32> to vector<16x256xf32>
    %cst_125 = arith.constant dense<0xFF800000> : vector<256xf32>
    %203 = vector.multi_reduction <maximumf>, %202, %cst_125 [0] : vector<16x256xf32> to vector<256xf32>
    %204 = vector.shape_cast %203 : vector<256xf32> to vector<1x256xf32>
    %205 = vector.extract_strided_slice %146 {offsets = [96, 0], sizes = [16, 256], strides = [1, 1]} : vector<128x256xf32> to vector<16x256xf32>
    %cst_126 = arith.constant dense<0xFF800000> : vector<256xf32>
    %206 = vector.multi_reduction <maximumf>, %205, %cst_126 [0] : vector<16x256xf32> to vector<256xf32>
    %207 = vector.shape_cast %206 : vector<256xf32> to vector<1x256xf32>
    %208 = vector.extract_strided_slice %146 {offsets = [112, 0], sizes = [16, 256], strides = [1, 1]} : vector<128x256xf32> to vector<16x256xf32>
    %cst_127 = arith.constant dense<0xFF800000> : vector<256xf32>
    %209 = vector.multi_reduction <maximumf>, %208, %cst_127 [0] : vector<16x256xf32> to vector<256xf32>
    %210 = vector.shape_cast %209 : vector<256xf32> to vector<1x256xf32>
    %211 = tpu.concatenate %151, %156, %161, %166, %171, %176, %181, %186, %189, %192, %195, %198, %201, %204, %207, %210 in 0 : vector<1x256xf32>, vector<1x256xf32>, vector<1x256xf32>, vector<1x256xf32>, vector<1x256xf32>, vector<1x256xf32>, vector<1x256xf32>, vector<1x256xf32>, vector<1x256xf32>, vector<1x256xf32>, vector<1x256xf32>, vector<1x256xf32>, vector<1x256xf32>, vector<1x256xf32>, vector<1x256xf32>, vector<1x256xf32> -> vector<16x256xf32>
    %c3_i32 = arith.constant 3 : i32
    %212 = tpu.dynamic_rotate %211 by %c3_i32 dim 1 : vector<16x256xf32>, i32 -> vector<16x256xf32>
    %c0_128 = arith.constant 0 : index
    %c0_129 = arith.constant 0 : index
    %213 = vector.load %arg9[%c0_128, %c0_129] : memref<7x256xf32, #tpu.memory_space<vmem>>, vector<1x256xf32>
    %214 = vector.broadcast %213 : vector<1x256xf32> to vector<16x256xf32>
    %215 = arith.mulf %212, %214 : vector<16x256xf32>
    %c2_i32 = arith.constant 2 : i32
    %216 = tpu.dynamic_rotate %211 by %c2_i32 dim 1 : vector<16x256xf32>, i32 -> vector<16x256xf32>
    %c1_130 = arith.constant 1 : index
    %c0_131 = arith.constant 0 : index
    %217 = vector.load %arg9[%c1_130, %c0_131] : memref<7x256xf32, #tpu.memory_space<vmem>>, vector<1x256xf32>
    %218 = vector.broadcast %217 : vector<1x256xf32> to vector<16x256xf32>
    %219 = arith.mulf %216, %218 : vector<16x256xf32>
    %c1_i32 = arith.constant 1 : i32
    %220 = tpu.dynamic_rotate %211 by %c1_i32 dim 1 : vector<16x256xf32>, i32 -> vector<16x256xf32>
    %c2_132 = arith.constant 2 : index
    %c0_133 = arith.constant 0 : index
    %221 = vector.load %arg9[%c2_132, %c0_133] : memref<7x256xf32, #tpu.memory_space<vmem>>, vector<1x256xf32>
    %222 = vector.broadcast %221 : vector<1x256xf32> to vector<16x256xf32>
    %223 = arith.mulf %220, %222 : vector<16x256xf32>
    %c0_i32 = arith.constant 0 : i32
    %224 = tpu.dynamic_rotate %211 by %c0_i32 dim 1 : vector<16x256xf32>, i32 -> vector<16x256xf32>
    %c3_134 = arith.constant 3 : index
    %c0_135 = arith.constant 0 : index
    %225 = vector.load %arg9[%c3_134, %c0_135] : memref<7x256xf32, #tpu.memory_space<vmem>>, vector<1x256xf32>
    %226 = vector.broadcast %225 : vector<1x256xf32> to vector<16x256xf32>
    %227 = arith.mulf %224, %226 : vector<16x256xf32>
    %c255_i32 = arith.constant 255 : i32
    %228 = tpu.dynamic_rotate %211 by %c255_i32 dim 1 : vector<16x256xf32>, i32 -> vector<16x256xf32>
    %c4_136 = arith.constant 4 : index
    %c0_137 = arith.constant 0 : index
    %229 = vector.load %arg9[%c4_136, %c0_137] : memref<7x256xf32, #tpu.memory_space<vmem>>, vector<1x256xf32>
    %230 = vector.broadcast %229 : vector<1x256xf32> to vector<16x256xf32>
    %231 = arith.mulf %228, %230 : vector<16x256xf32>
    %c254_i32 = arith.constant 254 : i32
    %232 = tpu.dynamic_rotate %211 by %c254_i32 dim 1 : vector<16x256xf32>, i32 -> vector<16x256xf32>
    %c5_138 = arith.constant 5 : index
    %c0_139 = arith.constant 0 : index
    %233 = vector.load %arg9[%c5_138, %c0_139] : memref<7x256xf32, #tpu.memory_space<vmem>>, vector<1x256xf32>
    %234 = vector.broadcast %233 : vector<1x256xf32> to vector<16x256xf32>
    %235 = arith.mulf %232, %234 : vector<16x256xf32>
    %c253_i32 = arith.constant 253 : i32
    %236 = tpu.dynamic_rotate %211 by %c253_i32 dim 1 : vector<16x256xf32>, i32 -> vector<16x256xf32>
    %c6_140 = arith.constant 6 : index
    %c0_141 = arith.constant 0 : index
    %237 = vector.load %arg9[%c6_140, %c0_141] : memref<7x256xf32, #tpu.memory_space<vmem>>, vector<1x256xf32>
    %238 = vector.broadcast %237 : vector<1x256xf32> to vector<16x256xf32>
    %239 = arith.mulf %236, %238 : vector<16x256xf32>
    %240 = tpu.concatenate %215, %219, %223, %227, %231, %235, %239 in 0 : vector<16x256xf32>, vector<16x256xf32>, vector<16x256xf32>, vector<16x256xf32>, vector<16x256xf32>, vector<16x256xf32>, vector<16x256xf32> -> vector<112x256xf32>
    %c0_142 = arith.constant 0 : index
    %c0_143 = arith.constant 0 : index
    %241 = vector.load %arg8[%c0_142, %c0_143] : memref<56x112xf32, #tpu.memory_space<vmem>>, vector<56x112xf32>
    %cst_144 = arith.constant dense<0.000000e+00> : vector<56x256xf32>
    %242 = tpu.matmul %241, %240, %cst_144 {dimension_numbers = #tpu.dot_dimension_numbers<[1], [0], [0], [1], [0, 0, 1, 1], [], []>} : vector<56x112xf32>, vector<112x256xf32>, vector<56x256xf32> -> vector<56x256xf32>
    %cst_145 = arith.constant 0.000000e+00 : f32
    %243 = vector.broadcast %cst_145 : f32 to vector<8x256xf32>
    %244 = vector.extract_strided_slice %242 {offsets = [0, 0], sizes = [8, 256], strides = [1, 1]} : vector<56x256xf32> to vector<8x256xf32>
    %c48_i32 = arith.constant 48 : i32
    %245 = tpu.dynamic_rotate %244 by %c48_i32 dim 1 : vector<8x256xf32>, i32 -> vector<8x256xf32>
    %c0_146 = arith.constant 0 : index
    %c0_147 = arith.constant 0 : index
    %246 = vector.load %arg10[%c0_146, %c0_147] : memref<7x256xf32, #tpu.memory_space<vmem>>, vector<1x256xf32>
    %247 = vector.broadcast %246 : vector<1x256xf32> to vector<8x256xf32>
    %248 = arith.mulf %245, %247 : vector<8x256xf32>
    %249 = arith.addf %243, %248 : vector<8x256xf32>
    %250 = vector.extract_strided_slice %242 {offsets = [8, 0], sizes = [8, 256], strides = [1, 1]} : vector<56x256xf32> to vector<8x256xf32>
    %c32_i32 = arith.constant 32 : i32
    %251 = tpu.dynamic_rotate %250 by %c32_i32 dim 1 : vector<8x256xf32>, i32 -> vector<8x256xf32>
    %c1_148 = arith.constant 1 : index
    %c0_149 = arith.constant 0 : index
    %252 = vector.load %arg10[%c1_148, %c0_149] : memref<7x256xf32, #tpu.memory_space<vmem>>, vector<1x256xf32>
    %253 = vector.broadcast %252 : vector<1x256xf32> to vector<8x256xf32>
    %254 = arith.mulf %251, %253 : vector<8x256xf32>
    %255 = arith.addf %249, %254 : vector<8x256xf32>
    %256 = vector.extract_strided_slice %242 {offsets = [16, 0], sizes = [8, 256], strides = [1, 1]} : vector<56x256xf32> to vector<8x256xf32>
    %c16_i32 = arith.constant 16 : i32
    %257 = tpu.dynamic_rotate %256 by %c16_i32 dim 1 : vector<8x256xf32>, i32 -> vector<8x256xf32>
    %c2_150 = arith.constant 2 : index
    %c0_151 = arith.constant 0 : index
    %258 = vector.load %arg10[%c2_150, %c0_151] : memref<7x256xf32, #tpu.memory_space<vmem>>, vector<1x256xf32>
    %259 = vector.broadcast %258 : vector<1x256xf32> to vector<8x256xf32>
    %260 = arith.mulf %257, %259 : vector<8x256xf32>
    %261 = arith.addf %255, %260 : vector<8x256xf32>
    %262 = vector.extract_strided_slice %242 {offsets = [24, 0], sizes = [8, 256], strides = [1, 1]} : vector<56x256xf32> to vector<8x256xf32>
    %c0_i32_152 = arith.constant 0 : i32
    %263 = tpu.dynamic_rotate %262 by %c0_i32_152 dim 1 : vector<8x256xf32>, i32 -> vector<8x256xf32>
    %c3_153 = arith.constant 3 : index
    %c0_154 = arith.constant 0 : index
    %264 = vector.load %arg10[%c3_153, %c0_154] : memref<7x256xf32, #tpu.memory_space<vmem>>, vector<1x256xf32>
    %265 = vector.broadcast %264 : vector<1x256xf32> to vector<8x256xf32>
    %266 = arith.mulf %263, %265 : vector<8x256xf32>
    %267 = arith.addf %261, %266 : vector<8x256xf32>
    %268 = vector.extract_strided_slice %242 {offsets = [32, 0], sizes = [8, 256], strides = [1, 1]} : vector<56x256xf32> to vector<8x256xf32>
    %c240_i32 = arith.constant 240 : i32
    %269 = tpu.dynamic_rotate %268 by %c240_i32 dim 1 : vector<8x256xf32>, i32 -> vector<8x256xf32>
    %c4_155 = arith.constant 4 : index
    %c0_156 = arith.constant 0 : index
    %270 = vector.load %arg10[%c4_155, %c0_156] : memref<7x256xf32, #tpu.memory_space<vmem>>, vector<1x256xf32>
    %271 = vector.broadcast %270 : vector<1x256xf32> to vector<8x256xf32>
    %272 = arith.mulf %269, %271 : vector<8x256xf32>
    %273 = arith.addf %267, %272 : vector<8x256xf32>
    %274 = vector.extract_strided_slice %242 {offsets = [40, 0], sizes = [8, 256], strides = [1, 1]} : vector<56x256xf32> to vector<8x256xf32>
    %c224_i32 = arith.constant 224 : i32
    %275 = tpu.dynamic_rotate %274 by %c224_i32 dim 1 : vector<8x256xf32>, i32 -> vector<8x256xf32>
    %c5_157 = arith.constant 5 : index
    %c0_158 = arith.constant 0 : index
    %276 = vector.load %arg10[%c5_157, %c0_158] : memref<7x256xf32, #tpu.memory_space<vmem>>, vector<1x256xf32>
    %277 = vector.broadcast %276 : vector<1x256xf32> to vector<8x256xf32>
    %278 = arith.mulf %275, %277 : vector<8x256xf32>
    %279 = arith.addf %273, %278 : vector<8x256xf32>
    %280 = vector.extract_strided_slice %242 {offsets = [48, 0], sizes = [8, 256], strides = [1, 1]} : vector<56x256xf32> to vector<8x256xf32>
    %c208_i32 = arith.constant 208 : i32
    %281 = tpu.dynamic_rotate %280 by %c208_i32 dim 1 : vector<8x256xf32>, i32 -> vector<8x256xf32>
    %c6_159 = arith.constant 6 : index
    %c0_160 = arith.constant 0 : index
    %282 = vector.load %arg10[%c6_159, %c0_160] : memref<7x256xf32, #tpu.memory_space<vmem>>, vector<1x256xf32>
    %283 = vector.broadcast %282 : vector<1x256xf32> to vector<8x256xf32>
    %284 = arith.mulf %281, %283 : vector<8x256xf32>
    %285 = arith.addf %279, %284 : vector<8x256xf32>
    %c0_161 = arith.constant 0 : index
    %286 = memref.load %arg11[%c0_161] : memref<1xf32, #tpu.memory_space<smem>>
    %287 = vector.broadcast %286 : f32 to vector<8x256xf32>
    %288 = arith.addf %285, %287 : vector<8x256xf32>
    %289 = arith.negf %288 : vector<8x256xf32>
    %290 = math.exp %289 : vector<8x256xf32>
    %cst_162 = arith.constant 1.000000e+00 : f32
    %291 = vector.broadcast %cst_162 : f32 to vector<8x256xf32>
    %292 = arith.addf %291, %290 : vector<8x256xf32>
    %293 = arith.divf %291, %292 : vector<8x256xf32>
    %294 = vector.extract_strided_slice %146 {offsets = [0, 0], sizes = [16, 256], strides = [1, 1]} : vector<128x256xf32> to vector<16x256xf32>
    %295 = vector.extract_strided_slice %293 {offsets = [0, 0], sizes = [1, 256], strides = [1, 1]} : vector<8x256xf32> to vector<1x256xf32>
    %296 = vector.broadcast %295 : vector<1x256xf32> to vector<16x256xf32>
    %297 = arith.mulf %294, %296 : vector<16x256xf32>
    %c0_163 = arith.constant 0 : index
    %c0_164 = arith.constant 0 : index
    %c0_165 = arith.constant 0 : index
    %298 = vector.load %arg12[%c0_163, %c0_164, %c0_165] : memref<8x16x256xf32, #tpu.memory_space<vmem>>, vector<1x16x256xf32>
    %299 = vector.shape_cast %298 : vector<1x16x256xf32> to vector<16x256xf32>
    %300 = vector.shape_cast %297 : vector<16x256xf32> to vector<1x16x256xf32>
    tpu.vector_store %arg12[%c0_163, %c0_164, %c0_165], %300 {strides = array<i32>} : memref<8x16x256xf32, #tpu.memory_space<vmem>>, vector<1x16x256xf32>,
    %301 = vector.extract_strided_slice %146 {offsets = [16, 0], sizes = [16, 256], strides = [1, 1]} : vector<128x256xf32> to vector<16x256xf32>
    %302 = vector.extract_strided_slice %293 {offsets = [1, 0], sizes = [1, 256], strides = [1, 1]} : vector<8x256xf32> to vector<1x256xf32>
    %303 = vector.broadcast %302 : vector<1x256xf32> to vector<16x256xf32>
    %304 = arith.mulf %301, %303 : vector<16x256xf32>
    %c1_166 = arith.constant 1 : index
    %c0_167 = arith.constant 0 : index
    %c0_168 = arith.constant 0 : index
    %305 = vector.load %arg12[%c1_166, %c0_167, %c0_168] : memref<8x16x256xf32, #tpu.memory_space<vmem>>, vector<1x16x256xf32>
    %306 = vector.shape_cast %305 : vector<1x16x256xf32> to vector<16x256xf32>
    %307 = vector.shape_cast %304 : vector<16x256xf32> to vector<1x16x256xf32>
    tpu.vector_store %arg12[%c1_166, %c0_167, %c0_168], %307 {strides = array<i32>} : memref<8x16x256xf32, #tpu.memory_space<vmem>>, vector<1x16x256xf32>,
    %308 = vector.extract_strided_slice %146 {offsets = [32, 0], sizes = [16, 256], strides = [1, 1]} : vector<128x256xf32> to vector<16x256xf32>
    %309 = vector.extract_strided_slice %293 {offsets = [2, 0], sizes = [1, 256], strides = [1, 1]} : vector<8x256xf32> to vector<1x256xf32>
    %310 = vector.broadcast %309 : vector<1x256xf32> to vector<16x256xf32>
    %311 = arith.mulf %308, %310 : vector<16x256xf32>
    %c2_169 = arith.constant 2 : index
    %c0_170 = arith.constant 0 : index
    %c0_171 = arith.constant 0 : index
    %312 = vector.load %arg12[%c2_169, %c0_170, %c0_171] : memref<8x16x256xf32, #tpu.memory_space<vmem>>, vector<1x16x256xf32>
    %313 = vector.shape_cast %312 : vector<1x16x256xf32> to vector<16x256xf32>
    %314 = vector.shape_cast %311 : vector<16x256xf32> to vector<1x16x256xf32>
    tpu.vector_store %arg12[%c2_169, %c0_170, %c0_171], %314 {strides = array<i32>} : memref<8x16x256xf32, #tpu.memory_space<vmem>>, vector<1x16x256xf32>,
    %315 = vector.extract_strided_slice %146 {offsets = [48, 0], sizes = [16, 256], strides = [1, 1]} : vector<128x256xf32> to vector<16x256xf32>
    %316 = vector.extract_strided_slice %293 {offsets = [3, 0], sizes = [1, 256], strides = [1, 1]} : vector<8x256xf32> to vector<1x256xf32>
    %317 = vector.broadcast %316 : vector<1x256xf32> to vector<16x256xf32>
    %318 = arith.mulf %315, %317 : vector<16x256xf32>
    %c3_172 = arith.constant 3 : index
    %c0_173 = arith.constant 0 : index
    %c0_174 = arith.constant 0 : index
    %319 = vector.load %arg12[%c3_172, %c0_173, %c0_174] : memref<8x16x256xf32, #tpu.memory_space<vmem>>, vector<1x16x256xf32>
    %320 = vector.shape_cast %319 : vector<1x16x256xf32> to vector<16x256xf32>
    %321 = vector.shape_cast %318 : vector<16x256xf32> to vector<1x16x256xf32>
    tpu.vector_store %arg12[%c3_172, %c0_173, %c0_174], %321 {strides = array<i32>} : memref<8x16x256xf32, #tpu.memory_space<vmem>>, vector<1x16x256xf32>,
    %322 = vector.extract_strided_slice %146 {offsets = [64, 0], sizes = [16, 256], strides = [1, 1]} : vector<128x256xf32> to vector<16x256xf32>
    %323 = vector.extract_strided_slice %293 {offsets = [4, 0], sizes = [1, 256], strides = [1, 1]} : vector<8x256xf32> to vector<1x256xf32>
    %324 = vector.broadcast %323 : vector<1x256xf32> to vector<16x256xf32>
    %325 = arith.mulf %322, %324 : vector<16x256xf32>
    %c4_175 = arith.constant 4 : index
    %c0_176 = arith.constant 0 : index
    %c0_177 = arith.constant 0 : index
    %326 = vector.load %arg12[%c4_175, %c0_176, %c0_177] : memref<8x16x256xf32, #tpu.memory_space<vmem>>, vector<1x16x256xf32>
    %327 = vector.shape_cast %326 : vector<1x16x256xf32> to vector<16x256xf32>
    %328 = vector.shape_cast %325 : vector<16x256xf32> to vector<1x16x256xf32>
    tpu.vector_store %arg12[%c4_175, %c0_176, %c0_177], %328 {strides = array<i32>} : memref<8x16x256xf32, #tpu.memory_space<vmem>>, vector<1x16x256xf32>,
    %329 = vector.extract_strided_slice %146 {offsets = [80, 0], sizes = [16, 256], strides = [1, 1]} : vector<128x256xf32> to vector<16x256xf32>
    %330 = vector.extract_strided_slice %293 {offsets = [5, 0], sizes = [1, 256], strides = [1, 1]} : vector<8x256xf32> to vector<1x256xf32>
    %331 = vector.broadcast %330 : vector<1x256xf32> to vector<16x256xf32>
    %332 = arith.mulf %329, %331 : vector<16x256xf32>
    %c5_178 = arith.constant 5 : index
    %c0_179 = arith.constant 0 : index
    %c0_180 = arith.constant 0 : index
    %333 = vector.load %arg12[%c5_178, %c0_179, %c0_180] : memref<8x16x256xf32, #tpu.memory_space<vmem>>, vector<1x16x256xf32>
    %334 = vector.shape_cast %333 : vector<1x16x256xf32> to vector<16x256xf32>
    %335 = vector.shape_cast %332 : vector<16x256xf32> to vector<1x16x256xf32>
    tpu.vector_store %arg12[%c5_178, %c0_179, %c0_180], %335 {strides = array<i32>} : memref<8x16x256xf32, #tpu.memory_space<vmem>>, vector<1x16x256xf32>,
    %336 = vector.extract_strided_slice %146 {offsets = [96, 0], sizes = [16, 256], strides = [1, 1]} : vector<128x256xf32> to vector<16x256xf32>
    %337 = vector.extract_strided_slice %293 {offsets = [6, 0], sizes = [1, 256], strides = [1, 1]} : vector<8x256xf32> to vector<1x256xf32>
    %338 = vector.broadcast %337 : vector<1x256xf32> to vector<16x256xf32>
    %339 = arith.mulf %336, %338 : vector<16x256xf32>
    %c6_181 = arith.constant 6 : index
    %c0_182 = arith.constant 0 : index
    %c0_183 = arith.constant 0 : index
    %340 = vector.load %arg12[%c6_181, %c0_182, %c0_183] : memref<8x16x256xf32, #tpu.memory_space<vmem>>, vector<1x16x256xf32>
    %341 = vector.shape_cast %340 : vector<1x16x256xf32> to vector<16x256xf32>
    %342 = vector.shape_cast %339 : vector<16x256xf32> to vector<1x16x256xf32>
    tpu.vector_store %arg12[%c6_181, %c0_182, %c0_183], %342 {strides = array<i32>} : memref<8x16x256xf32, #tpu.memory_space<vmem>>, vector<1x16x256xf32>,
    %343 = vector.extract_strided_slice %146 {offsets = [112, 0], sizes = [16, 256], strides = [1, 1]} : vector<128x256xf32> to vector<16x256xf32>
    %344 = vector.extract_strided_slice %293 {offsets = [7, 0], sizes = [1, 256], strides = [1, 1]} : vector<8x256xf32> to vector<1x256xf32>
    %345 = vector.broadcast %344 : vector<1x256xf32> to vector<16x256xf32>
    %346 = arith.mulf %343, %345 : vector<16x256xf32>
    %c7_184 = arith.constant 7 : index
    %c0_185 = arith.constant 0 : index
    %c0_186 = arith.constant 0 : index
    %347 = vector.load %arg12[%c7_184, %c0_185, %c0_186] : memref<8x16x256xf32, #tpu.memory_space<vmem>>, vector<1x16x256xf32>
    %348 = vector.shape_cast %347 : vector<1x16x256xf32> to vector<16x256xf32>
    %349 = vector.shape_cast %346 : vector<16x256xf32> to vector<1x16x256xf32>
    tpu.vector_store %arg12[%c7_184, %c0_185, %c0_186], %349 {strides = array<i32>} : memref<8x16x256xf32, #tpu.memory_space<vmem>>, vector<1x16x256xf32>,
    return
  }
  func.func @transform_0(%arg0: i32) -> (i32, i32, i32) {
    %c0_i32 = arith.constant 0 : i32
    %c0_i32_0 = arith.constant 0 : i32
    %c0_i32_1 = arith.constant 0 : i32
    return %arg0, %c0_i32, %c0_i32_0 : i32, i32, i32
  }
  func.func @transform_1(%arg0: i32) -> (i32, i32) {
    %c0_i32 = arith.constant 0 : i32
    %c0_i32_0 = arith.constant 0 : i32
    %c0_i32_1 = arith.constant 0 : i32
    return %c0_i32, %c0_i32_0 : i32, i32
  }
  func.func @transform_2(%arg0: i32) -> (i32, i32) {
    %c0_i32 = arith.constant 0 : i32
    %c0_i32_0 = arith.constant 0 : i32
    %c0_i32_1 = arith.constant 0 : i32
    return %c0_i32, %c0_i32_0 : i32, i32
  }
  func.func @transform_3(%arg0: i32) -> (i32, i32) {
    %c0_i32 = arith.constant 0 : i32
    %c0_i32_0 = arith.constant 0 : i32
    %c0_i32_1 = arith.constant 0 : i32
    return %c0_i32, %c0_i32_0 : i32, i32
  }
  func.func @transform_4(%arg0: i32) -> (i32, i32) {
    %c0_i32 = arith.constant 0 : i32
    %c0_i32_0 = arith.constant 0 : i32
    %c0_i32_1 = arith.constant 0 : i32
    return %c0_i32, %c0_i32_0 : i32, i32
  }
  func.func @transform_5(%arg0: i32) -> (i32, i32) {
    %c0_i32 = arith.constant 0 : i32
    %c0_i32_0 = arith.constant 0 : i32
    %c0_i32_1 = arith.constant 0 : i32
    return %c0_i32, %c0_i32_0 : i32, i32
  }
  func.func @transform_6(%arg0: i32) -> (i32, i32) {
    %c0_i32 = arith.constant 0 : i32
    %c0_i32_0 = arith.constant 0 : i32
    %c0_i32_1 = arith.constant 0 : i32
    return %c0_i32, %c0_i32_0 : i32, i32
  }
  func.func @transform_7(%arg0: i32) -> (i32, i32) {
    %c0_i32 = arith.constant 0 : i32
    %c0_i32_0 = arith.constant 0 : i32
    %c0_i32_1 = arith.constant 0 : i32
    return %c0_i32, %c0_i32_0 : i32, i32
  }
  func.func @transform_8(%arg0: i32) -> (i32, i32) {
    %c0_i32 = arith.constant 0 : i32
    %c0_i32_0 = arith.constant 0 : i32
    %c0_i32_1 = arith.constant 0 : i32
    return %c0_i32, %c0_i32_0 : i32, i32
  }
  func.func @transform_9(%arg0: i32) -> (i32, i32) {
    %c0_i32 = arith.constant 0 : i32
    %c0_i32_0 = arith.constant 0 : i32
    %c0_i32_1 = arith.constant 0 : i32
    return %c0_i32, %c0_i32_0 : i32, i32
  }
  func.func @transform_10(%arg0: i32) -> i32 {
    %c0_i32 = arith.constant 0 : i32
    %c0_i32_0 = arith.constant 0 : i32
    return %c0_i32 : i32
  }
  func.func @transform_11(%arg0: i32) -> (i32, i32, i32) {
    %c0_i32 = arith.constant 0 : i32
    %c0_i32_0 = arith.constant 0 : i32
    %c0_i32_1 = arith.constant 0 : i32
    return %arg0, %c0_i32, %c0_i32_0 : i32, i32, i32
  }
}

</mosaic_0001>

<bundles_post_ra>
// kernel: tile.8
= control target key start
LH: loop header
LB: loop body
LE: loop exit
PB: predicated region body
PF: predicated region fallthrough
CT: control target
= control target key end

     0   :  { %2 = vsyncpa [#allocation1], 0  ;;  %s44_s6 = smov [#allocation0]   ;;  %s70_s0 = inlined_call_operand.hbm [shape: f32[16], index: 0, kind: input, shape index: {}]   ;;  %s71_s1 = inlined_call_operand.vmem [shape: f32[8,16], index: 1, kind: output, shape index: {}]  }
   0x1   :  { %s9_s7 = sshll.u32 %s44_s6, 4  ;;  %s20_s10 = scalar_lea.hbm %s70_s0, 16  ;;  %s10_s7 = int_to_ptr.vmem [resolvable:$true] %s9_s7 }
   0x2   :  { %p21_p0 = scmp.ne.s32.totalorder %s70_s0, %s20_s10  ;;  %p24_p1 = scmp.lt.u32.totalorder %s20_s10, %s70_s0 }
   0x4   :  { %p26_p2 = pnand %p24_p1, %p21_p0 }
   0x6   :  { %29 = shalt.err (!%p26_p2)
}
   0x7   :  { %s30_s15 = scalar_lea.vmem %s10_s7, 16  ;;  %s34_s16 = scalar_lea.vmem %s10_s7, 32 }
   0x8   :  { %p31_p3 = scmp.ne.s32.totalorder %s10_s7, %s30_s15  ;;  %p35_p4 = scmp.lt.s32.totalorder %s10_s7, %s10_s7 }
   0x9   :  { %p36_p5 = scmp.lt.s32.totalorder %s34_s16, %s30_s15 }
   0xb   :  { %p37_p6 = por %p36_p5, %p35_p4 }
   0xd   :  { %p38_p7 = pnand %p37_p6, %p31_p3 }
   0xf   :  { %41 = shalt.err (!%p38_p7)
}
  0x10   :  { %12 = dma.hbm_to_vmem [thread:$0]  %s70_s0, 16, %s10_s7, [#allocation1]  }
  0x11   :  { %42 = dma.done.wait [#allocation1], 16  }
  0x12   :  { %43 = vsyncadd [#allocation1], 4294967280  ;;  %v16_v0 = vld [vmem:[#allocation0] ss:$0 sm:$0xff] }
  0x13   :  { %17 = vst [vmem:[%s71_s1] sm:$0xff] %v16_v0 }
  0x14   :  { %18 = vsyncpa [#allocation1], 1 }

// kernel: mul.15
= control target key start
LH: loop header
LB: loop body
LE: loop exit
PB: predicated region body
PF: predicated region fallthrough
CT: control target
= control target key end

     0   :  { %vm36_vm0 = vcmask 56320   ;;  %s137_s0 = inlined_call_operand.vmem [shape: f32[7,7,2], index: 0, kind: input, shape index: {}]   ;;  %s138_s1 = inlined_call_operand.vmem [shape: f32[7,14], index: 1, kind: output, shape index: {}]  }
   0x1   :  { %v73_v0 = vld [vmem:[%s137_s0 + $0xc] sm:$0x3]  ;;  %v74_v1 = vld [vmem:[%s137_s0 + $0xa] sm:$0x3]  ;;  %v75_v2 = vld [vmem:[%s137_s0 + $0x8] sm:$0x3] }
   0x2   :  { %8 = vst [vmem:[#allocation0 + $0x30] sm:$0x3] %v73_v0  ;;  %13 = vst [vmem:[#allocation0 + $0x28] sm:$0x3] %v74_v1  ;;  %v76_v3 = vld [vmem:[%s137_s0 + $0x6] sm:$0x3] }
   0x3   :  { %18 = vst [vmem:[#allocation0 + $0x20] sm:$0x3] %v75_v2  ;;  %v77_v4 = vld [vmem:[%s137_s0 + $0x4] sm:$0x3]  ;;  %v78_v5 = vld [vmem:[%s137_s0 + $0x2] sm:$0x3] }
   0x4   :  { %23 = vst [vmem:[#allocation0 + $0x18] sm:$0x3] %v76_v3  ;;  %28 = vst [vmem:[#allocation0 + $0x10] sm:$0x3] %v77_v4  ;;  %v33_v6 = vld [vmem:[%s137_s0] sm:$0x3] }
   0x5   :  { %32 = vst [vmem:[#allocation0 + $0x8] sm:$0x3] %v78_v5  ;;  %34 = vst [vmem:[#allocation0] sm:$0x3] %v33_v6 }
   0x9   :  { %v59_v8 = vld [vmem:[#allocation0 + $0x28] sm:$0x3]   ;;  %v64_v9 = vld [vmem:[#allocation0 + $0x30] sm:$0x3]  }
   0xa   :  { %v54_v7 = vld [vmem:[#allocation0 + $0x20] sm:$0x3]   ;;  %83 = vst.msk [vmem:[%s138_s1 + $0xa] sm:$0x3] %vm36_vm0, %v59_v8   ;;  %84 = vst.msk [vmem:[%s138_s1 + $0xc] sm:$0x3] %vm36_vm0, %v64_v9  }
   0xb   :  { %v44_v11 = vld [vmem:[#allocation0 + $0x10] sm:$0x3]   ;;  %v49_v12 = vld [vmem:[#allocation0 + $0x18] sm:$0x3]   ;;  %82 = vst.msk [vmem:[%s138_s1 + $0x8] sm:$0x3] %vm36_vm0, %v54_v7  }
   0xc   :  { %v39_v10 = vld [vmem:[#allocation0 + $0x8] sm:$0x3]   ;;  %v35_v13 = vld [vmem:[#allocation0] sm:$0x3]   ;;  %80 = vst.msk [vmem:[%s138_s1 + $0x4] sm:$0x3] %vm36_vm0, %v44_v11  }
   0xd   :  { %79 = vst.msk [vmem:[%s138_s1 + $0x2] sm:$0x3] %vm36_vm0, %v39_v10   ;;  %81 = vst.msk [vmem:[%s138_s1 + $0x6] sm:$0x3] %vm36_vm0, %v49_v12  }
   0xe   :  { %37 = vst.msk [vmem:[%s138_s1] sm:$0x3] %vm36_vm0, %v35_v13  }

// kernel: tile.0
= control target key start
LH: loop header
LB: loop body
LE: loop exit
PB: predicated region body
PF: predicated region fallthrough
CT: control target
= control target key end

     0   :  { %vm3_vm0 = vcmask 7168   ;;  %s264_s8 = smov 125   ;;  %s265_s17 = smov 126   ;;  %s547_s0 = inlined_call_operand.vmem [shape: f32[8,16], index: 0, kind: input, shape index: {}]   ;;  %s548_s1 = inlined_call_operand.vmem [shape: f32[128,1], index: 1, kind: output, shape index: {}]  }
   0x1   :  { %v8_v0 = vld [vmem:[%s547_s0] sm:$0xff]   ;;  %s263_s0 = smov 127   ;;  %s266_s18 = smov 124  }
   0x2   :  { %9 = vrot.lane.b32.xlu0 %v8_v0, %s263_s0  ;;  %33 = vrot.lane.b32.xlu1 %v8_v0, %s264_s8  ;;  %4 = vst.msk [vmem:[%s548_s1] ss:$16 sm:$0x3] %vm3_vm0, %v8_v0   ;;  %5 = vst.msk [vmem:[%s548_s1] ss:$16 sm:$0xc] %vm3_vm0, %v8_v0  }
   0x3   :  { %6 = vst.msk [vmem:[%s548_s1] ss:$16 sm:$0x30] %vm3_vm0, %v8_v0   ;;  %7 = vst.msk [vmem:[%s548_s1] ss:$16 sm:$0xc0] %vm3_vm0, %v8_v0  }
   0x4   :  { %s267_s19 = smov 123   ;;  %s268_s20 = smov 122  }
   0x5   :  { %s269_s21 = smov 121   ;;  %s270_s22 = smov 120  }
   0x6   :  { %21 = vrot.lane.b32.xlu0 %v8_v0, %s265_s17  ;;  %45 = vrot.lane.b32.xlu1 %v8_v0, %s266_s18  ;;  %s271_s23 = smov 119   ;;  %s272_s24 = smov 118  }
   0x7   :  { %s273_s25 = smov 117   ;;  %s274_s26 = smov 116  }
   0x8   :  { %s275_s27 = smov 115   ;;  %s276_s28 = smov 114  }
   0x9   :  { %s277_s29 = smov 113  }
   0xa   :  { %57 = vrot.lane.b32.xlu0 %v8_v0, %s267_s19  ;;  %69 = vrot.lane.b32.xlu1 %v8_v0, %s268_s20 }
   0xe   :  { %81 = vrot.lane.b32.xlu0 %v8_v0, %s269_s21  ;;  %93 = vrot.lane.b32.xlu1 %v8_v0, %s270_s22 }
  0x12   :  { %105 = vrot.lane.b32.xlu0 %v8_v0, %s271_s23  ;;  %117 = vrot.lane.b32.xlu1 %v8_v0, %s272_s24 }
  0x16   :  { %129 = vrot.lane.b32.xlu0 %v8_v0, %s273_s25  ;;  %141 = vrot.lane.b32.xlu1 %v8_v0, %s274_s26 }
  0x1a   :  { %153 = vrot.lane.b32.xlu0 %v8_v0, %s275_s27  ;;  %165 = vrot.lane.b32.xlu1 %v8_v0, %s276_s28 }
  0x1e   :  { %177 = vrot.lane.b32.xlu0 %v8_v0, %s277_s29 }
  0x74   :  { %v10_v1 = vpop.permute.xlu0 %9   ;;  %v34_v2 = vpop.permute.xlu1 %33  }
  0x75   :  { %188 = vst.msk [vmem:[%s548_s1 + $0x1] ss:$16 sm:$0x3] %vm3_vm0, %v10_v1   ;;  %189 = vst.msk [vmem:[%s548_s1 + $0x1] ss:$16 sm:$0xc] %vm3_vm0, %v10_v1  }
  0x76   :  { %190 = vst.msk [vmem:[%s548_s1 + $0x1] ss:$16 sm:$0x30] %vm3_vm0, %v10_v1   ;;  %191 = vst.msk [vmem:[%s548_s1 + $0x1] ss:$16 sm:$0xc0] %vm3_vm0, %v10_v1  }
  0x77   :  { %196 = vst.msk [vmem:[%s548_s1 + $0x3] ss:$16 sm:$0x3] %vm3_vm0, %v34_v2   ;;  %197 = vst.msk [vmem:[%s548_s1 + $0x3] ss:$16 sm:$0xc] %vm3_vm0, %v34_v2  }
  0x78   :  { %198 = vst.msk [vmem:[%s548_s1 + $0x3] ss:$16 sm:$0x30] %vm3_vm0, %v34_v2   ;;  %199 = vst.msk [vmem:[%s548_s1 + $0x3] ss:$16 sm:$0xc0] %vm3_vm0, %v34_v2   ;;  %v22_v3 = vpop.permute.xlu0 %21   ;;  %v46_v4 = vpop.permute.xlu1 %45  }
  0x79   :  { %192 = vst.msk [vmem:[%s548_s1 + $0x2] ss:$16 sm:$0x3] %vm3_vm0, %v22_v3   ;;  %193 = vst.msk [vmem:[%s548_s1 + $0x2] ss:$16 sm:$0xc] %vm3_vm0, %v22_v3  }
  0x7a   :  { %194 = vst.msk [vmem:[%s548_s1 + $0x2] ss:$16 sm:$0x30] %vm3_vm0, %v22_v3   ;;  %195 = vst.msk [vmem:[%s548_s1 + $0x2] ss:$16 sm:$0xc0] %vm3_vm0, %v22_v3  }
  0x7b   :  { %200 = vst.msk [vmem:[%s548_s1 + $0x4] ss:$16 sm:$0x3] %vm3_vm0, %v46_v4   ;;  %201 = vst.msk [vmem:[%s548_s1 + $0x4] ss:$16 sm:$0xc] %vm3_vm0, %v46_v4  }
  0x7c   :  { %202 = vst.msk [vmem:[%s548_s1 + $0x4] ss:$16 sm:$0x30] %vm3_vm0, %v46_v4   ;;  %203 = vst.msk [vmem:[%s548_s1 + $0x4] ss:$16 sm:$0xc0] %vm3_vm0, %v46_v4   ;;  %v58_v5 = vpop.permute.xlu0 %57   ;;  %v70_v6 = vpop.permute.xlu1 %69  }
  0x7d   :  { %204 = vst.msk [vmem:[%s548_s1 + $0x5] ss:$16 sm:$0x3] %vm3_vm0, %v58_v5   ;;  %205 = vst.msk [vmem:[%s548_s1 + $0x5] ss:$16 sm:$0xc] %vm3_vm0, %v58_v5  }
  0x7e   :  { %206 = vst.msk [vmem:[%s548_s1 + $0x5] ss:$16 sm:$0x30] %vm3_vm0, %v58_v5   ;;  %207 = vst.msk [vmem:[%s548_s1 + $0x5] ss:$16 sm:$0xc0] %vm3_vm0, %v58_v5  }
  0x7f   :  { %208 = vst.msk [vmem:[%s548_s1 + $0x6] ss:$16 sm:$0x3] %vm3_vm0, %v70_v6   ;;  %209 = vst.msk [vmem:[%s548_s1 + $0x6] ss:$16 sm:$0xc] %vm3_vm0, %v70_v6  }
  0x80   :  { %210 = vst.msk [vmem:[%s548_s1 + $0x6] ss:$16 sm:$0x30] %vm3_vm0, %v70_v6   ;;  %211 = vst.msk [vmem:[%s548_s1 + $0x6] ss:$16 sm:$0xc0] %vm3_vm0, %v70_v6   ;;  %v82_v7 = vpop.permute.xlu0 %81   ;;  %v94_v8 = vpop.permute.xlu1 %93  }
  0x81   :  { %212 = vst.msk [vmem:[%s548_s1 + $0x7] ss:$16 sm:$0x3] %vm3_vm0, %v82_v7   ;;  %213 = vst.msk [vmem:[%s548_s1 + $0x7] ss:$16 sm:$0xc] %vm3_vm0, %v82_v7  }
  0x82   :  { %214 = vst.msk [vmem:[%s548_s1 + $0x7] ss:$16 sm:$0x30] %vm3_vm0, %v82_v7   ;;  %215 = vst.msk [vmem:[%s548_s1 + $0x7] ss:$16 sm:$0xc0] %vm3_vm0, %v82_v7  }
  0x83   :  { %216 = vst.msk [vmem:[%s548_s1 + $0x8] ss:$16 sm:$0x3] %vm3_vm0, %v94_v8   ;;  %217 = vst.msk [vmem:[%s548_s1 + $0x8] ss:$16 sm:$0xc] %vm3_vm0, %v94_v8  }
  0x84   :  { %218 = vst.msk [vmem:[%s548_s1 + $0x8] ss:$16 sm:$0x30] %vm3_vm0, %v94_v8   ;;  %219 = vst.msk [vmem:[%s548_s1 + $0x8] ss:$16 sm:$0xc0] %vm3_vm0, %v94_v8   ;;  %v106_v9 = vpop.permute.xlu0 %105   ;;  %v118_v10 = vpop.permute.xlu1 %117  }
  0x85   :  { %220 = vst.msk [vmem:[%s548_s1 + $0x9] ss:$16 sm:$0x3] %vm3_vm0, %v106_v9   ;;  %221 = vst.msk [vmem:[%s548_s1 + $0x9] ss:$16 sm:$0xc] %vm3_vm0, %v106_v9  }
  0x86   :  { %222 = vst.msk [vmem:[%s548_s1 + $0x9] ss:$16 sm:$0x30] %vm3_vm0, %v106_v9   ;;  %223 = vst.msk [vmem:[%s548_s1 + $0x9] ss:$16 sm:$0xc0] %vm3_vm0, %v106_v9  }
  0x87   :  { %224 = vst.msk [vmem:[%s548_s1 + $0xa] ss:$16 sm:$0x3] %vm3_vm0, %v118_v10   ;;  %225 = vst.msk [vmem:[%s548_s1 + $0xa] ss:$16 sm:$0xc] %vm3_vm0, %v118_v10  }
  0x88   :  { %226 = vst.msk [vmem:[%s548_s1 + $0xa] ss:$16 sm:$0x30] %vm3_vm0, %v118_v10   ;;  %227 = vst.msk [vmem:[%s548_s1 + $0xa] ss:$16 sm:$0xc0] %vm3_vm0, %v118_v10   ;;  %v130_v11 = vpop.permute.xlu0 %129   ;;  %v142_v12 = vpop.permute.xlu1 %141  }
  0x89   :  { %228 = vst.msk [vmem:[%s548_s1 + $0xb] ss:$16 sm:$0x3] %vm3_vm0, %v130_v11   ;;  %229 = vst.msk [vmem:[%s548_s1 + $0xb] ss:$16 sm:$0xc] %vm3_vm0, %v130_v11  }
  0x8a   :  { %230 = vst.msk [vmem:[%s548_s1 + $0xb] ss:$16 sm:$0x30] %vm3_vm0, %v130_v11   ;;  %231 = vst.msk [vmem:[%s548_s1 + $0xb] ss:$16 sm:$0xc0] %vm3_vm0, %v130_v11  }
  0x8b   :  { %232 = vst.msk [vmem:[%s548_s1 + $0xc] ss:$16 sm:$0x3] %vm3_vm0, %v142_v12   ;;  %233 = vst.msk [vmem:[%s548_s1 + $0xc] ss:$16 sm:$0xc] %vm3_vm0, %v142_v12  }
  0x8c   :  { %234 = vst.msk [vmem:[%s548_s1 + $0xc] ss:$16 sm:$0x30] %vm3_vm0, %v142_v12   ;;  %235 = vst.msk [vmem:[%s548_s1 + $0xc] ss:$16 sm:$0xc0] %vm3_vm0, %v142_v12   ;;  %v154_v13 = vpop.permute.xlu0 %153   ;;  %v166_v14 = vpop.permute.xlu1 %165  }
  0x8d   :  { %236 = vst.msk [vmem:[%s548_s1 + $0xd] ss:$16 sm:$0x3] %vm3_vm0, %v154_v13   ;;  %237 = vst.msk [vmem:[%s548_s1 + $0xd] ss:$16 sm:$0xc] %vm3_vm0, %v154_v13  }
  0x8e   :  { %238 = vst.msk [vmem:[%s548_s1 + $0xd] ss:$16 sm:$0x30] %vm3_vm0, %v154_v13   ;;  %239 = vst.msk [vmem:[%s548_s1 + $0xd] ss:$16 sm:$0xc0] %vm3_vm0, %v154_v13  }
  0x8f   :  { %240 = vst.msk [vmem:[%s548_s1 + $0xe] ss:$16 sm:$0x3] %vm3_vm0, %v166_v14   ;;  %241 = vst.msk [vmem:[%s548_s1 + $0xe] ss:$16 sm:$0xc] %vm3_vm0, %v166_v14  }
  0x90   :  { %242 = vst.msk [vmem:[%s548_s1 + $0xe] ss:$16 sm:$0x30] %vm3_vm0, %v166_v14   ;;  %243 = vst.msk [vmem:[%s548_s1 + $0xe] ss:$16 sm:$0xc0] %vm3_vm0, %v166_v14   ;;  %v178_v15 = vpop.permute.xlu0 %177  }
  0x91   :  { %244 = vst.msk [vmem:[%s548_s1 + $0xf] ss:$16 sm:$0x3] %vm3_vm0, %v178_v15   ;;  %245 = vst.msk [vmem:[%s548_s1 + $0xf] ss:$16 sm:$0xc] %vm3_vm0, %v178_v15  }
  0x92   :  { %246 = vst.msk [vmem:[%s548_s1 + $0xf] ss:$16 sm:$0x30] %vm3_vm0, %v178_v15   ;;  %247 = vst.msk [vmem:[%s548_s1 + $0xf] ss:$16 sm:$0xc0] %vm3_vm0, %v178_v15  }

// kernel: cbam_forward.1
= control target key start
LH: loop header
LB: loop body
LE: loop exit
PB: predicated region body
PF: predicated region fallthrough
CT: control target
= control target key end

     0   :  { %s2981_s19 = smov 0   ;;  %s4234_s0 = inlined_call_operand.vmem [shape: f32[16,32,256], index: 0, kind: input, shape index: {}]   ;;  %s4235_s1 = inlined_call_operand.vmem [shape: f32[2,32], index: 1, kind: input, shape index: {}]   ;;  %s4236_s2 = inlined_call_operand.vmem [shape: f32[2,1], index: 2, kind: input, shape index: {}]   ;;  %s4237_s3 = inlined_call_operand.vmem [shape: f32[32,2], index: 3, kind: input, shape index: {}]   ;;  %s4238_s4 = inlined_call_operand.vmem [shape: f32[32,1], index: 4, kind: input, shape index: {}]   ;;  %s4239_s5 = inlined_call_operand.vmem [shape: f32[128,256], index: 5, kind: input, shape index: {}]   ;;  %s4240_s6 = inlined_call_operand.vmem [shape: f32[128,1], index: 6, kind: input, shape index: {}]   ;;  %s4241_s7 = inlined_call_operand.vmem [shape: f32[56,112], index: 7, kind: input, shape index: {}]   ;;  %s4242_s8 = inlined_call_operand.vmem [shape: f32[7,256], index: 8, kind: input, shape index: {}]   ;;  %s4243_s9 = inlined_call_operand.vmem [shape: f32[7,256], index: 9, kind: input, shape index: {}]   ;;  %s4244_s10 = inlined_call_operand.<no memory space> [shape: f32[1], index: 10, kind: input, shape index: {}]   ;;  %s4245_s11 = inlined_call_operand.vmem [shape: f32[16,16,256], index: 11, kind: output, shape index: {}]  }
   0x1   :  { %16 = sst [smem:[#allocation2]] %s4244_s10 }
   0x2 LB: > { %s2485_s20 = sadd.s32 4294967295, %s2892_s19   ;;  %p2489_p0 = scmp.ge.s32.totalorder %s2892_s19, 1  ;;  %s2892_s19 = sphi %s2981_s19, %s22_s19  }
   0x3   : > { %p340_p1 = scmp.lt.s32.totalorder %s2892_s19, 3 }
   0x5   : > { %p341_p2 = pnand %p2489_p0, %p340_p1 }
   0x7   : > { %344 = sbr.rel (%p341_p2) target bundleno = 1964 (0x7ac), region = 64 }
   0xe   : > { %s2490_s21 = sshll.u32 %s2485_s20, 3  ;;  %vm2895_vm0 = vmmov 0   ;;  %vm692_vm1 = vcmask 7168   ;;  %vm697_vm2 = vcmask 15360   ;;  %vm702_vm3 = vcmask 23552   ;;  %s2898_s28 = smov 120  }
   0xf   : > { %p383_p3 = scmp.lt.s32.totalorder %s2490_s21, 15  ;;  %vm707_vm4 = vcmask 31744   ;;  %vm712_vm5 = vcmask 39936   ;;  %vm717_vm6 = vcmask 48128   ;;  %vm722_vm7 = vcmask 56320   ;;  %s2906_s20 = smov 3  }
  0x10   : > { %vm727_vm8 = vcmask 64512   ;;  %vm732_vm9 = vcmask 72704   ;;  %vm737_vm10 = vcmask 80896   ;;  %vm742_vm11 = vcmask 89088   ;;  %s2908_s22 = smov 1   ;;  %s2909_s23 = smov 127  }
  0x11   : > { %s4341_s21 = smov (!%p383_p3, %s2490_s21), 15  ;;  %vm747_vm12 = vcmask 97280   ;;  %vm752_vm13 = vcmask 105472   ;;  %vm757_vm14 = vcmask 113664   ;;  %vm762_vm15 = vcmask 121856   ;;  %s2910_s25 = smov 126  }
  0x12   : > { %s2613_s10 = sshll.u32 %s4341_s21, 6  ;;  %s2911_s26 = smov 125  }
  0x13   : > { %s2995_s24 = scalar_lea.vmem %s4234_s0, %s2613_s10  ;;  %s2907_s10 = smov 2  }
  0x14   : > { %v2998_v0 = vld [vmem:[%s2995_s24 + $0x40] sm:$0xff]  ;;  %v3001_v1 = vld [vmem:[%s2995_s24 + $0x48] sm:$0xff]  ;;  %v3012_v5 = vld [vmem:[%s2995_s24 + $0x50] sm:$0xff]  ;;  %s2913_s16 = smov 32   ;;  %s2914_s17 = smov 16  }
  0x15   : > { %v3004_v2 = vld [vmem:[%s2995_s24] sm:$0xff]  ;;  %v430_v3 = vadd.f32 %v3001_v1, %v2998_v0  ;;  %v3009_v4 = vld [vmem:[%s2995_s24 + $0x8] sm:$0xff]  ;;  %v3015_v6 = vld [vmem:[%s2995_s24 + $0x58] sm:$0xff]  ;;  %s2915_s18 = smov 112  }
  0x16   : > { %v404_v7 = vadd.f32 %v3009_v4, %v3004_v2  ;;  %v3020_v8 = vld [vmem:[%s2995_s24 + $0x10] sm:$0xff]  ;;  %v3023_v9 = vld [vmem:[%s2995_s24 + $0x18] sm:$0xff]  ;;  %v433_v10 = vadd.f32 %v3015_v6, %v3012_v5  ;;  %v3036_v14 = vld [vmem:[%s2995_s24 + $0x80] sm:$0xff] }
  0x17   : > { %431 = vadd.xlane.f32.xlu1 %v430_v3  ;;  %v407_v11 = vadd.f32 %v3023_v9, %v3020_v8  ;;  %v3030_v12 = vld [vmem:[%s2995_s24 + $0x90] sm:$0xff]  ;;  %v3033_v13 = vld [vmem:[%s2995_s24 + $0x98] sm:$0xff]  ;;  %v3039_v15 = vld [vmem:[%s2995_s24 + $0x88] sm:$0xff] }
  0x18   : > { %405 = vadd.xlane.f32.xlu0 %v404_v7  ;;  %v458_v16 = vadd.f32 %v3033_v13, %v3030_v12  ;;  %v455_v17 = vadd.f32 %v3039_v15, %v3036_v14  ;;  %v3046_v18 = vld [vmem:[%s2995_s24 + $0xd0] sm:$0xff]  ;;  %v3049_v19 = vld [vmem:[%s2995_s24 + $0xd8] sm:$0xff]  ;;  %v3052_v20 = vld [vmem:[%s2995_s24 + $0xc0] sm:$0xff] }
  0x19   : > { %v3055_v21 = vld [vmem:[%s2995_s24 + $0xc8] sm:$0xff]  ;;  %v483_v22 = vadd.f32 %v3049_v19, %v3046_v18  ;;  %v3062_v24 = vld [vmem:[%s2995_s24 + $0x110] sm:$0xff]  ;;  %v3065_v25 = vld [vmem:[%s2995_s24 + $0x118] sm:$0xff] }
  0x1a   : > { %v480_v23 = vadd.f32 %v3055_v21, %v3052_v20  ;;  %v3068_v26 = vld [vmem:[%s2995_s24 + $0x100] sm:$0xff]  ;;  %v3071_v27 = vld [vmem:[%s2995_s24 + $0x108] sm:$0xff]  ;;  %v508_v28 = vadd.f32 %v3065_v25, %v3062_v24  ;;  %v3078_v30 = vld [vmem:[%s2995_s24 + $0x30] sm:$0xff] }
  0x1b   : > { %434 = vadd.xlane.f32.xlu1 %v433_v10  ;;  %v505_v29 = vadd.f32 %v3071_v27, %v3068_v26  ;;  %v3081_v31 = vld [vmem:[%s2995_s24 + $0x38] sm:$0xff]  ;;  %v3084_v32 = vld [vmem:[%s2995_s24 + $0x20] sm:$0xff]  ;;  %v3087_v33 = vld [vmem:[%s2995_s24 + $0x28] sm:$0xff] }
  0x1c   : > { %408 = vadd.xlane.f32.xlu0 %v407_v11  ;;  %4280 = vst [vmem:[#allocation3_spill] sm:$0xff] %v3087_v33  ;;  %v413_v34 = vadd.f32 %v3081_v31, %v3078_v30  ;;  %v410_v35 = vadd.f32 %v3087_v33, %v3084_v32  ;;  %v3094_v36 = vld [vmem:[%s2995_s24 + $0x70] sm:$0xff]  ;;  %v3097_v37 = vld [vmem:[%s2995_s24 + $0x78] sm:$0xff]  ;;  %v3100_v38 = vld [vmem:[%s2995_s24 + $0x60] sm:$0xff] }
  0x1d   : > { %v3103_v39 = vld [vmem:[%s2995_s24 + $0x68] sm:$0xff]  ;;  %v439_v40 = vadd.f32 %v3097_v37, %v3094_v36  ;;  %v3110_v42 = vld [vmem:[%s2995_s24 + $0x150] sm:$0xff]  ;;  %v3113_v43 = vld [vmem:[%s2995_s24 + $0x158] sm:$0xff] }
  0x1e   : > { %v436_v41 = vadd.f32 %v3103_v39, %v3100_v38  ;;  %v3116_v44 = vld [vmem:[%s2995_s24 + $0x140] sm:$0xff]  ;;  %v3119_v45 = vld [vmem:[%s2995_s24 + $0x148] sm:$0xff]  ;;  %v533_v46 = vadd.f32 %v3113_v43, %v3110_v42  ;;  %v3126_v48 = vld [vmem:[%s2995_s24 + $0xb0] sm:$0xff] }
  0x1f   : > { %459 = vadd.xlane.f32.xlu1 %v458_v16  ;;  %v530_v47 = vadd.f32 %v3119_v45, %v3116_v44  ;;  %v3129_v49 = vld [vmem:[%s2995_s24 + $0xb8] sm:$0xff]  ;;  %v3132_v50 = vld [vmem:[%s2995_s24 + $0xa0] sm:$0xff]  ;;  %v3135_v51 = vld [vmem:[%s2995_s24 + $0xa8] sm:$0xff] }
  0x20   : > { %456 = vadd.xlane.f32.xlu0 %v455_v17  ;;  %v464_v52 = vadd.f32 %v3129_v49, %v3126_v48  ;;  %v461_v53 = vadd.f32 %v3135_v51, %v3132_v50  ;;  %v3142_v54 = vld [vmem:[%s2995_s24 + $0x190] sm:$0xff]  ;;  %v3145_v55 = vld [vmem:[%s2995_s24 + $0x198] sm:$0xff]  ;;  %v3148_v56 = vld [vmem:[%s2995_s24 + $0x180] sm:$0xff] }
  0x21   : > { %v3151_v57 = vld [vmem:[%s2995_s24 + $0x188] sm:$0xff]  ;;  %v558_v58 = vadd.f32 %v3145_v55, %v3142_v54  ;;  %v3158_v60 = vld [vmem:[%s2995_s24 + $0xf0] sm:$0xff]  ;;  %v3161_v61 = vld [vmem:[%s2995_s24 + $0xf8] sm:$0xff] }
  0x22   : > { %v555_v59 = vadd.f32 %v3151_v57, %v3148_v56  ;;  %v3164_v62 = vld [vmem:[%s2995_s24 + $0xe0] sm:$0xff]  ;;  %v3167_v63 = vld [vmem:[%s2995_s24 + $0xe8] sm:$0xff]  ;;  %v489_v3 = vadd.f32 %v3161_v61, %v3158_v60  ;;  %v3174_v10 = vld [vmem:[%s2995_s24 + $0x1d0] sm:$0xff] }
  0x23   : > { %484 = vadd.xlane.f32.xlu1 %v483_v22  ;;  %v486_v7 = vadd.f32 %v3167_v63, %v3164_v62  ;;  %v3177_v11 = vld [vmem:[%s2995_s24 + $0x1d8] sm:$0xff]  ;;  %v3180_v16 = vld [vmem:[%s2995_s24 + $0x1c0] sm:$0xff]  ;;  %v3183_v17 = vld [vmem:[%s2995_s24 + $0x1c8] sm:$0xff] }
  0x24   : > { %481 = vadd.xlane.f32.xlu0 %v480_v23  ;;  %v583_v22 = vadd.f32 %v3177_v11, %v3174_v10  ;;  %v580_v23 = vadd.f32 %v3183_v17, %v3180_v16 }
  0x27   : > { %509 = vadd.xlane.f32.xlu1 %v508_v28  ;;  %v3190_v28 = vld [vmem:[%s2995_s24 + $0x130] sm:$0xff] }
  0x28   : > { %506 = vadd.xlane.f32.xlu0 %v505_v29  ;;  %v3193_v29 = vld [vmem:[%s2995_s24 + $0x138] sm:$0xff] }
  0x2b   : > { %414 = vadd.xlane.f32.xlu1 %v413_v34  ;;  %v3196_v34 = vld [vmem:[%s2995_s24 + $0x120] sm:$0xff] }
  0x2c   : > { %411 = vadd.xlane.f32.xlu0 %v410_v35  ;;  %4281 = vst [vmem:[#allocation4_spill] sm:$0xff] %v3196_v34  ;;  %v3199_v35 = vld [vmem:[%s2995_s24 + $0x128] sm:$0xff] }
  0x2f   : > { %440 = vadd.xlane.f32.xlu1 %v439_v40  ;;  %v514_v40 = vadd.f32 %v3193_v29, %v3190_v28 }
  0x30   : > { %437 = vadd.xlane.f32.xlu0 %v436_v41  ;;  %v511_v41 = vadd.f32 %v3199_v35, %v3196_v34  ;;  %v3251_v34 = vld [vmem:[%s2995_s24 + $0x1e8] sm:$0xff] }
  0x33   : > { %534 = vadd.xlane.f32.xlu1 %v533_v46  ;;  %v3206_v46 = vld [vmem:[%s2995_s24 + $0x170] sm:$0xff] }
  0x34   : > { %531 = vadd.xlane.f32.xlu0 %v530_v47  ;;  %4282 = vst [vmem:[#allocation5_spill] sm:$0xff] %v3206_v46  ;;  %v3209_v47 = vld [vmem:[%s2995_s24 + $0x178] sm:$0xff] }
  0x35   : > { %4283 = vst [vmem:[#allocation6_spill] sm:$0xff] %v3209_v47 }
  0x37   : > { %465 = vadd.xlane.f32.xlu1 %v464_v52  ;;  %v3212_v52 = vld [vmem:[%s2995_s24 + $0x160] sm:$0xff] }
  0x38   : > { %462 = vadd.xlane.f32.xlu0 %v461_v53  ;;  %4284 = vst [vmem:[#allocation7_spill] sm:$0xff] %v3212_v52  ;;  %v3215_v53 = vld [vmem:[%s2995_s24 + $0x168] sm:$0xff] }
  0x39   : > { %4285 = vst [vmem:[#allocation8_spill] sm:$0xff] %v3215_v53 }
  0x3b   : > { %559 = vadd.xlane.f32.xlu1 %v558_v58  ;;  %v539_v58 = vadd.f32 %v3209_v47, %v3206_v46  ;;  %v3242_v46 = vld [vmem:[%s2995_s24 + $0x1f0] sm:$0xff]  ;;  %v3245_v47 = vld [vmem:[%s2995_s24 + $0x1f8] sm:$0xff] }
  0x3c   : > { %556 = vadd.xlane.f32.xlu0 %v555_v59  ;;  %v536_v59 = vadd.f32 %v3215_v53, %v3212_v52  ;;  %v599_v52 = vmax.f32 %v3020_v8, %v3023_v9  ;;  %v596_v53 = vmax.f32 %v3004_v2, %v3009_v4  ;;  %v611_v2 = vmax.f32 %v3012_v5, %v3015_v6 }
  0x3d   : > { %v608_v4 = vmax.f32 %v2998_v0, %v3001_v1  ;;  %v623_v9 = vmax.f32 %v3030_v12, %v3033_v13  ;;  %v632_v5 = vmax.f32 %v3052_v20, %v3055_v21  ;;  %v605_v0 = vmax.f32 %v3078_v30, %v3081_v31 }
  0x3e   : > { %v602_v1 = vmax.f32 %v3084_v32, %v3087_v33  ;;  %v647_v6 = vmax.f32 %v3062_v24, %v3065_v25  ;;  %v644_v12 = vmax.f32 %v3068_v26, %v3071_v27  ;;  %v617_v13 = vmax.f32 %v3094_v36, %v3097_v37 }
  0x3f   : > { %490 = vadd.xlane.f32.xlu1 %v489_v3  ;;  %v3222_v3 = vld [vmem:[%s2995_s24 + $0x1b0] sm:$0xff]  ;;  %v626_v20 = vmax.f32 %v3132_v50, %v3135_v51  ;;  %v671_v21 = vmax.f32 %v3142_v54, %v3145_v55  ;;  %v668_v24 = vmax.f32 %v3148_v56, %v3151_v57  ;;  %v641_v25 = vmax.f32 %v3158_v60, %v3161_v61 }
  0x40   : > { %487 = vadd.xlane.f32.xlu0 %v486_v7  ;;  %v3225_v7 = vld [vmem:[%s2995_s24 + $0x1b8] sm:$0xff]  ;;  %v638_v26 = vmax.f32 %v3164_v62, %v3167_v63  ;;  %v683_v27 = vmax.f32 %v3174_v10, %v3177_v11  ;;  %v680_v36 = vmax.f32 %v3180_v16, %v3183_v17  ;;  %v653_v37 = vmax.f32 %v3190_v28, %v3193_v29  ;;  %v768_v63 = vld [vmem:[%s4236_s2] sm:$0x3] }
  0x41   : > { %v677_v50 = vmax.f32 %v3222_v3, %v3225_v7  ;;  %v689_v54 = vmax.f32 %v3242_v46, %v3245_v47  ;;  %v4255_v56 = vmov 0.0|0.0   ;;  %v4253_v61 = vmov 0.0  }
  0x42   : > { %2644 = vmatprep.subr.bf16.mxu0 %v4255_v56  ;;  %2633 = vmatprep.mubr.msk.f32.mxu0 %vm2895_vm0, %v4253_v61  ;;  %v4251_v11 = vmov 0   ;;  %vm774_vm0 = vcmask 261120  }
  0x43   : > { %584 = vadd.xlane.f32.xlu1 %v583_v22  ;;  %v3228_v22 = vld [vmem:[%s2995_s24 + $0x1a0] sm:$0xff]  ;;  %2774 = vset.pattern.permute.xlu0 %v4251_v11 }
  0x44   : > { %581 = vadd.xlane.f32.xlu0 %v580_v23  ;;  %v3231_v23 = vld [vmem:[%s2995_s24 + $0x1a8] sm:$0xff]  ;;  %2775 = vset.pattern.permute.xlu1 %v4251_v11 }
  0x45   : > { %v674_v51 = vmax.f32 %v3228_v22, %v3231_v23 }
  0x47   : > { %515 = vadd.xlane.f32.xlu1 %v514_v40  ;;  %v564_v40 = vadd.f32 %v3225_v7, %v3222_v3 }
  0x48   : > { %512 = vadd.xlane.f32.xlu0 %v511_v41  ;;  %v561_v41 = vadd.f32 %v3231_v23, %v3228_v22 }
  0x4b   : > { %540 = vadd.xlane.f32.xlu1 %v539_v58  ;;  %v3248_v58 = vld [vmem:[%s2995_s24 + $0x1e0] sm:$0xff] }
  0x4c   : > { %537 = vadd.xlane.f32.xlu0 %v536_v59  ;;  %v589_v59 = vadd.f32 %v3245_v47, %v3242_v46  ;;  %v586_v8 = vadd.f32 %v3251_v34, %v3248_v58  ;;  %v686_v55 = vmax.f32 %v3248_v58, %v3251_v34 }
  0x4f   : > { %565 = vadd.xlane.f32.xlu1 %v564_v40 }
  0x50   : > { %562 = vadd.xlane.f32.xlu0 %v561_v41 }
  0x53   : > { %600 = vmax.xlane.f32.xlu1 %v599_v52  ;;  %v620_v52 = vmax.f32 %v3036_v14, %v3039_v15  ;;  %v614_v14 = vmax.f32 %v3100_v38, %v3103_v39  ;;  %v659_v15 = vmax.f32 %v3110_v42, %v3113_v43  ;;  %v4286_v38 = vld [vmem:[#allocation4_spill] sm:$0xff]  ;;  %v4287_v42 = vld [vmem:[#allocation6_spill] sm:$0xff]  ;;  %v4288_v43 = vld [vmem:[#allocation5_spill] sm:$0xff] }
  0x54   : > { %597 = vmax.xlane.f32.xlu0 %v596_v53  ;;  %v635_v53 = vmax.f32 %v3046_v18, %v3049_v19  ;;  %v656_v18 = vmax.f32 %v3116_v44, %v3119_v45  ;;  %v629_v19 = vmax.f32 %v3126_v48, %v3129_v49  ;;  %v650_v39 = vmax.f32 %v4286_v38, %v3199_v35  ;;  %v4289_v45 = vld [vmem:[#allocation8_spill] sm:$0xff]  ;;  %v4290_v48 = vld [vmem:[#allocation7_spill] sm:$0xff] }
  0x55   : > { %v665_v44 = vmax.f32 %v4288_v43, %v4287_v42  ;;  %v662_v49 = vmax.f32 %v4290_v48, %v4289_v45 }
  0x57   : > { %590 = vadd.xlane.f32.xlu1 %v589_v59 }
  0x58   : > { %587 = vadd.xlane.f32.xlu0 %v586_v8 }
  0x5b   : > { %612 = vmax.xlane.f32.xlu1 %v611_v2 }
  0x5c   : > { %609 = vmax.xlane.f32.xlu0 %v608_v4 }
  0x5f   : > { %624 = vmax.xlane.f32.xlu1 %v623_v9 }
  0x60   : > { %621 = vmax.xlane.f32.xlu0 %v620_v52 }
  0x63   : > { %636 = vmax.xlane.f32.xlu1 %v635_v53 }
  0x64   : > { %633 = vmax.xlane.f32.xlu0 %v632_v5 }
  0x67   : > { %606 = vmax.xlane.f32.xlu1 %v605_v0 }
  0x68   : > { %603 = vmax.xlane.f32.xlu0 %v602_v1 }
  0x6b   : > { %648 = vmax.xlane.f32.xlu1 %v647_v6 }
  0x6c   : > { %645 = vmax.xlane.f32.xlu0 %v644_v12 }
  0x6f   : > { %618 = vmax.xlane.f32.xlu1 %v617_v13 }
  0x70   : > { %615 = vmax.xlane.f32.xlu0 %v614_v14 }
  0x73   : > { %660 = vmax.xlane.f32.xlu1 %v659_v15 }
  0x74   : > { %657 = vmax.xlane.f32.xlu0 %v656_v18 }
  0x77   : > { %630 = vmax.xlane.f32.xlu1 %v629_v19 }
  0x78   : > { %627 = vmax.xlane.f32.xlu0 %v626_v20 }
  0x7b   : > { %672 = vmax.xlane.f32.xlu1 %v671_v21 }
  0x7c   : > { %669 = vmax.xlane.f32.xlu0 %v668_v24 }
  0x7f   : > { %642 = vmax.xlane.f32.xlu1 %v641_v25 }
  0x80   : > { %639 = vmax.xlane.f32.xlu0 %v638_v26 }
  0x83   : > { %684 = vmax.xlane.f32.xlu1 %v683_v27 }
  0x84   : > { %681 = vmax.xlane.f32.xlu0 %v680_v36 }
  0x87   : > { %654 = vmax.xlane.f32.xlu1 %v653_v37 }
  0x88   : > { %651 = vmax.xlane.f32.xlu0 %v650_v39 }
  0x8b   : > { %666 = vmax.xlane.f32.xlu1 %v665_v44 }
  0x8c   : > { %663 = vmax.xlane.f32.xlu0 %v662_v49 }
  0x8f   : > { %678 = vmax.xlane.f32.xlu1 %v677_v50 }
  0x90   : > { %675 = vmax.xlane.f32.xlu0 %v674_v51 }
  0x93   : > { %690 = vmax.xlane.f32.xlu1 %v689_v54 }
  0x94   : > { %687 = vmax.xlane.f32.xlu0 %v686_v55 }
  0xa4   : > { %v432_v57 = vpop.xlane.xlu1 %431 }
  0xa5   : > { %v406_v60 = vpop.xlane.xlu0 %405  ;;  %v442_v44 = vmul.f32 0.00390625, %v432_v57 }
  0xa6   : > { %v417_v45 = vmul.f32 0.00390625, %v406_v60 }
  0xa8   : > { %v435_v62 = vpop.xlane.xlu1 %434  ;;  %v693_v57 = vsel %vm692_vm1, %v417_v45, %v442_v44 }
  0xa9   : > { %v409_v10 = vpop.xlane.xlu0 %408  ;;  %v443_v42 = vmul.f32 0.00390625, %v435_v62 }
  0xaa   : > { %771 = vperm.xlu0 %2774, %v768_v63   ;;  %v418_v43 = vmul.f32 0.00390625, %v409_v10 }
  0xac   : > { %v460_v16 = vpop.xlane.xlu1 %459  ;;  %v694_v11 = vsel %vm692_vm1, %v418_v43, %v443_v42 }
  0xad   : > { %v457_v17 = vpop.xlane.xlu0 %456  ;;  %v468_v48 = vmul.f32 0.00390625, %v460_v16 }
  0xae   : > { %v467_v50 = vmul.f32 0.00390625, %v457_v17 }
  0xaf   : > { %v699_v60 = vsel %vm697_vm2, %v694_v11, %v468_v48 }
  0xb0   : > { %v485_v28 = vpop.xlane.xlu1 %484  ;;  %v698_v17 = vsel %vm697_vm2, %v693_v57, %v467_v50 }
  0xb1   : > { %v482_v29 = vpop.xlane.xlu0 %481  ;;  %v493_v51 = vmul.f32 0.00390625, %v485_v28 }
  0xb2   : > { %v492_v55 = vmul.f32 0.00390625, %v482_v29 }
  0xb3   : > { %v704_v28 = vsel %vm702_vm3, %v699_v60, %v493_v51 }
  0xb4   : > { %v510_v34 = vpop.xlane.xlu1 %509 }
  0xb5   : > { %v507_v35 = vpop.xlane.xlu0 %506  ;;  %v518_v63 = vmul.f32 0.00390625, %v510_v34 }
  0xb6   : > { %v517_v61 = vmul.f32 0.00390625, %v507_v35  ;;  %v703_v35 = vsel %vm702_vm3, %v698_v17, %v492_v55 }
  0xb8   : > { %v3324_v46 = vpop.xlane.xlu1 %414  ;;  %v708_v11 = vsel %vm707_vm4, %v703_v35, %v517_v61 }
  0xb9   : > { %v3326_v47 = vpop.xlane.xlu0 %411 }
  0xbc   : > { %v3328_v3 = vpop.xlane.xlu1 %440 }
  0xbd   : > { %v3330_v7 = vpop.xlane.xlu0 %437 }
  0xc0   : > { %v535_v22 = vpop.xlane.xlu1 %534 }
  0xc1   : > { %v532_v23 = vpop.xlane.xlu0 %531  ;;  %v543_v56 = vmul.f32 0.00390625, %v535_v22  ;;  %v709_v22 = vsel %vm707_vm4, %v704_v28, %v518_v63 }
  0xc2   : > { %v542_v62 = vmul.f32 0.00390625, %v532_v23 }
  0xc3   : > { %v714_v23 = vsel %vm712_vm5, %v709_v22, %v543_v56 }
  0xc4   : > { %v3332_v40 = vpop.xlane.xlu1 %465 }
  0xc5   : > { %v3334_v41 = vpop.xlane.xlu0 %462 }
  0xc8   : > { %v560_v58 = vpop.xlane.xlu1 %559 }
  0xc9   : > { %v557_v59 = vpop.xlane.xlu0 %556  ;;  %v568_v10 = vmul.f32 0.00390625, %v560_v58  ;;  %v713_v58 = vsel %vm712_vm5, %v708_v11, %v542_v62  ;;  %v470_v62 = vmul.f32 0.00390625, %v3332_v40 }
  0xca   : > { %v567_v29 = vmul.f32 0.00390625, %v557_v59 }
  0xcb   : > { %v719_v43 = vsel %vm717_vm6, %v714_v23, %v568_v10 }
  0xcc   : > { %v3336_v8 = vpop.xlane.xlu1 %490  ;;  %v718_v44 = vsel %vm717_vm6, %v713_v58, %v567_v29 }
  0xcd   : > { %v3338_v2 = vpop.xlane.xlu0 %487 }
  0xd0   : > { %v585_v4 = vpop.xlane.xlu1 %584 }
  0xd1   : > { %v582_v9 = vpop.xlane.xlu0 %581  ;;  %v593_v34 = vmul.f32 0.00390625, %v585_v4 }
  0xd2   : > { %v592_v42 = vmul.f32 0.00390625, %v582_v9 }
  0xd3   : > { %v724_v4 = vsel %vm722_vm7, %v719_v43, %v593_v34 }
  0xd4   : > { %v3340_v52 = vpop.xlane.xlu1 %515  ;;  %v723_v48 = vsel %vm722_vm7, %v718_v44, %v592_v42 }
  0xd5   : > { %v3342_v53 = vpop.xlane.xlu0 %512  ;;  %v520_v40 = vmul.f32 0.00390625, %v3340_v52 }
  0xd6   : > { %v519_v34 = vmul.f32 0.00390625, %v3342_v53 }
  0xd8   : > { %v3344_v5 = vpop.xlane.xlu1 %540 }
  0xd9   : > { %v3346_v0 = vpop.xlane.xlu0 %537 }
  0xda   : > { %v544_v42 = vmul.f32 0.00390625, %v3346_v0  ;;  %v4291_v0 = vmov 0.0|0.0  }
  0xdc   : > { %v3348_v1 = vpop.xlane.xlu1 %565 }
  0xdd   : > { %v3350_v6 = vpop.xlane.xlu0 %562 }
  0xde   : > { %v569_v23 = vmul.f32 0.00390625, %v3350_v6 }
  0xe0   : > { %v601_v12 = vpop.xlane.xlu1 %600 }
  0xe1   : > { %v3352_v13 = vpop.xlane.xlu0 %597  ;;  %v729_v9 = vsel %vm727_vm8, %v724_v4, %v601_v12 }
  0xe2   : > { %v728_v56 = vsel %vm727_vm8, %v723_v48, %v3352_v13 }
  0xe4   : > { %v3354_v14 = vpop.xlane.xlu1 %590 }
  0xe5   : > { %v3356_v15 = vpop.xlane.xlu0 %587  ;;  %v595_v53 = vmul.f32 0.00390625, %v3354_v14 }
  0xe8   : > { %v613_v18 = vpop.xlane.xlu1 %612 }
  0xe9   : > { %v3358_v19 = vpop.xlane.xlu0 %609  ;;  %v734_v61 = vsel %vm732_vm9, %v729_v9, %v613_v18 }
  0xea   : > { %v733_v50 = vsel %vm732_vm9, %v728_v56, %v3358_v19  ;;  %v420_v19 = vmul.f32 0.00390625, %v3324_v46  ;;  %v495_v46 = vmul.f32 0.00390625, %v3336_v8 }
  0xec   : > { %v3360_v20 = vpop.xlane.xlu1 %624 }
  0xed   : > { %v3362_v21 = vpop.xlane.xlu0 %621  ;;  %v739_v51 = vsel %vm737_vm10, %v734_v61, %v3360_v20  ;;  %v445_v20 = vmul.f32 0.00390625, %v3328_v3 }
  0xee   : > { %v738_v12 = vsel %vm737_vm10, %v733_v50, %v3362_v21 }
  0xef   : > { %v696_v29 = vsel %vm692_vm1, %v420_v19, %v445_v20 }
  0xf0   : > { %v3364_v24 = vpop.xlane.xlu1 %636  ;;  %v701_v22 = vsel %vm697_vm2, %v696_v29, %v470_v62  ;;  %v852_v29 = vld [vmem:[%s4237_s3 + $0x18] sm:$0xff] }
  0xf1   : > { %v3366_v25 = vpop.xlane.xlu0 %633  ;;  %v744_v63 = vsel %vm742_vm11, %v739_v51, %v3364_v24  ;;  %v444_v24 = vmul.f32 0.00390625, %v3330_v7  ;;  %v494_v7 = vmul.f32 0.00390625, %v3338_v2  ;;  %v706_v11 = vsel %vm702_vm3, %v701_v22, %v495_v46  ;;  %v856_v46 = vld [vmem:[%s4238_s4 + $0x18] sm:$0xff] }
  0xf2   : > { %v743_v13 = vsel %vm742_vm11, %v738_v12, %v3366_v25  ;;  %v711_v43 = vsel %vm707_vm4, %v706_v11, %v520_v40  ;;  %v850_v40 = vld [vmem:[%s4237_s3 + $0x8] sm:$0xff] }
  0xf4   : > { %v3368_v26 = vpop.xlane.xlu1 %606 }
  0xf5   : > { %v3370_v27 = vpop.xlane.xlu0 %603 }
  0xf8   : > { %v3372_v36 = vpop.xlane.xlu1 %648 }
  0xf9   : > { %v3374_v37 = vpop.xlane.xlu0 %645  ;;  %v749_v18 = vsel %vm747_vm12, %v744_v63, %v3372_v36  ;;  %v469_v36 = vmul.f32 0.00390625, %v3334_v41  ;;  %v545_v41 = vmul.f32 0.00390625, %v3344_v5 }
  0xfa   : > { %v748_v60 = vsel %vm747_vm12, %v743_v13, %v3374_v37 }
  0xfb   : > { %v716_v4 = vsel %vm712_vm5, %v711_v43, %v545_v41 }
  0xfc   : > { %v3376_v38 = vpop.xlane.xlu1 %618 }
  0xfd   : > { %v3378_v39 = vpop.xlane.xlu0 %615 }
 0x100   : > { %v661_v49 = vpop.xlane.xlu1 %660 }
 0x101   : > { %v658_v54 = vpop.xlane.xlu0 %657  ;;  %v754_v21 = vsel %vm752_vm13, %v749_v18, %v661_v49  ;;  %v419_v49 = vmul.f32 0.00390625, %v3326_v47  ;;  %v570_v47 = vmul.f32 0.00390625, %v3348_v1 }
 0x102   : > { %v753_v10 = vsel %vm752_vm13, %v748_v60, %v658_v54 }
 0x103   : > { %v695_v35 = vsel %vm692_vm1, %v419_v49, %v444_v24  ;;  %v721_v6 = vsel %vm717_vm6, %v716_v4, %v570_v47  ;;  %vm889_vm1 = vcmask 1041408  }
 0x104   : > { %v3383_v16 = vpop.xlane.xlu1 %630  ;;  %v700_v52 = vsel %vm697_vm2, %v695_v35, %v469_v36  ;;  %v726_v14 = vsel %vm722_vm7, %v721_v6, %v595_v53  ;;  %v855_v36 = vld [vmem:[%s4238_s4 + $0x10] sm:$0xff] }
 0x105   : > { %v3387_v33 = vpop.xlane.xlu0 %627  ;;  %v705_v58 = vsel %vm702_vm3, %v700_v52, %v494_v7  ;;  %v731_v56 = vsel %vm727_vm8, %v726_v14, %v3368_v26  ;;  %vm1753_vm3 = vcmask 1042432  }
 0x106   : > { %v710_v1 = vsel %vm707_vm4, %v705_v58, %v519_v34  ;;  %v736_v50 = vsel %vm732_vm9, %v731_v56, %v3376_v38  ;;  %v4292_v34 = vmov 0.0   ;;  %vm1756_vm4 = vcmask 1043456  }
 0x107   : > { %v715_v44 = vsel %vm712_vm5, %v710_v1, %v544_v42  ;;  %v741_v12 = vsel %vm737_vm10, %v736_v50, %v3383_v16  ;;  %vm1759_vm5 = vcmask 1044480  }
 0x108   : > { %v673_v59 = vpop.xlane.xlu1 %672  ;;  %v720_v9 = vsel %vm717_vm6, %v715_v44, %v569_v23  ;;  %vm1762_vm6 = vcmask 1045504  }
 0x109   : > { %v670_v45 = vpop.xlane.xlu0 %669  ;;  %v759_v25 = vsel %vm757_vm14, %v754_v21, %v673_v59  ;;  %v594_v59 = vmul.f32 0.00390625, %v3356_v15 }
 0x10a   : > { %v758_v3 = vsel %vm757_vm14, %v753_v10, %v670_v45  ;;  %v849_v10 = vld [vmem:[%s4237_s3] sm:$0xff] }
 0x10b   : > { %v725_v15 = vsel %vm722_vm7, %v720_v9, %v594_v59  ;;  %vm1765_vm7 = vcmask 1046528  }
 0x10c   : > { %v643_v55 = vpop.xlane.xlu1 %642  ;;  %v730_v61 = vsel %vm727_vm8, %v725_v15, %v3370_v27 }
 0x10d   : > { %v640_v57 = vpop.xlane.xlu0 %639  ;;  %v735_v51 = vsel %vm732_vm9, %v730_v61, %v3378_v39  ;;  %v746_v26 = vsel %vm742_vm11, %v741_v12, %v643_v55 }
 0x10e   : > { %v740_v13 = vsel %vm737_vm10, %v735_v51, %v3387_v33 }
 0x10f   : > { %v745_v19 = vsel %vm742_vm11, %v740_v13, %v640_v57  ;;  %v767_v57 = vld [vmem:[%s4235_s1] sm:$0x3] }
 0x110   : > { %v685_v17 = vpop.xlane.xlu1 %684 }
 0x111   : > { %v764_v28 = vsel %vm762_vm15, %v759_v25, %v685_v17  ;;  %v682_v37 = vpop.xlane.xlu0 %681  ;;  %v853_v25 = vld [vmem:[%s4238_s4] sm:$0xff]  ;;  %v854_v17 = vld [vmem:[%s4238_s4 + $0x8] sm:$0xff] }
 0x112   : > { %v763_v54 = vsel %vm762_vm15, %v758_v3, %v682_v37  ;;  %859 = vperm.xlu1 %2775, %v853_v25  }
 0x113   : > { %v2645_v8 = vpack.c.bf16 %v764_v28, %v763_v54  ;;  %v851_v54 = vld [vmem:[%s4237_s3 + $0x10] sm:$0xff] }
 0x114   : > { %v655_v2 = vpop.xlane.xlu1 %654 }
 0x115   : > { %2646 = vmatpush3.bf16.msra.mxu0 %v2645_v8  ;;  %v652_v5 = vpop.xlane.xlu0 %651  ;;  %v751_v27 = vsel %vm747_vm12, %v746_v26, %v655_v2 }
 0x116   : > { %2647 = vmatprep.subr.bf16.mxu0 %v4291_v0  ;;  %v750_v20 = vsel %vm747_vm12, %v745_v19, %v652_v5  ;;  %864 = vperm.xlu1 %2775, %v854_v17   ;;  %v2899_v19 = vmov 1   ;;  %v2827_v17 = vld [vmem:[%s2995_s24 + $0x18] sm:$0xff] }
 0x118   : > { %v667_v45 = vpop.xlane.xlu1 %666 }
 0x119   : > { %v664_v48 = vpop.xlane.xlu0 %663  ;;  %v756_v38 = vsel %vm752_vm13, %v751_v27, %v667_v45  ;;  %v2900_v27 = vmov 2  }
 0x11a   : > { %v755_v39 = vsel %vm752_vm13, %v750_v20, %v664_v48  ;;  %869 = vperm.xlu1 %2775, %v855_v36  }
 0x11c   : > { %v679_v63 = vpop.xlane.xlu1 %678 }
 0x11d   : > { %v676_v18 = vpop.xlane.xlu0 %675  ;;  %v761_v60 = vsel %vm757_vm14, %v756_v38, %v679_v63  ;;  %v4293_v38 = vmov 0  }
 0x11e   : > { %v760_v21 = vsel %vm757_vm14, %v755_v39, %v676_v18  ;;  %874 = vperm.xlu1 %2775, %v856_v46   ;;  %v2828_v46 = vld [vmem:[%s2995_s24] sm:$0xff]  ;;  %vm1987_vm14 = vcmask 916480  }
 0x120   : > { %v691_v16 = vpop.xlane.xlu1 %690 }
 0x121   : > { %v766_v33 = vsel %vm762_vm15, %v761_v60, %v691_v16  ;;  %v688_v24 = vpop.xlane.xlu0 %687  ;;  %v2901_v60 = vmov 3   ;;  %v2902_v16 = vmov 4  }
 0x122   : > { %v765_v55 = vsel %vm762_vm15, %v760_v21, %v688_v24  ;;  %v2903_v21 = vmov 5   ;;  %v2905_v24 = vmov 7  }
 0x123   : > { %v2648_v62 = vpack.c.bf16 %v766_v33, %v765_v55  ;;  %v2904_v33 = vmov 6   ;;  %v1219_v55 = vld [vmem:[%s4239_s5 + $0x8] sm:$0xff] }
 0x124   : > { %1410 = vmatprep.mubr.f32.mxu1 %v1219_v55  ;;  %v1256_v55 = vld [vmem:[%s4240_s6 + $0x30] sm:$0xff] }
 0x125   : > { %2649 = vmatpush3.bf16.msra.mxu0 %v2648_v62 }
 0x128   : > { %2634 = vmatmul.mubr.msk.f32.vlgmr.msra.gmra.mrb[0].mxu0 %vm774_vm0, %v767_v57 }
 0x129   : > { %2638 = vmatprep.mubr.msk.f32.mxu0 %vm697_vm2, %v849_v10  ;;  %v772_v3 = vpop.permute.xlu0 %771  ;;  %v2826_v10 = vld [vmem:[%s2995_s24 + $0x10] sm:$0xff] }
 0x191   : > { %v860_v41 = vpop.permute.xlu1 %859 }
 0x195   : > { %v865_v8 = vpop.permute.xlu1 %864 }
 0x199   : > { %v870_v11 = vpop.permute.xlu1 %869 }
 0x19d   : > { %v875_v53 = vpop.permute.xlu1 %874 }
 0x1fb   : > { %v844_v28 = vpop.f32.mrb[0].mxu0 }
 0x1fc   : > { %v845_v37 = vadd.f32 %v844_v28, %v772_v3  ;;  %v2635_v49 = vpop.f32.mrb[1].mxu0  ;;  %v2829_v28 = vld [vmem:[%s2995_s24 + $0x8] sm:$0xff] }
 0x1fe   : > { %v848_v7 = vmax.f32 %v845_v37, 0.0 }
 0x200   : > { %2636 = vmatprep.subr.msk.mxu0 %vm889_vm1, %v848_v7 }
 0x201   : > { %2637 = vmatpush3.msk.msra.mxu0 %vm889_vm1, %v848_v7 }
 0x202   : > { %2639 = vmatmul.mubr.msk.f32.vlgmr.msra.gmra.mrb[2].mxu0 %vm697_vm2, %v850_v40 }
 0x203   : > { %2641 = vmatprep.mubr.msk.f32.mxu0 %vm697_vm2, %v851_v54 }
 0x206   : > { %2642 = vmatmul.mubr.msk.f32.gmra.mrb[4].mxu0 %vm697_vm2, %v852_v29  ;;  %vm1748_vm2 = vcmask 1040384  }
 0x207   : > { %2073 = vmatprep.mubr.f32.mxu0 %v4292_v34 }
 0x2d5   : > { %v2640_v35 = vpop.f32.mrb[2].mxu0 }
 0x2d6   : > { %v965_v22 = vadd.f32 %v2640_v35, %v865_v8  ;;  %v959_v42 = vpop.f32.mrb[3].mxu0  ;;  %v2830_v35 = vld [vmem:[%s2995_s24 + $0x48] sm:$0xff] }
 0x2d7   : > { %v960_v2 = vadd.f32 %v959_v42, %v860_v41 }
 0x2d8   : > { %984 = vrot.lane.b32.xlu1 %v965_v22, %s2898_s28 }
 0x2d9   : > { %v2643_v47 = vpop.f32.mrb[4].mxu0 }
 0x2da   : > { %v969_v52 = vpop.f32.mrb[5].mxu0  ;;  %v975_v5 = vadd.f32 %v2643_v47, %v875_v53 }
 0x2db   : > { %v970_v23 = vadd.f32 %v969_v52, %v870_v11  ;;  %v4294_v11 = vld [vmem:[#allocation3_spill] sm:$0xff] }
 0x2dc   : > { %982 = vrot.lane.b32.xlu1 %v960_v2, %s2898_s28 }
 0x2e0   : > { %986 = vrot.lane.b32.xlu1 %v970_v23, %s2898_s28 }
 0x2e4   : > { %988 = vrot.lane.b32.xlu1 %v975_v5, %s2898_s28 }
 0x34a   : > { %v985_v58 = vpop.permute.xlu1 %984 }
 0x34b   : > { %v995_v43 = vadd.f32 %v985_v58, %v965_v22 }
 0x34d   : > { %v2559_v59 = vmul.f32 -1.442695, %v995_v43 }
 0x34e   : > { %v983_v0 = vpop.permute.xlu1 %982 }
 0x34f   : > { %2802 = vpow2.f32 %v2559_v59  ;;  %v994_v1 = vadd.f32 %v983_v0, %v960_v2  ;;  %v2832_v0 = vld [vmem:[%s2995_s24 + $0x40] sm:$0xff] }
 0x351   : > { %v2558_v4 = vmul.f32 -1.442695, %v994_v1 }
 0x352   : > { %v987_v44 = vpop.permute.xlu1 %986 }
 0x353   : > { %2804 = vpow2.f32 %v2558_v4  ;;  %v996_v6 = vadd.f32 %v987_v44, %v970_v23  ;;  %v2833_v44 = vld [vmem:[%s2995_s24 + $0x50] sm:$0xff] }
 0x355   : > { %v2560_v48 = vmul.f32 -1.442695, %v996_v6 }
 0x356   : > { %v989_v45 = vpop.permute.xlu1 %988 }
 0x357   : > { %v997_v14 = vadd.f32 %v989_v45, %v975_v5  ;;  %v2831_v5 = vld [vmem:[%s2995_s24 + $0x58] sm:$0xff]  ;;  %v1250_v45 = vld [vmem:[%s4240_s6] sm:$0xff] }
 0x359   : > { %v2803_v9 = vpop.eup %2802  ;;  %v2561_v56 = vmul.f32 -1.442695, %v997_v14  ;;  %v1251_v14 = vld [vmem:[%s4240_s6 + $0x8] sm:$0xff] }
 0x35a   : > { %v1011_v15 = vadd.f32 1.0, %v2803_v9  ;;  %v2834_v9 = vld [vmem:[%s2995_s24 + $0x70] sm:$0xff] }
 0x35b   : > { %2806 = vpow2.f32 %v2561_v56 }
 0x35c   : > { %2808 = vrcp.f32 %v1011_v15  ;;  %v2835_v15 = vld [vmem:[%s2995_s24 + $0x78] sm:$0xff] }
 0x35d   : > { %v2805_v61 = vpop.eup %2804  ;;  %2810 = vpow2.f32 %v2560_v48 }
 0x35e   : > { %v1010_v50 = vadd.f32 1.0, %v2805_v61 }
 0x360   : > { %2812 = vrcp.f32 %v1010_v50  ;;  %v2836_v50 = vld [vmem:[%s2995_s24 + $0x98] sm:$0xff] }
 0x365   : > { %v2807_v51 = vpop.eup %2806 }
 0x366   : > { %v3509_v12 = vpop.eup %2808  ;;  %v1013_v63 = vadd.f32 1.0, %v2807_v51 }
 0x367   : > { %v2811_v13 = vpop.eup %2810  ;;  %1029 = vperm.xlu1 %2775, %v3509_v12  }
 0x368   : > { %2814 = vrcp.f32 %v1013_v63  ;;  %v1012_v18 = vadd.f32 1.0, %v2811_v13  ;;  %v2838_v13 = vld [vmem:[%s2995_s24 + $0x68] sm:$0xff] }
 0x36a   : > { %v2813_v26 = vpop.eup %2812  ;;  %2816 = vrcp.f32 %v1012_v18  ;;  %v1252_v18 = vld [vmem:[%s4240_s6 + $0x10] sm:$0xff] }
 0x36b   : > { %2776 = vset.pattern.permute.xlu1 %v2899_v19  ;;  %1024 = vperm.xlu0 %2774, %v2813_v26  }
 0x36c   : > { %1055 = vperm.xlu1 %2776, %v3509_v12  }
 0x36f   : > { %2777 = vset.pattern.permute.xlu0 %v2899_v19 }
 0x370   : > { %2778 = vset.pattern.permute.xlu1 %v2900_v27  ;;  %1051 = vperm.xlu0 %2777, %v2813_v26  }
 0x371   : > { %1075 = vperm.xlu1 %2778, %v2813_v26  }
 0x372   : > { %v2815_v20 = vpop.eup %2814 }
 0x374   : > { %1063 = vperm.xlu0 %2777, %v2815_v20   ;;  %v2817_v39 = vpop.eup %2816 }
 0x375   : > { %2779 = vset.pattern.permute.xlu1 %v4293_v38 }
 0x376   : > { %1039 = vperm.xlu1 %2779, %v2815_v20  }
 0x378   : > { %2780 = vset.pattern.permute.xlu0 %v4293_v38 }
 0x379   : > { %1034 = vperm.xlu0 %2780, %v2817_v39  }
 0x37a   : > { %2782 = vset.pattern.permute.xlu1 %v2900_v27 }
 0x37b   : > { %1087 = vperm.xlu1 %2782, %v2815_v20  }
 0x37d   : > { %2781 = vset.pattern.permute.xlu0 %v2900_v27 }
 0x37e   : > { %1079 = vperm.xlu0 %2781, %v3509_v12  }
 0x37f   : > { %2784 = vset.pattern.permute.xlu1 %v2901_v60 }
 0x380   : > { %1103 = vperm.xlu1 %2784, %v3509_v12  }
 0x382   : > { %2783 = vset.pattern.permute.xlu0 %v2901_v60 }
 0x383   : > { %1099 = vperm.xlu0 %2783, %v2813_v26  }
 0x384   : > { %2785 = vset.pattern.permute.xlu1 %v2899_v19  ;;  %v1254_v19 = vld [vmem:[%s4240_s6 + $0x20] sm:$0xff] }
 0x385   : > { %1059 = vperm.xlu1 %2785, %v2817_v39  }
 0x387   : > { %1111 = vperm.xlu0 %2783, %v2815_v20  }
 0x389   : > { %2786 = vset.pattern.permute.xlu1 %v2902_v16 }
 0x38a   : > { %1123 = vperm.xlu1 %2786, %v2813_v26  }
 0x38b   : > { %2787 = vset.pattern.permute.xlu0 %v2902_v16 }
 0x38c   : > { %1127 = vperm.xlu0 %2787, %v3509_v12  }
 0x38e   : > { %2788 = vset.pattern.permute.xlu1 %v2900_v27  ;;  %v2839_v27 = vld [vmem:[%s2995_s24 + $0x88] sm:$0xff] }
 0x38f   : > { %1083 = vperm.xlu1 %2788, %v2817_v39  }
 0x390   : > { %2790 = vset.pattern.permute.xlu0 %v2903_v21 }
 0x391   : > { %1147 = vperm.xlu0 %2790, %v2813_v26  }
 0x393   : > { %2789 = vset.pattern.permute.xlu1 %v2902_v16 }
 0x394   : > { %1135 = vperm.xlu1 %2789, %v2815_v20  }
 0x395   : > { %1159 = vperm.xlu0 %2790, %v2815_v20  }
 0x398   : > { %2791 = vset.pattern.permute.xlu1 %v2901_v60  ;;  %v2840_v60 = vld [vmem:[%s2995_s24 + $0x90] sm:$0xff] }
 0x399   : > { %2795 = vset.pattern.permute.xlu0 %v2904_v33  ;;  %1107 = vperm.xlu1 %2791, %v2817_v39  }
 0x39a   : > { %1175 = vperm.xlu0 %2795, %v3509_v12  }
 0x39d   : > { %2792 = vset.pattern.permute.xlu1 %v2903_v21 }
 0x39e   : > { %2798 = vset.pattern.permute.xlu0 %v2905_v24  ;;  %1151 = vperm.xlu1 %2792, %v3509_v12  }
 0x39f   : > { %1195 = vperm.xlu0 %2798, %v2813_v26  }
 0x3a2   : > { %2793 = vset.pattern.permute.xlu1 %v2902_v16 }
 0x3a3   : > { %1207 = vperm.xlu0 %2798, %v2815_v20   ;;  %1131 = vperm.xlu1 %2793, %v2817_v39  }
 0x3a7   : > { %2794 = vset.pattern.permute.xlu1 %v2904_v33  ;;  %2801 = vset.pattern.permute.xlu0 %v4293_v38 }
 0x3a8   : > { %1171 = vperm.xlu1 %2794, %v2813_v26   ;;  %1273 = vperm.xlu0 %2801, %v1251_v14   ;;  %v2852_v14 = vld [vmem:[%s2995_s24 + $0x118] sm:$0xff] }
 0x3ac   : > { %2796 = vset.pattern.permute.xlu1 %v2903_v21  ;;  %1288 = vperm.xlu0 %2801, %v1254_v19  }
 0x3ad   : > { %1155 = vperm.xlu1 %2796, %v2817_v39  }
 0x3b0   : > { %1298 = vperm.xlu0 %2801, %v1256_v55   ;;  %v2858_v55 = vld [vmem:[%s2995_s24 + $0x130] sm:$0xff] }
 0x3b1   : > { %2797 = vset.pattern.permute.xlu1 %v2904_v33 }
 0x3b2   : > { %1183 = vperm.xlu1 %2797, %v2815_v20  }
 0x3b6   : > { %1179 = vperm.xlu1 %2797, %v2817_v39  }
 0x3ba   : > { %2799 = vset.pattern.permute.xlu1 %v2905_v24  ;;  %v1253_v24 = vld [vmem:[%s4240_s6 + $0x18] sm:$0xff] }
 0x3bb   : > { %1199 = vperm.xlu1 %2799, %v3509_v12   ;;  %v2837_v12 = vld [vmem:[%s2995_s24 + $0x60] sm:$0xff] }
 0x3bf   : > { %1203 = vperm.xlu1 %2799, %v2817_v39  }
 0x3c3   : > { %2800 = vset.pattern.permute.xlu1 %v4293_v38 }
 0x3c4   : > { %1268 = vperm.xlu1 %2800, %v1250_v45  }
 0x3c8   : > { %1278 = vperm.xlu1 %2800, %v1252_v18   ;;  %v2856_v18 = vld [vmem:[%s2995_s24 + $0x110] sm:$0xff] }
 0x3cc   : > { %1283 = vperm.xlu1 %2800, %v1253_v24   ;;  %v1265_v24 = vld [vmem:[%s4240_s6 + $0x78] sm:$0xff] }
 0x3e6   : > { %v1030_v62 = vpop.permute.xlu1 %1029 }
 0x3e7   : > { %v1044_v25 = vmul.f32 %v2826_v10, %v1030_v62  ;;  %v1045_v36 = vmul.f32 %v2827_v17, %v1030_v62  ;;  %v2841_v62 = vld [vmem:[%s2995_s24 + $0x80] sm:$0xff]  ;;  %v1255_v17 = vld [vmem:[%s4240_s6 + $0x28] sm:$0xff] }
 0x3e8   : > { %1293 = vperm.xlu1 %2800, %v1255_v17   ;;  %v2860_v17 = vld [vmem:[%s2995_s24 + $0x158] sm:$0xff] }
 0x3ea   : > { %v1025_v57 = vpop.permute.xlu0 %1024 }
 0x3eb   : > { %v1042_v3 = vmul.f32 %v2828_v46, %v1025_v57  ;;  %v1043_v37 = vmul.f32 %v2829_v28, %v1025_v57  ;;  %v1056_v49 = vpop.permute.xlu1 %1055  ;;  %v2842_v46 = vld [vmem:[%s2995_s24 + $0xb0] sm:$0xff] }
 0x3ec   : > { %v1069_v58 = vmul.f32 %v2831_v5, %v1056_v49  ;;  %v1068_v6 = vmul.f32 %v2833_v44, %v1056_v49  ;;  %v1262_v44 = vld [vmem:[%s4240_s6 + $0x60] sm:$0xff] }
 0x3ed   : > { %v2650_v7 = vpack.c.bf16 %v1045_v36, %v1043_v37  ;;  %v2652_v40 = vpack.c.bf16 %v1044_v25, %v1042_v3  ;;  %v1258_v36 = vld [vmem:[%s4240_s6 + $0x40] sm:$0xff]  ;;  %v2843_v37 = vld [vmem:[%s2995_s24 + $0xb8] sm:$0xff] }
 0x3ee   : > { %1308 = vperm.xlu0 %2801, %v1258_v36   ;;  %v2861_v36 = vld [vmem:[%s2995_s24 + $0x120] sm:$0xff] }
 0x3ef   : > { %v1052_v54 = vpop.permute.xlu0 %1051  ;;  %2651 = vmatprep.subr.bf16.mxu1 %v2650_v7  ;;  %v2844_v7 = vld [vmem:[%s2995_s24 + $0xc8] sm:$0xff] }
 0x3f0   : > { %2653 = vmatpush1.bf16.msra.mxu1 %v2652_v40  ;;  %v1076_v29 = vpop.permute.xlu1 %1075  ;;  %v1067_v22 = vmul.f32 %v2830_v35, %v1052_v54  ;;  %v1066_v1 = vmul.f32 %v2832_v0, %v1052_v54  ;;  %v2845_v54 = vld [vmem:[%s2995_s24 + $0xa0] sm:$0xff]  ;;  %v1259_v0 = vld [vmem:[%s4240_s6 + $0x48] sm:$0xff] }
 0x3f1   : > { %v1091_v20 = vmul.f32 %v2839_v27, %v1076_v29  ;;  %v1090_v57 = vmul.f32 %v2841_v62, %v1076_v29 }
 0x3f2   : > { %v2658_v4 = vpack.c.bf16 %v1069_v58, %v1067_v22  ;;  %v2847_v22 = vld [vmem:[%s2995_s24 + $0xd8] sm:$0xff] }
 0x3f3   : > { %v1064_v41 = vpop.permute.xlu0 %1063 }
 0x3f4   : > { %v1072_v48 = vmul.f32 %v2834_v9, %v1064_v41  ;;  %v1073_v61 = vmul.f32 %v2835_v15, %v1064_v41  ;;  %v2846_v41 = vld [vmem:[%s2995_s24 + $0xa8] sm:$0xff] }
 0x3f5   : > { %v1040_v8 = vpop.permute.xlu1 %1039  ;;  %v2854_v15 = vld [vmem:[%s2995_s24 + $0xe8] sm:$0xff] }
 0x3f6   : > { %v1048_v47 = vmul.f32 %v1040_v8, %v3078_v30  ;;  %v1049_v2 = vmul.f32 %v1040_v8, %v3081_v31  ;;  %v2660_v31 = vpack.c.bf16 %v1068_v6, %v1066_v1  ;;  %v2850_v6 = vld [vmem:[%s2995_s24 + $0xf0] sm:$0xff] }
 0x3f8   : > { %v1035_v42 = vpop.permute.xlu0 %1034 }
 0x3f9   : > { %v1046_v52 = vmul.f32 %v1035_v42, %v3084_v32  ;;  %v1047_v23 = vmul.f32 %v1035_v42, %v4294_v11  ;;  %v2848_v11 = vld [vmem:[%s2995_s24 + $0xc0] sm:$0xff] }
 0x3fa   : > { %v1088_v53 = vpop.permute.xlu1 %1087 }
 0x3fb   : > { %v2654_v43 = vpack.c.bf16 %v1049_v2, %v1047_v23  ;;  %v2656_v59 = vpack.c.bf16 %v1048_v47, %v1046_v52  ;;  %v1096_v3 = vmul.f32 %v2842_v46, %v1088_v53  ;;  %v1097_v49 = vmul.f32 %v2843_v37, %v1088_v53  ;;  %v1257_v52 = vld [vmem:[%s4240_s6 + $0x38] sm:$0xff]  ;;  %v1260_v53 = vld [vmem:[%s4240_s6 + $0x50] sm:$0xff]  ;;  %v2863_v37 = vld [vmem:[%s2995_s24 + $0x148] sm:$0xff] }
 0x3fc   : > { %1303 = vperm.xlu1 %2800, %v1257_v52   ;;  %1318 = vperm.xlu0 %2801, %v1260_v53   ;;  %v2867_v53 = vld [vmem:[%s2995_s24 + $0x178] sm:$0xff] }
 0x3fd   : > { %2655 = vmatprep.subr.bf16.mxu1 %v2654_v43  ;;  %v1080_v32 = vpop.permute.xlu0 %1079  ;;  %v2849_v43 = vld [vmem:[%s2995_s24 + $0xd0] sm:$0xff] }
 0x3fe   : > { %2657 = vmatpush1.bf16.msra.mxu1 %v2656_v59  ;;  %v1093_v51 = vmul.f32 %v2836_v50, %v1080_v32  ;;  %v1092_v16 = vmul.f32 %v2840_v60, %v1080_v32  ;;  %v2851_v32 = vld [vmem:[%s2995_s24 + $0xf8] sm:$0xff] }
 0x3ff   : > { %2659 = vmatprep.subr.bf16.mxu1 %v2658_v4  ;;  %v3538_v30 = vpop.permute.xlu1 %1103  ;;  %v1261_v50 = vld [vmem:[%s4240_s6 + $0x58] sm:$0xff] }
 0x400   : > { %v2666_v21 = vpack.c.bf16 %v1093_v51, %v1091_v20  ;;  %v2668_v25 = vpack.c.bf16 %v1092_v16, %v1090_v57  ;;  %v1117_v42 = vmul.f32 %v2847_v22, %v3538_v30  ;;  %v1116_v59 = vmul.f32 %v2849_v43, %v3538_v30  ;;  %1313 = vperm.xlu1 %2800, %v1259_v0   ;;  %v1264_v51 = vld [vmem:[%s4240_s6 + $0x70] sm:$0xff]  ;;  %v2865_v22 = vld [vmem:[%s2995_s24 + $0x140] sm:$0xff] }
 0x401   : > { %1328 = vperm.xlu0 %2801, %v1262_v44   ;;  %v2871_v44 = vld [vmem:[%s2995_s24 + $0x198] sm:$0xff] }
 0x402   : > { %2661 = vmatpush1.bf16.msra.mxu1 %v2660_v31  ;;  %v1100_v10 = vpop.permute.xlu0 %1099 }
 0x403   : > { %v1115_v40 = vmul.f32 %v2844_v7, %v1100_v10  ;;  %v1114_v23 = vmul.f32 %v2848_v11, %v1100_v10  ;;  %v2859_v10 = vld [vmem:[%s2995_s24 + $0x138] sm:$0xff] }
 0x404   : > { %v1060_v56 = vpop.permute.xlu1 %1059  ;;  %1323 = vperm.xlu1 %2800, %v1261_v50  }
 0x405   : > { %v1070_v63 = vmul.f32 %v2837_v12, %v1060_v56  ;;  %v1071_v26 = vmul.f32 %v2838_v13, %v1060_v56  ;;  %v2674_v5 = vpack.c.bf16 %v1117_v42, %v1115_v40  ;;  %v2676_v1 = vpack.c.bf16 %v1116_v59, %v1114_v23  ;;  %v2855_v12 = vld [vmem:[%s2995_s24 + $0x108] sm:$0xff]  ;;  %1338 = vperm.xlu0 %2801, %v1264_v51   ;;  %v2869_v59 = vld [vmem:[%s2995_s24 + $0x160] sm:$0xff]  ;;  %v2874_v51 = vld [vmem:[%s2995_s24 + $0x1b0] sm:$0xff] }
 0x406   : > { %v1112_v35 = vpop.permute.xlu0 %1111 }
 0x407   : > { %v2662_v38 = vpack.c.bf16 %v1073_v61, %v1071_v26  ;;  %v2664_v39 = vpack.c.bf16 %v1072_v48, %v1070_v63  ;;  %v1120_v30 = vmul.f32 %v2850_v6, %v1112_v35  ;;  %v1121_v45 = vmul.f32 %v2851_v32, %v1112_v35  ;;  %v2853_v48 = vld [vmem:[%s2995_s24 + $0xe0] sm:$0xff] }
 0x408   : > { %v2872_v32 = vld [vmem:[%s2995_s24 + $0x180] sm:$0xff] }
 0x409   : > { %2663 = vmatprep.subr.bf16.mxu1 %v2662_v38  ;;  %v3559_v33 = vpop.permute.xlu1 %1123  ;;  %v1263_v38 = vld [vmem:[%s4240_s6 + $0x68] sm:$0xff] }
 0x40a   : > { %2665 = vmatpush1.bf16.msra.mxu1 %v2664_v39  ;;  %v1139_v63 = vmul.f32 %v2855_v12, %v3559_v33  ;;  %v2857_v39 = vld [vmem:[%s2995_s24 + $0x100] sm:$0xff]  ;;  %1333 = vperm.xlu1 %2800, %v1263_v38  }
 0x40b   : > { %2667 = vmatprep.subr.bf16.mxu1 %v2666_v21  ;;  %v1128_v4 = vpop.permute.xlu0 %1127  ;;  %v1138_v60 = vmul.f32 %v2857_v39, %v3559_v33 }
 0x40c   : > { %v1141_v9 = vmul.f32 %v2852_v14, %v1128_v4  ;;  %v1140_v19 = vmul.f32 %v2856_v18, %v1128_v4 }
 0x40e   : > { %2669 = vmatpush1.bf16.msra.mxu1 %v2668_v25  ;;  %v1084_v28 = vpop.permute.xlu1 %1083  ;;  %v2682_v27 = vpack.c.bf16 %v1141_v9, %v1139_v63  ;;  %v2684_v16 = vpack.c.bf16 %v1140_v19, %v1138_v60  ;;  %1343 = vperm.xlu1 %2800, %v1265_v24   ;;  %v2875_v63 = vld [vmem:[%s2995_s24 + $0x1b8] sm:$0xff]  ;;  %v2877_v19 = vld [vmem:[%s2995_s24 + $0x1a8] sm:$0xff]  ;;  %v2878_v60 = vld [vmem:[%s2995_s24 + $0x1c0] sm:$0xff] }
 0x40f   : > { %v1094_v29 = vmul.f32 %v2845_v54, %v1084_v28  ;;  %v1095_v8 = vmul.f32 %v2846_v41, %v1084_v28 }
 0x410   : > { %v1148_v21 = vpop.permute.xlu0 %1147 }
 0x411   : > { %v2670_v47 = vpack.c.bf16 %v1097_v49, %v1095_v8  ;;  %v2672_v2 = vpack.c.bf16 %v1096_v3, %v1094_v29  ;;  %v2862_v3 = vld [vmem:[%s2995_s24 + $0x128] sm:$0xff]  ;;  %v1163_v49 = vmul.f32 %v2863_v37, %v1148_v21  ;;  %v2864_v29 = vld [vmem:[%s2995_s24 + $0x150] sm:$0xff]  ;;  %v1162_v42 = vmul.f32 %v2865_v22, %v1148_v21 }
 0x412   : > { %v2879_v21 = vld [vmem:[%s2995_s24 + $0x1c8] sm:$0xff]  ;;  %v1220_v22 = vld [vmem:[%s4239_s5 + $0x10] sm:$0xff] }
 0x413   : > { %2671 = vmatprep.subr.bf16.mxu1 %v2670_v47  ;;  %v1136_v58 = vpop.permute.xlu1 %1135 }
 0x414   : > { %2673 = vmatpush1.bf16.msra.mxu1 %v2672_v2  ;;  %v1144_v62 = vmul.f32 %v2858_v55, %v1136_v58  ;;  %v1145_v25 = vmul.f32 %v2859_v10, %v1136_v58  ;;  %v1160_v54 = vpop.permute.xlu0 %1159  ;;  %v2866_v2 = vld [vmem:[%s2995_s24 + $0x170] sm:$0xff]  ;;  %v2868_v58 = vld [vmem:[%s2995_s24 + $0x188] sm:$0xff] }
 0x415   : > { %2675 = vmatprep.subr.bf16.mxu1 %v2674_v5  ;;  %v1168_v52 = vmul.f32 %v2866_v2, %v1160_v54  ;;  %v1169_v5 = vmul.f32 %v2867_v53, %v1160_v54  ;;  %v2880_v55 = vld [vmem:[%s2995_s24 + $0x1d0] sm:$0xff]  ;;  %v1225_v2 = vld [vmem:[%s4239_s5 + $0x38] sm:$0xff] }
 0x416   : > { %v1229_v53 = vld [vmem:[%s4239_s5 + $0x58] sm:$0xff] }
 0x418   : > { %2677 = vmatpush1.bf16.msra.mxu1 %v2676_v1  ;;  %v1108_v31 = vpop.permute.xlu1 %1107  ;;  %v2870_v1 = vld [vmem:[%s2995_s24 + $0x168] sm:$0xff] }
 0x419   : > { %v1118_v56 = vmul.f32 %v2853_v48, %v1108_v31  ;;  %v1119_v61 = vmul.f32 %v2854_v15, %v1108_v31  ;;  %v1176_v11 = vpop.permute.xlu0 %1175  ;;  %v2873_v48 = vld [vmem:[%s2995_s24 + $0x190] sm:$0xff] }
 0x41a   : > { %v1189_v6 = vmul.f32 %v2871_v44, %v1176_v11  ;;  %v1237_v44 = vld [vmem:[%s4239_s5 + $0x98] sm:$0xff] }
 0x41b   : > { %v2678_v13 = vpack.c.bf16 %v1121_v45, %v1119_v61  ;;  %v2680_v26 = vpack.c.bf16 %v1120_v30, %v1118_v56  ;;  %v1188_v56 = vmul.f32 %v2873_v48, %v1176_v11  ;;  %v1227_v11 = vld [vmem:[%s4239_s5 + $0x48] sm:$0xff]  ;;  %v1245_v48 = vld [vmem:[%s4239_s5 + $0xd8] sm:$0xff] }
 0x41d   : > { %2679 = vmatprep.subr.bf16.mxu1 %v2678_v13  ;;  %v1152_v20 = vpop.permute.xlu1 %1151 }
 0x41e   : > { %2681 = vmatpush1.bf16.msra.mxu1 %v2680_v26  ;;  %v1165_v33 = vmul.f32 %v2860_v17, %v1152_v20  ;;  %v1164_v41 = vmul.f32 %v2864_v29, %v1152_v20  ;;  %v1196_v50 = vpop.permute.xlu0 %1195  ;;  %v2876_v26 = vld [vmem:[%s2995_s24 + $0x1a0] sm:$0xff] }
 0x41f   : > { %2683 = vmatprep.subr.bf16.mxu1 %v2682_v27  ;;  %v1211_v24 = vmul.f32 %v2879_v21, %v1196_v50 }
 0x420   : > { %v2690_v8 = vpack.c.bf16 %v1165_v33, %v1163_v49  ;;  %v2692_v47 = vpack.c.bf16 %v1164_v41, %v1162_v42  ;;  %v2884_v49 = vld [vmem:[%s2995_s24 + $0x1e0] sm:$0xff]  ;;  %v1223_v42 = vld [vmem:[%s4239_s5 + $0x28] sm:$0xff] }
 0x422   : > { %2685 = vmatpush1.bf16.msra.mxu1 %v2684_v16  ;;  %v1132_v57 = vpop.permute.xlu1 %1131  ;;  %v1210_v16 = vmul.f32 %v2878_v60, %v1196_v50  ;;  %v1249_v50 = vld [vmem:[%s4239_s5 + $0xf8] sm:$0xff] }
 0x423   : > { %v1142_v46 = vmul.f32 %v2861_v36, %v1132_v57  ;;  %v1143_v28 = vmul.f32 %v2862_v3, %v1132_v57  ;;  %v2881_v57 = vld [vmem:[%s2995_s24 + $0x1d8] sm:$0xff] }
 0x425   : > { %v2686_v7 = vpack.c.bf16 %v1145_v25, %v1143_v28  ;;  %v2688_v40 = vpack.c.bf16 %v1144_v62, %v1142_v46  ;;  %v1208_v25 = vpop.permute.xlu0 %1207  ;;  %v2882_v46 = vld [vmem:[%s2995_s24 + $0x1f0] sm:$0xff]  ;;  %v2883_v28 = vld [vmem:[%s2995_s24 + $0x1f8] sm:$0xff] }
 0x426   : > { %v1216_v3 = vmul.f32 %v2882_v46, %v1208_v25  ;;  %v1217_v37 = vmul.f32 %v2883_v28, %v1208_v25 }
 0x427   : > { %2687 = vmatprep.subr.bf16.mxu1 %v2686_v7  ;;  %v1172_v35 = vpop.permute.xlu1 %1171 }
 0x428   : > { %2689 = vmatpush1.bf16.msra.mxu1 %v2688_v40  ;;  %v1187_v43 = vmul.f32 %v2868_v58, %v1172_v35  ;;  %v1186_v45 = vmul.f32 %v2872_v32, %v1172_v35  ;;  %v2885_v40 = vld [vmem:[%s2995_s24 + $0x1e8] sm:$0xff]  ;;  %v1221_v35 = vld [vmem:[%s4239_s5 + $0x18] sm:$0xff]  ;;  %s2912_s24 = smov 48  }
 0x429   : > { %2691 = vmatprep.subr.bf16.mxu1 %v2690_v8  ;;  %v1218_v8 = vld [vmem:[%s4239_s5] sm:$0xff]  ;;  %v1231_v58 = vld [vmem:[%s4239_s5 + $0x68] sm:$0xff]  ;;  %v1241_v32 = vld [vmem:[%s4239_s5 + $0xb8] sm:$0xff] }
 0x42a   : > { %v2698_v14 = vpack.c.bf16 %v1189_v6, %v1187_v43  ;;  %v2700_v15 = vpack.c.bf16 %v1188_v56, %v1186_v45  ;;  %v1230_v43 = vld [vmem:[%s4239_s5 + $0x60] sm:$0xff]  ;;  %v1236_v6 = vld [vmem:[%s4239_s5 + $0x90] sm:$0xff] }
 0x42b   : > { %v1240_v45 = vld [vmem:[%s4239_s5 + $0xb0] sm:$0xff] }
 0x42c   : > { %2693 = vmatpush1.bf16.msra.mxu1 %v2692_v47  ;;  %v1156_v23 = vpop.permute.xlu1 %1155  ;;  %v1222_v47 = vld [vmem:[%s4239_s5 + $0x20] sm:$0xff]  ;;  %v1244_v56 = vld [vmem:[%s4239_s5 + $0xd0] sm:$0xff] }
 0x42d   : > { %v1166_v0 = vmul.f32 %v2869_v59, %v1156_v23  ;;  %v1167_v4 = vmul.f32 %v2870_v1, %v1156_v23  ;;  %v1226_v23 = vld [vmem:[%s4239_s5 + $0x40] sm:$0xff]  ;;  %v1233_v59 = vld [vmem:[%s4239_s5 + $0x78] sm:$0xff]  ;;  %v1235_v1 = vld [vmem:[%s4239_s5 + $0x88] sm:$0xff] }
 0x42f   : > { %v2694_v30 = vpack.c.bf16 %v1169_v5, %v1167_v4  ;;  %v2696_v31 = vpack.c.bf16 %v1168_v52, %v1166_v0  ;;  %v1224_v52 = vld [vmem:[%s4239_s5 + $0x30] sm:$0xff]  ;;  %v1234_v4 = vld [vmem:[%s4239_s5 + $0x80] sm:$0xff] }
 0x430   : > { %v1228_v5 = vld [vmem:[%s4239_s5 + $0x50] sm:$0xff] }
 0x431   : > { %2695 = vmatprep.subr.bf16.mxu1 %v2694_v30  ;;  %v1184_v9 = vpop.permute.xlu1 %1183  ;;  %v1232_v0 = vld [vmem:[%s4239_s5 + $0x70] sm:$0xff]  ;;  %v1239_v30 = vld [vmem:[%s4239_s5 + $0xa8] sm:$0xff] }
 0x432   : > { %2697 = vmatpush1.bf16.msra.mxu1 %v2696_v31  ;;  %v1192_v12 = vmul.f32 %v2874_v51, %v1184_v9  ;;  %v1193_v13 = vmul.f32 %v2875_v63, %v1184_v9  ;;  %v1238_v31 = vld [vmem:[%s4239_s5 + $0xa0] sm:$0xff]  ;;  %v1248_v51 = vld [vmem:[%s4239_s5 + $0xf0] sm:$0xff] }
 0x433   : > { %2699 = vmatprep.subr.bf16.mxu1 %v2698_v14  ;;  %v1243_v14 = vld [vmem:[%s4239_s5 + $0xc8] sm:$0xff]  ;;  %v1242_v9 = vld [vmem:[%s4239_s5 + $0xc0] sm:$0xff] }
 0x435   : > { %v1180_v61 = vpop.permute.xlu1 %1179 }
 0x436   : > { %v1190_v18 = vmul.f32 %v2876_v26, %v1180_v61  ;;  %v1191_v27 = vmul.f32 %v2877_v19, %v1180_v61  ;;  %2701 = vmatpush1.bf16.msra.mxu1 %v2700_v15  ;;  %v1247_v15 = vld [vmem:[%s4239_s5 + $0xe8] sm:$0xff]  ;;  %v1246_v61 = vld [vmem:[%s4239_s5 + $0xe0] sm:$0xff]  ;;  %v1274_v26 = vpop.permute.xlu0 %1273 }
 0x438   : > { %v2702_v20 = vpack.c.bf16 %v1193_v13, %v1191_v27  ;;  %v2704_v38 = vpack.c.bf16 %v1192_v12, %v1190_v18 }
 0x43a   : > { %2703 = vmatprep.subr.bf16.mxu1 %v2702_v20  ;;  %v1200_v39 = vpop.permute.xlu1 %1199 }
 0x43b   : > { %v1212_v62 = vmul.f32 %v2880_v55, %v1200_v39  ;;  %v1213_v10 = vmul.f32 %v2881_v57, %v1200_v39  ;;  %2705 = vmatpush1.bf16.msra.mxu1 %v2704_v38 }
 0x43d   : > { %v2706_v17 = vpack.c.bf16 %v1213_v10, %v1211_v24  ;;  %v2708_v33 = vpack.c.bf16 %v1212_v62, %v1210_v16 }
 0x43e   : > { %v1204_v36 = vpop.permute.xlu1 %1203 }
 0x43f   : > { %v1214_v7 = vmul.f32 %v2884_v49, %v1204_v36  ;;  %v1215_v54 = vmul.f32 %v2885_v40, %v1204_v36  ;;  %2707 = vmatprep.subr.bf16.mxu1 %v2706_v17 }
 0x440   : > { %2709 = vmatpush1.bf16.msra.mxu1 %v2708_v33 }
 0x441   : > { %v2710_v29 = vpack.c.bf16 %v1217_v37, %v1215_v54  ;;  %v2712_v41 = vpack.c.bf16 %v1216_v3, %v1214_v7 }
 0x443   : > { %2711 = vmatprep.subr.bf16.mxu1 %v2710_v29  ;;  %v1269_v12 = vpop.permute.xlu1 %1268 }
 0x444   : > { %2713 = vmatpush1.bf16.msra.mxu1 %v2712_v41 }
 0x447   : > { %1411 = vmatmul.mubr.f32.vlgmr.msra.gmra.mrb[0].mxu1 %v1218_v8  ;;  %v1279_v38 = vpop.permute.xlu1 %1278 }
 0x448   : > { %1416 = vmatprep.mubr.f32.mxu1 %v1221_v35 }
 0x44b   : > { %1417 = vmatmul.mubr.f32.gmra.mrb[2].mxu1 %v1220_v22  ;;  %v1284_v25 = vpop.permute.xlu1 %1283 }
 0x44c   : > { %1422 = vmatprep.mubr.f32.mxu1 %v1223_v42  ;;  %v4257_v42 = vlaneseq }
 0x44f   : > { %1423 = vmatmul.mubr.f32.gmra.mrb[4].mxu1 %v1222_v47 }
 0x450   : > { %1428 = vmatprep.mubr.f32.mxu1 %v1225_v2 }
 0x453   : > { %1429 = vmatmul.mubr.f32.gmra.mrb[6].mxu1 %v1224_v52 }
 0x454   : > { %1434 = vmatprep.mubr.f32.mxu1 %v1227_v11 }
 0x457   : > { %1435 = vmatmul.mubr.f32.gmra.mrb[8].mxu1 %v1226_v23 }
 0x458   : > { %1440 = vmatprep.mubr.f32.mxu1 %v1229_v53 }
 0x45b   : > { %1441 = vmatmul.mubr.f32.gmra.mrb[10].mxu1 %v1228_v5 }
 0x45c   : > { %1446 = vmatprep.mubr.f32.mxu1 %v1231_v58  ;;  %v1289_v58 = vpop.permute.xlu0 %1288 }
 0x45f   : > { %1447 = vmatmul.mubr.f32.gmra.mrb[12].mxu1 %v1230_v43 }
 0x460   : > { %1452 = vmatprep.mubr.f32.mxu1 %v1233_v59 }
 0x463   : > { %1453 = vmatmul.mubr.f32.gmra.mrb[14].mxu1 %v1232_v0 }
 0x464   : > { %1458 = vmatprep.mubr.f32.mxu1 %v1235_v1  ;;  %v3772_v1 = vshrl.u32 %v4257_v42, 7 }
 0x467   : > { %1459 = vmatmul.mubr.f32.gmra.mrb[16].mxu1 %v1234_v4 }
 0x468   : > { %1464 = vmatprep.mubr.f32.mxu1 %v1237_v44 }
 0x46b   : > { %1465 = vmatmul.mubr.f32.gmra.mrb[18].mxu1 %v1236_v6 }
 0x46c   : > { %1470 = vmatprep.mubr.f32.mxu1 %v1239_v30  ;;  %v1294_v30 = vpop.permute.xlu1 %1293 }
 0x46f   : > { %1471 = vmatmul.mubr.f32.gmra.mrb[20].mxu1 %v1238_v31 }
 0x470   : > { %1476 = vmatprep.mubr.f32.mxu1 %v1241_v32 }
 0x473   : > { %1477 = vmatmul.mubr.f32.gmra.mrb[22].mxu1 %v1240_v45 }
 0x474   : > { %1482 = vmatprep.mubr.f32.mxu1 %v1243_v14 }
 0x477   : > { %1483 = vmatmul.mubr.f32.gmra.mrb[24].mxu1 %v1242_v9 }
 0x478   : > { %1488 = vmatprep.mubr.f32.mxu1 %v1245_v48 }
 0x47b   : > { %1489 = vmatmul.mubr.f32.gmra.mrb[26].mxu1 %v1244_v56 }
 0x47c   : > { %1494 = vmatprep.mubr.f32.mxu1 %v1247_v15 }
 0x47f   : > { %1495 = vmatmul.mubr.f32.gmra.mrb[28].mxu1 %v1246_v61 }
 0x480   : > { %1500 = vmatprep.mubr.f32.mxu1 %v1249_v50 }
 0x483   : > { %1501 = vmatmul.mubr.f32.gmra.mrb[30].mxu1 %v1248_v51 }
 0x51a   : > { %v1412_v63 = vpop.f32.mrb[0].mxu1 }
 0x51b   : > { %v1414_v13 = vpop.f32.mrb[1].mxu1  ;;  %v3739_v19 = vadd.f32 %v1412_v63, %v1269_v12 }
 0x51c   : > { %v3745_v60 = vadd.f32 %v1414_v13, %v1269_v12  ;;  %v3787_v13 = vsub.s32 1, %v3772_v1 }
 0x51e   : > { %v1418_v18 = vpop.f32.mrb[2].mxu1 }
 0x51f   : > { %v3741_v27 = vadd.f32 %v1418_v18, %v1274_v26  ;;  %v1420_v20 = vpop.f32.mrb[3].mxu1 }
 0x520   : > { %v3743_v39 = vadd.f32 %v1420_v20, %v1274_v26 }
 0x521   : > { %v1507_v16 = vadd.f32 %v3741_v27, %v3739_v19  ;;  %v1636_v24 = vmax.f32 %v3739_v19, %v3741_v27 }
 0x522   : > { %v1424_v21 = vpop.f32.mrb[4].mxu1  ;;  %v1514_v55 = vadd.f32 %v3743_v39, %v3745_v60  ;;  %v1643_v10 = vmax.f32 %v3745_v60, %v3743_v39 }
 0x523   : > { %v1426_v62 = vpop.f32.mrb[5].mxu1  ;;  %v1508_v57 = vrot.slane %v1507_v16, 4  ;;  %v1637_v33 = vrot.slane %v1636_v24, 4  ;;  %v3755_v46 = vadd.f32 %v1424_v21, %v1279_v38 }
 0x524   : > { %v1515_v36 = vrot.slane %v1514_v55, 4  ;;  %v1644_v49 = vrot.slane %v1643_v10, 4  ;;  %v3759_v7 = vadd.f32 %v1426_v62, %v1279_v38  ;;  %v3796_v62 = vld [vmem:[%s4242_s8 + $0x3] ss:$8 sm:$0x3] }
 0x525   : > { %v1509_v37 = vadd.f32 %v1508_v57, %v1507_v16  ;;  %v1638_v35 = vmax.f32 %v1636_v24, %v1637_v33 }
 0x526   : > { %v1430_v17 = vpop.f32.mrb[6].mxu1  ;;  %4295 = vst [vmem:[#allocation4_spill] sm:$0xff] %v3759_v7  ;;  %v1516_v2 = vadd.f32 %v1515_v36, %v1514_v55  ;;  %v1645_v52 = vmax.f32 %v1643_v10, %v1644_v49 }
 0x527   : > { %v3757_v3 = vadd.f32 %v1430_v17, %v1284_v25  ;;  %v1432_v28 = vpop.f32.mrb[7].mxu1  ;;  %v1510_v47 = vrot.slane %v1509_v37, 2  ;;  %v1639_v59 = vrot.slane %v1638_v35, 2 }
 0x528   : > { %v3761_v40 = vadd.f32 %v1432_v28, %v1284_v25  ;;  %v1517_v44 = vrot.slane %v1516_v2, 2  ;;  %v1646_v6 = vrot.slane %v1645_v52, 2 }
 0x529   : > { %v1524_v54 = vadd.f32 %v3757_v3, %v3755_v46  ;;  %v1650_v29 = vmax.f32 %v3755_v46, %v3757_v3  ;;  %v1511_v4 = vadd.f32 %v1510_v47, %v1509_v37  ;;  %v1640_v50 = vmax.f32 %v1638_v35, %v1639_v59  ;;  %v1304_v47 = vpop.permute.xlu1 %1303 }
 0x52a   : > { %4296 = vst [vmem:[#allocation6_spill] sm:$0xff] %v3761_v40  ;;  %v1531_v41 = vadd.f32 %v3761_v40, %v3759_v7  ;;  %v1436_v8 = vpop.f32.mrb[8].mxu1  ;;  %v1657_v11 = vmax.f32 %v3759_v7, %v3761_v40  ;;  %v1518_v26 = vadd.f32 %v1517_v44, %v1516_v2  ;;  %v1647_v21 = vmax.f32 %v1645_v52, %v1646_v6 }
 0x52b   : > { %v1438_v22 = vpop.f32.mrb[9].mxu1  ;;  %v1525_v23 = vrot.slane %v1524_v54, 4  ;;  %v1651_v53 = vrot.slane %v1650_v29, 4  ;;  %v3774_v45 = vadd.f32 %v1436_v8, %v1289_v58  ;;  %v1512_v16 = vrot.slane %v1511_v4, 1 }
 0x52c   : > { %v1532_v5 = vrot.slane %v1531_v41, 4  ;;  %v1658_v31 = vrot.slane %v1657_v11, 4  ;;  %v3780_v15 = vadd.f32 %v1438_v22, %v1289_v58  ;;  %v3799_v37 = vsub.s32 0, %v3772_v1 }
 0x52d   : > { %v1526_v32 = vadd.f32 %v1525_v23, %v1524_v54  ;;  %4297 = vst [vmem:[#allocation5_spill] sm:$0xff] %v3774_v45  ;;  %v1652_v48 = vmax.f32 %v1650_v29, %v1651_v53  ;;  %v1519_v49 = vrot.slane %v1518_v26, 1  ;;  %v1641_v8 = vrot.slane %v1640_v50, 1 }
 0x52e   : > { %v1442_v43 = vpop.f32.mrb[10].mxu1  ;;  %v1533_v56 = vadd.f32 %v1532_v5, %v1531_v41  ;;  %4300 = vst [vmem:[#allocation3_spill] sm:$0xff] %v3780_v15  ;;  %v1659_v18 = vmax.f32 %v1657_v11, %v1658_v31  ;;  %v3803_v41 = vrot.slane %v3796_v62, %v3787_v13  ;;  %v1648_v35 = vrot.slane %v1647_v21, 1  ;;  %v1299_v5 = vpop.permute.xlu0 %1298 }
 0x52f   : > { %v1444_v0 = vpop.f32.mrb[11].mxu1  ;;  %v3776_v14 = vadd.f32 %v1442_v43, %v1294_v30  ;;  %v1527_v24 = vrot.slane %v1526_v32, 2  ;;  %v1653_v57 = vrot.slane %v1652_v48, 2  ;;  %v1513_v52 = vadd.f32 %v1512_v16, %v1511_v4 }
 0x530   : > { %v3778_v9 = vadd.f32 %v1444_v0, %v1294_v30  ;;  %v1534_v10 = vrot.slane %v1533_v56, 2  ;;  %v1660_v54 = vrot.slane %v1659_v18, 2  ;;  %v1520_v30 = vadd.f32 %v1519_v49, %v1518_v26  ;;  %v1314_v49 = vpop.permute.xlu1 %1313 }
 0x531   : > { %4298 = vst [vmem:[#allocation8_spill] sm:$0xff] %v3776_v14  ;;  %v1540_v51 = vadd.f32 %v3776_v14, %v3774_v45  ;;  %v1664_v12 = vmax.f32 %v3774_v45, %v3776_v14  ;;  %v1528_v22 = vadd.f32 %v1527_v24, %v1526_v32  ;;  %v1654_v11 = vmax.f32 %v1652_v48, %v1653_v57 }
 0x532   : > { %4299 = vst [vmem:[#allocation7_spill] sm:$0xff] %v3778_v9  ;;  %v1448_v61 = vpop.f32.mrb[12].mxu1  ;;  %v1547_v20 = vadd.f32 %v3778_v9, %v3780_v15  ;;  %v1671_v38 = vmax.f32 %v3780_v15, %v3778_v9  ;;  %v1535_v23 = vadd.f32 %v1534_v10, %v1533_v56  ;;  %v1661_v31 = vmax.f32 %v1659_v18, %v1660_v54 }
 0x533   : > { %v1450_v63 = vpop.f32.mrb[13].mxu1  ;;  %v1541_v55 = vrot.slane %v1540_v51, 4  ;;  %v1665_v25 = vrot.slane %v1664_v12, 4  ;;  %v3805_v59 = vadd.f32 %v1448_v61, %v1299_v5  ;;  %v1655_v61 = vrot.slane %v1654_v11, 1 }
 0x534   : > { %v1548_v17 = vrot.slane %v1547_v20, 4  ;;  %v1672_v36 = vrot.slane %v1671_v38, 4  ;;  %v3811_v32 = vadd.f32 %v1450_v63, %v1299_v5  ;;  %v1642_v16 = vmax.f32 %v1640_v50, %v1641_v8 }
 0x535   : > { %v1542_v29 = vadd.f32 %v1541_v55, %v1540_v51  ;;  %v1666_v53 = vmax.f32 %v1664_v12, %v1665_v25  ;;  %4301 = vst [vmem:[#allocation9_spill] sm:$0xff] %v3805_v59  ;;  %v1536_v12 = vrot.slane %v1535_v23, 1  ;;  %v1649_v63 = vmax.f32 %v1647_v21, %v1648_v35 }
 0x536   : > { %v1454_v33 = vpop.f32.mrb[14].mxu1  ;;  %v1549_v2 = vadd.f32 %v1548_v17, %v1547_v20  ;;  %v1673_v43 = vmax.f32 %v1671_v38, %v1672_v36  ;;  %4304 = vst [vmem:[#allocation12_spill] sm:$0xff] %v3811_v32  ;;  %v1529_v20 = vrot.slane %v1528_v22, 1  ;;  %v1522_v10 = vmul.f32 0.0625, %v1513_v52 }
 0x537   : > { %v1456_v28 = vpop.f32.mrb[15].mxu1  ;;  %v3807_v0 = vadd.f32 %v1454_v33, %v1304_v47  ;;  %v1543_v51 = vrot.slane %v1542_v29, 2  ;;  %v1667_v24 = vrot.slane %v1666_v53, 2  ;;  %v3821_v25 = vmul.f32 0.0625, %v1520_v30 }
 0x538   : > { %v3809_v44 = vadd.f32 %v1456_v28, %v1304_v47  ;;  %v1550_v4 = vrot.slane %v1549_v2, 2  ;;  %v1674_v55 = vrot.slane %v1673_v43, 2  ;;  %v1530_v36 = vadd.f32 %v1529_v20, %v1528_v22 }
 0x539   : > { %4302 = vst [vmem:[#allocation10_spill] sm:$0xff] %v3807_v0  ;;  %v1556_v48 = vadd.f32 %v3807_v0, %v3805_v59  ;;  %v1678_v56 = vmax.f32 %v3805_v59, %v3807_v0  ;;  %v1544_v17 = vadd.f32 %v1543_v51, %v1542_v29  ;;  %v1662_v28 = vrot.slane %v1661_v31, 1 }
 0x53a   : > { %v1460_v58 = vpop.f32.mrb[16].mxu1  ;;  %4303 = vst [vmem:[#allocation11_spill] sm:$0xff] %v3809_v44  ;;  %v1563_v38 = vadd.f32 %v3809_v44, %v3811_v32  ;;  %v1685_v26 = vmax.f32 %v3811_v32, %v3809_v44  ;;  %v1551_v54 = vadd.f32 %v1550_v4, %v1549_v2  ;;  %v1656_v5 = vmax.f32 %v1654_v11, %v1655_v61  ;;  %v1309_v44 = vpop.permute.xlu0 %1308 }
 0x53b   : > { %v1462_v6 = vpop.f32.mrb[17].mxu1  ;;  %v1557_v33 = vrot.slane %v1556_v48, 4  ;;  %v1679_v47 = vrot.slane %v1678_v56, 4  ;;  %v1537_v42 = vadd.f32 %v1536_v12, %v1535_v23  ;;  %v1668_v8 = vmax.f32 %v1666_v53, %v1667_v24 }
 0x53c   : > { %v1564_v0 = vrot.slane %v1563_v38, 4  ;;  %v1686_v50 = vrot.slane %v1685_v26, 4  ;;  %v1675_v35 = vmax.f32 %v1673_v43, %v1674_v55  ;;  %v3823_v32 = vadd.f32 %v1460_v58, %v1309_v44 }
 0x53d   : > { %v1545_v29 = vrot.slane %v1544_v17, 1  ;;  %v1558_v51 = vadd.f32 %v1557_v33, %v1556_v48  ;;  %v3827_v22 = vadd.f32 %v1462_v6, %v1309_v44  ;;  %v1552_v2 = vrot.slane %v1551_v54, 1 }
 0x53e   : > { %v1466_v18 = vpop.f32.mrb[18].mxu1  ;;  %4305 = vst [vmem:[#allocation13_spill] sm:$0xff] %v3823_v32  ;;  %v1680_v11 = vmax.f32 %v1678_v56, %v1679_v47  ;;  %v1565_v43 = vadd.f32 %v1564_v0, %v1563_v38  ;;  %v1687_v58 = vmax.f32 %v1685_v26, %v1686_v50  ;;  %v1538_v6 = vmul.f32 0.0625, %v1530_v36 }
 0x53f   : > { %v1468_v57 = vpop.f32.mrb[19].mxu1  ;;  %v3825_v52 = vadd.f32 %v1466_v18, %v1314_v49  ;;  %4307 = vst [vmem:[#allocation15_spill] sm:$0xff] %v3827_v22  ;;  %v1663_v61 = vmax.f32 %v1661_v31, %v1662_v28  ;;  %v1669_v24 = vrot.slane %v1668_v8, 1  ;;  %v1559_v55 = vrot.slane %v1558_v51, 2 }
 0x540   : > { %v3829_v20 = vadd.f32 %v1468_v57, %v1314_v49  ;;  %v1546_v49 = vadd.f32 %v1545_v29, %v1544_v17  ;;  %v1553_v47 = vadd.f32 %v1552_v2, %v1551_v54  ;;  %v1676_v0 = vrot.slane %v1675_v35, 1 }
 0x541   : > { %4306 = vst [vmem:[#allocation14_spill] sm:$0xff] %v3825_v52  ;;  %v1572_v23 = vadd.f32 %v3825_v52, %v3823_v32  ;;  %v1692_v53 = vmax.f32 %v3823_v32, %v3825_v52  ;;  %v1681_v26 = vrot.slane %v1680_v11, 2  ;;  %v1566_v50 = vrot.slane %v1565_v43, 2 }
 0x542   : > { %v1472_v21 = vpop.f32.mrb[20].mxu1  ;;  %4308 = vst [vmem:[#allocation16_spill] sm:$0xff] %v3829_v20  ;;  %v1579_v4 = vadd.f32 %v3829_v20, %v3827_v22  ;;  %v1699_v48 = vmax.f32 %v3827_v22, %v3829_v20  ;;  %v1688_v52 = vrot.slane %v1687_v58, 2  ;;  %v1768_v20 = vsel %vm1748_vm2, %v1642_v16, %v1656_v5 }
 0x543   : > { %v1474_v30 = vpop.f32.mrb[21].mxu1  ;;  %v1573_v12 = vrot.slane %v1572_v23, 4  ;;  %v1693_v18 = vrot.slane %v1692_v53, 4  ;;  %v1539_v36 = vmul.f32 0.0625, %v1537_v42  ;;  %v1769_v31 = vsel %vm1748_vm2, %v1649_v63, %v1663_v61  ;;  %v1319_v42 = vpop.permute.xlu0 %1318 }
 0x544   : > { %v1580_v57 = vrot.slane %v1579_v4, 4  ;;  %v1700_v33 = vrot.slane %v1699_v48, 4  ;;  %v1749_v9 = vsel %vm1748_vm2, %v1522_v10, %v1538_v6  ;;  %v1560_v14 = vadd.f32 %v1559_v55, %v1558_v51 }
 0x545   : > { %v1574_v38 = vadd.f32 %v1573_v12, %v1572_v23  ;;  %v1694_v32 = vmax.f32 %v1692_v53, %v1693_v18  ;;  %v1554_v54 = vmul.f32 0.0625, %v1546_v49  ;;  %v1670_v29 = vmax.f32 %v1668_v8, %v1669_v24  ;;  %v1324_v12 = vpop.permute.xlu1 %1323 }
 0x546   : > { %v1478_v44 = vpop.f32.mrb[22].mxu1  ;;  %v1581_v28 = vadd.f32 %v1580_v57, %v1579_v4  ;;  %v1701_v17 = vmax.f32 %v1699_v48, %v1700_v33  ;;  %v1555_v2 = vmul.f32 0.0625, %v1553_v47  ;;  %v1677_v23 = vmax.f32 %v1675_v35, %v1676_v0 }
 0x547   : > { %v1480_v56 = vpop.f32.mrb[23].mxu1  ;;  %v1575_v15 = vrot.slane %v1574_v38, 2  ;;  %v3842_v45 = vmax.f32 %v1680_v11, %v1681_v26  ;;  %v1567_v53 = vadd.f32 %v1566_v50, %v1565_v43  ;;  %v3844_v18 = vmax.f32 %v1687_v58, %v1688_v52 }
 0x548   : > { %v1695_v16 = vrot.slane %v1694_v32, 2  ;;  %v1582_v5 = vrot.slane %v1581_v28, 2  ;;  %v3846_v4 = vadd.f32 %v1472_v21, %v1319_v42  ;;  %v3848_v10 = vadd.f32 %v1478_v44, %v1324_v12 }
 0x549   : > { %v3850_v51 = vadd.f32 %v1480_v56, %v1324_v12  ;;  %v1561_v8 = vrot.slane %v1560_v14, 1  ;;  %v1576_v6 = vadd.f32 %v1575_v15, %v1574_v38  ;;  %v1702_v35 = vrot.slane %v1701_v17, 2  ;;  %v1334_v33 = vpop.permute.xlu1 %1333 }
 0x54a   : > { %v1484_v59 = vpop.f32.mrb[24].mxu1  ;;  %4309 = vst [vmem:[#allocation17_spill] sm:$0xff] %v3846_v4  ;;  %4310 = vst [vmem:[#allocation18_spill] sm:$0xff] %v3848_v10  ;;  %v3852_v61 = vadd.f32 %v1474_v30, %v1319_v42  ;;  %v1750_v52 = vsel %vm1748_vm2, %v3821_v25, %v1539_v36  ;;  %v3857_v11 = vsel %vm889_vm1, %v1768_v20, %v1670_v29  ;;  %v1568_v15 = vrot.slane %v1567_v53, 1 }
 0x54b   : > { %v1486_v22 = vpop.f32.mrb[25].mxu1  ;;  %4311 = vst [vmem:[#allocation19_spill] sm:$0xff] %v3850_v51  ;;  %v3860_v43 = vsel %vm889_vm1, %v1769_v31, %v1677_v23  ;;  %v1588_v21 = vadd.f32 %v3848_v10, %v3846_v4  ;;  %v1751_v58 = vsel %vm889_vm1, %v1749_v9, %v1554_v54  ;;  %v1752_v44 = vsel %vm889_vm1, %v1750_v52, %v1555_v2  ;;  %v1329_v9 = vpop.permute.xlu0 %1328 }
 0x54c   : > { %4312 = vst [vmem:[#allocation20_spill] sm:$0xff] %v3852_v61  ;;  %v1595_v30 = vadd.f32 %v3850_v51, %v3852_v61  ;;  %v1683_v25 = vrot.slane %v3842_v45, 1  ;;  %v1690_v20 = vrot.slane %v3844_v18, 1  ;;  %v1696_v24 = vmax.f32 %v1694_v32, %v1695_v16 }
 0x54d   : > { %v1583_v55 = vadd.f32 %v1582_v5, %v1581_v28  ;;  %v1562_v49 = vadd.f32 %v1561_v8, %v1560_v14  ;;  %v1577_v47 = vrot.slane %v1576_v6, 1  ;;  %v1703_v0 = vmax.f32 %v1701_v17, %v1702_v35 }
 0x54e   : > { %v1490_v63 = vpop.f32.mrb[26].mxu1  ;;  %v1706_v38 = vmax.f32 %v3846_v4, %v3848_v10  ;;  %v1589_v26 = vrot.slane %v1588_v21, 4  ;;  %v1713_v50 = vmax.f32 %v3852_v61, %v3850_v51  ;;  %v3878_v36 = vadd.f32 %v1484_v59, %v1329_v9 }
 0x54f   : > { %v1492_v48 = vpop.f32.mrb[27].mxu1  ;;  %v3880_v31 = vadd.f32 %v1490_v63, %v1334_v33  ;;  %v1569_v32 = vadd.f32 %v1568_v15, %v1567_v53  ;;  %v1596_v28 = vrot.slane %v1595_v30, 4  ;;  %v3882_v54 = vadd.f32 %v1486_v22, %v1329_v9 }
 0x550   : > { %4313 = vst [vmem:[#allocation21_spill] sm:$0xff] %v3878_v36  ;;  %v3884_v14 = vadd.f32 %v1492_v48, %v1334_v33  ;;  %v1697_v17 = vrot.slane %v1696_v24, 1  ;;  %v1584_v2 = vrot.slane %v1583_v55, 1  ;;  %v1704_v42 = vrot.slane %v1703_v0, 1 }
 0x551   : > { %4314 = vst [vmem:[#allocation22_spill] sm:$0xff] %v3880_v31  ;;  %4315 = vst [vmem:[#allocation23_spill] sm:$0xff] %v3882_v54  ;;  %v1604_v23 = vadd.f32 %v3880_v31, %v3878_v36  ;;  %v1720_v12 = vmax.f32 %v3878_v36, %v3880_v31  ;;  %v1707_v16 = vrot.slane %v1706_v38, 4  ;;  %v1578_v63 = vadd.f32 %v1577_v47, %v1576_v6 }
 0x552   : > { %v3868_v56 = vpop.f32.mrb[28].mxu1  ;;  %4316 = vst [vmem:[#allocation24_spill] sm:$0xff] %v3884_v14  ;;  %v1611_v53 = vadd.f32 %v3884_v14, %v3882_v54  ;;  %v1727_v22 = vmax.f32 %v3882_v54, %v3884_v14  ;;  %v1590_v5 = vadd.f32 %v1589_v26, %v1588_v21  ;;  %v1714_v48 = vrot.slane %v1713_v50, 4 }
 0x553   : > { %v3872_v57 = vpop.f32.mrb[29].mxu1  ;;  %v1605_v8 = vrot.slane %v1604_v23, 4  ;;  %v1597_v35 = vadd.f32 %v1596_v28, %v1595_v30  ;;  %v1721_v52 = vrot.slane %v1720_v12, 4  ;;  %v1570_v9 = vmul.f32 0.0625, %v1562_v49 }
 0x554   : > { %v1612_v15 = vrot.slane %v1611_v53, 4  ;;  %v1728_v33 = vrot.slane %v1727_v22, 4  ;;  %v1684_v31 = vmax.f32 %v3842_v45, %v1683_v25  ;;  %v1571_v36 = vmul.f32 0.0625, %v1569_v32 }
 0x555   : > { %v1691_v51 = vmax.f32 %v3844_v18, %v1690_v20  ;;  %v1585_v10 = vadd.f32 %v1584_v2, %v1583_v55  ;;  %v1708_v61 = vmax.f32 %v1706_v38, %v1707_v16  ;;  %v1606_v4 = vadd.f32 %v1605_v8, %v1604_v23 }
 0x556   : > { %v1502_v29 = vpop.f32.mrb[30].mxu1  ;;  %v1613_v40 = vadd.f32 %v1612_v15, %v1611_v53  ;;  %v1586_v7 = vmul.f32 0.0625, %v1578_v63  ;;  %v1698_v14 = vmax.f32 %v1696_v24, %v1697_v17  ;;  %v1705_v6 = vmax.f32 %v1703_v0, %v1704_v42 }
 0x557   : > { %v1504_v59 = vpop.f32.mrb[31].mxu1  ;;  %v1715_v21 = vmax.f32 %v1713_v50, %v1714_v48  ;;  %v1591_v47 = vrot.slane %v1590_v5, 2  ;;  %v1598_v26 = vrot.slane %v1597_v35, 2  ;;  %v1722_v30 = vmax.f32 %v1720_v12, %v1721_v52 }
 0x558   : > { %v1729_v28 = vmax.f32 %v1727_v22, %v1728_v33  ;;  %v1754_v54 = vsel %vm1753_vm3, %v1751_v58, %v1570_v9  ;;  %v1772_v45 = vsel %vm1753_vm3, %v3857_v11, %v1684_v31  ;;  %v1755_v25 = vsel %vm1753_vm3, %v1752_v44, %v1571_v36  ;;  %v1344_v11 = vpop.permute.xlu1 %1343  ;;  %v1339_v31 = vpop.permute.xlu0 %1338 }
 0x559   : > { %v1773_v18 = vsel %vm1753_vm3, %v3860_v43, %v1691_v51  ;;  %v1587_v20 = vmul.f32 0.0625, %v1585_v10  ;;  %v1709_v55 = vrot.slane %v1708_v61, 2  ;;  %v1607_v49 = vrot.slane %v1606_v4, 2 }
 0x55a   : > { %v1614_v24 = vrot.slane %v1613_v40, 2  ;;  %v3903_v0 = vsel %vm1756_vm4, %v1754_v54, %v1586_v7  ;;  %v3906_v38 = vsel %vm1756_vm4, %v1772_v45, %v1698_v14  ;;  %v3909_v58 = vsel %vm1756_vm4, %v1773_v18, %v1705_v6 }
 0x55b   : > { %v1716_v50 = vrot.slane %v1715_v21, 2  ;;  %v1592_v44 = vadd.f32 %v1591_v47, %v1590_v5  ;;  %v1599_v36 = vadd.f32 %v1598_v26, %v1597_v35  ;;  %v1723_v32 = vrot.slane %v1722_v30, 2 }
 0x55c   : > { %v1730_v51 = vrot.slane %v1729_v28, 2  ;;  %v3912_v10 = vadd.f32 %v3868_v56, %v1339_v31  ;;  %v3915_v43 = vadd.f32 %v3872_v57, %v1339_v31  ;;  %v3917_v7 = vadd.f32 %v1502_v29, %v1344_v11 }
 0x55d   : > { %v3919_v54 = vadd.f32 %v1504_v59, %v1344_v11  ;;  %v1758_v14 = vsel %vm1756_vm4, %v1755_v25, %v1587_v20  ;;  %v1710_v17 = vmax.f32 %v1708_v61, %v1709_v55  ;;  %v1608_v2 = vadd.f32 %v1607_v49, %v1606_v4 }
 0x55e   : > { %v1615_v23 = vadd.f32 %v1614_v24, %v1613_v40  ;;  %v1717_v12 = vmax.f32 %v1715_v21, %v1716_v50  ;;  %v1620_v42 = vadd.f32 %v3917_v7, %v3912_v10  ;;  %v1734_v56 = vmax.f32 %v3912_v10, %v3917_v7 }
 0x55f   : > { %v1627_v57 = vadd.f32 %v3919_v54, %v3915_v43  ;;  %v1593_v29 = vrot.slane %v1592_v44, 1  ;;  %v1600_v16 = vrot.slane %v1599_v36, 1  ;;  %v1724_v59 = vmax.f32 %v1722_v30, %v1723_v32 }
 0x560   : > { %v1741_v53 = vmax.f32 %v3915_v43, %v3919_v54  ;;  %v1731_v61 = vmax.f32 %v1729_v28, %v1730_v51  ;;  %v1621_v4 = vrot.slane %v1620_v42, 4  ;;  %v1735_v40 = vrot.slane %v1734_v56, 4 }
 0x561   : > { %v1628_v22 = vrot.slane %v1627_v57, 4  ;;  %v1711_v63 = vrot.slane %v1710_v17, 1  ;;  %v1609_v5 = vrot.slane %v1608_v2, 1  ;;  %v1616_v48 = vrot.slane %v1615_v23, 1 }
 0x562   : > { %v1742_v8 = vrot.slane %v1741_v53, 4  ;;  %v1718_v35 = vrot.slane %v1717_v12, 1  ;;  %v1622_v52 = vadd.f32 %v1621_v4, %v1620_v42  ;;  %v1736_v15 = vmax.f32 %v1734_v56, %v1735_v40 }
 0x563   : > { %v1629_v33 = vadd.f32 %v1628_v22, %v1627_v57  ;;  %v1594_v9 = vadd.f32 %v1593_v29, %v1592_v44  ;;  %v1601_v6 = vadd.f32 %v1600_v16, %v1599_v36  ;;  %v1725_v21 = vrot.slane %v1724_v59, 1 }
 0x564   : > { %v1743_v47 = vmax.f32 %v1741_v53, %v1742_v8  ;;  %v1732_v26 = vrot.slane %v1731_v61, 1  ;;  %v1623_v30 = vrot.slane %v1622_v52, 2  ;;  %v1737_v28 = vrot.slane %v1736_v15, 2 }
 0x565   : > { %v1630_v45 = vrot.slane %v1629_v33, 2  ;;  %v1712_v25 = vmax.f32 %v1710_v17, %v1711_v63  ;;  %v1610_v18 = vadd.f32 %v1609_v5, %v1608_v2  ;;  %v1617_v20 = vadd.f32 %v1616_v48, %v1615_v23 }
 0x566   : > { %v1744_v55 = vrot.slane %v1743_v47, 2  ;;  %v1719_v49 = vmax.f32 %v1717_v12, %v1718_v35  ;;  %v1624_v24 = vadd.f32 %v1623_v30, %v1622_v52  ;;  %v1738_v50 = vmax.f32 %v1736_v15, %v1737_v28 }
 0x567   : > { %v1631_v11 = vadd.f32 %v1630_v45, %v1629_v33  ;;  %v1602_v31 = vmul.f32 0.0625, %v1594_v9  ;;  %v1603_v32 = vmul.f32 0.0625, %v1601_v6  ;;  %v1726_v51 = vmax.f32 %v1724_v59, %v1725_v21 }
 0x568   : > { %v1745_v42 = vmax.f32 %v1743_v47, %v1744_v55  ;;  %v1733_v44 = vmax.f32 %v1731_v61, %v1732_v26  ;;  %v1625_v36 = vrot.slane %v1624_v24, 1  ;;  %v1739_v56 = vrot.slane %v1738_v50, 1 }
 0x569   : > { %v1632_v57 = vrot.slane %v1631_v11, 1  ;;  %v1776_v29 = vsel %vm1759_vm5, %v3906_v38, %v1712_v25  ;;  %v1618_v16 = vmul.f32 0.0625, %v1610_v18  ;;  %v1619_v17 = vmul.f32 0.0625, %v1617_v20 }
 0x56a   : > { %v1746_v2 = vrot.slane %v1745_v42, 1  ;;  %v1777_v23 = vsel %vm1759_vm5, %v3909_v58, %v1719_v49  ;;  %v1626_v12 = vadd.f32 %v1625_v36, %v1624_v24  ;;  %v1740_v53 = vmax.f32 %v1738_v50, %v1739_v56  ;;  %v1797_v24 = vld [vmem:[%s4242_s8] ss:$8 sm:$0x3] }
 0x56b   : > { %v1633_v4 = vadd.f32 %v1632_v57, %v1631_v11  ;;  %v1760_v59 = vsel %vm1759_vm5, %v3903_v0, %v1602_v31  ;;  %v1761_v61 = vsel %vm1759_vm5, %v1758_v14, %v1603_v32  ;;  %v1778_v22 = vsel %vm1762_vm6, %v1776_v29, %v1726_v51  ;;  %v2562_v51 = vld [vmem:[%s4242_s8 + $0x1] ss:$8 sm:$0x3] }
 0x56c   : > { %v1747_v40 = vmax.f32 %v1745_v42, %v1746_v2  ;;  %v1634_v63 = vmul.f32 0.0625, %v1626_v12  ;;  %v1780_v38 = vsel %vm1765_vm7, %v1778_v22, %v1740_v53  ;;  %v1779_v48 = vsel %vm1762_vm6, %v1777_v23, %v1733_v44 }
 0x56d   : > { %v1635_v5 = vmul.f32 0.0625, %v1633_v4  ;;  %1784 = vrot.lane.b32.xlu1 %v1780_v38, %s2906_s20  ;;  %v1763_v58 = vsel %vm1762_vm6, %v1760_v59, %v1618_v16  ;;  %v1764_v35 = vsel %vm1762_vm6, %v1761_v61, %v1619_v17  ;;  %v1879_v0 = vrot.slane %v3796_v62, %v3799_v37  ;;  %v2563_v4 = vld [vmem:[%s4242_s8 + $0x2] ss:$8 sm:$0x3] }
 0x56e   : > { %v1781_v8 = vsel %vm1765_vm7, %v1779_v48, %v1747_v40  ;;  %v1766_v14 = vsel %vm1765_vm7, %v1763_v58, %v1634_v63  ;;  %v4317_v20 = vlaneseq  ;;  %v1802_v11 = vrot.slane %v1797_v24, %v3799_v37 }
 0x56f   : > { %v1767_v52 = vsel %vm1765_vm7, %v1764_v35, %v1635_v5  ;;  %1782 = vrot.lane.b32.xlu0 %v1766_v14, %s2906_s20  ;;  %v3951_v33 = vmul.f32 %v3803_v41, %v1781_v8  ;;  %v3953_v9 = vmul.f32 %v1879_v0, %v1766_v14  ;;  %v3957_v21 = vmul.f32 %v1879_v0, %v1780_v38 }
 0x570   : > { %v3948_v15 = vmul.f32 %v3803_v41, %v1767_v52  ;;  %v3966_v55 = vand.u32 127, %v4317_v20  ;;  %v1806_v31 = vrot.slane %v1797_v24, %v3787_v13  ;;  %v1832_v29 = vrot.slane %v2562_v51, %v3799_v37 }
 0x571   : > { %1815 = vrot.lane.b32.xlu1 %v1780_v38, %s2907_s10  ;;  %v2728_v62 = vpack.c.bf16 %v3957_v21, %v3953_v9  ;;  %v1836_v16 = vrot.slane %v2562_v51, %v3787_v13  ;;  %v1862_v48 = vrot.slane %v2563_v4, %v3799_v37  ;;  %v1866_v58 = vrot.slane %v2563_v4, %v3787_v13 }
 0x572   : > { %v2726_v6 = vpack.c.bf16 %v3951_v33, %v3948_v15  ;;  %vm1792_vm8 = vcmp.lt.s32.totalorder %v3966_v55, 3  ;;  %vm1821_vm9 = vcmp.lt.s32.totalorder %v3966_v55, 2  ;;  %vm1851_vm10 = vcmp.lt.s32.totalorder %v3966_v55, 1  ;;  %v2567_v15 = vld [vmem:[%s4242_s8 + $0x6] ss:$8 sm:$0x3] }
 0x573   : > { %1813 = vrot.lane.b32.xlu0 %v1766_v14, %s2907_s10  ;;  %vm1898_vm11 = vcmp.lt.s32.totalorder %v3966_v55, 127  ;;  %vm1928_vm12 = vcmp.lt.s32.totalorder %v3966_v55, 126  ;;  %vm1958_vm13 = vcmp.lt.s32.totalorder %v3966_v55, 125  ;;  %vm2143_vm15 = vcmp.lt.s32.totalorder %v3966_v55, 32 }
 0x574   : > { %vm2120_vm0 = vcmp.lt.s32.totalorder %v3966_v55, 48  ;;  %vm2167_vm1 = vcmp.lt.s32.totalorder %v3966_v55, 16  ;;  %vm2208_vm2 = vcmp.lt.s32.totalorder %v3966_v55, 112  ;;  %vm2232_vm3 = vcmp.lt.s32.totalorder %v3966_v55, 96 }
 0x575   : > { %1845 = vrot.lane.b32.xlu1 %v1780_v38, %s2908_s22  ;;  %vm2256_vm4 = vcmp.lt.s32.totalorder %v3966_v55, 80  ;;  %v2327_v55 = vsub.s32 2, %v3772_v1 }
 0x577   : > { %1843 = vrot.lane.b32.xlu0 %v1766_v14, %s2908_s22 }
 0x579   : > { %1892 = vrot.lane.b32.xlu1 %v1780_v38, %s2909_s23 }
 0x57b   : > { %1890 = vrot.lane.b32.xlu0 %v1766_v14, %s2909_s23 }
 0x57d   : > { %1922 = vrot.lane.b32.xlu1 %v1780_v38, %s2910_s25 }
 0x57f   : > { %1920 = vrot.lane.b32.xlu0 %v1766_v14, %s2910_s25 }
 0x581   : > { %1788 = vrot.lane.b32.xlu1 %v1781_v8, %s2906_s20 }
 0x583   : > { %1786 = vrot.lane.b32.xlu0 %v1767_v52, %s2906_s20  ;;  %s2916_s20 = smov 96  }
 0x585   : > { %1819 = vrot.lane.b32.xlu1 %v1781_v8, %s2907_s10 }
 0x587   : > { %1817 = vrot.lane.b32.xlu0 %v1767_v52, %s2907_s10  ;;  %s2917_s10 = smov 80  }
 0x589   : > { %1849 = vrot.lane.b32.xlu1 %v1781_v8, %s2908_s22 }
 0x58b   : > { %1847 = vrot.lane.b32.xlu0 %v1767_v52, %s2908_s22 }
 0x58d   : > { %1896 = vrot.lane.b32.xlu1 %v1781_v8, %s2909_s23 }
 0x58f   : > { %1950 = vrot.lane.b32.xlu0 %v1766_v14, %s2911_s26 }
 0x591   : > { %1926 = vrot.lane.b32.xlu1 %v1781_v8, %s2910_s25 }
 0x593   : > { %1894 = vrot.lane.b32.xlu0 %v1767_v52, %s2909_s23 }
 0x595   : > { %1952 = vrot.lane.b32.xlu1 %v1780_v38, %s2911_s26 }
 0x597   : > { %1924 = vrot.lane.b32.xlu0 %v1767_v52, %s2910_s25 }
 0x599   : > { %1956 = vrot.lane.b32.xlu1 %v1781_v8, %s2911_s26 }
 0x59b   : > { %1954 = vrot.lane.b32.xlu0 %v1767_v52, %s2911_s26 }
 0x5df   : > { %v1785_v41 = vpop.permute.xlu1 %1784 }
 0x5e1   : > { %v1783_v47 = vpop.permute.xlu0 %1782 }
 0x5e3   : > { %v1816_v26 = vpop.permute.xlu1 %1815 }
 0x5e5   : > { %v1814_v30 = vpop.permute.xlu0 %1813 }
 0x5e7   : > { %v1846_v28 = vpop.permute.xlu1 %1845 }
 0x5e9   : > { %v1844_v45 = vpop.permute.xlu0 %1843 }
 0x5eb   : > { %v3961_v25 = vpop.permute.xlu1 %1892 }
 0x5ed   : > { %v3963_v18 = vpop.permute.xlu0 %1890 }
 0x5ef   : > { %v3968_v49 = vpop.permute.xlu1 %1922 }
 0x5f1   : > { %v3973_v50 = vpop.permute.xlu0 %1920 }
 0x5f3   : > { %v1789_v32 = vpop.permute.xlu1 %1788 }
 0x5f4   : > { %v1794_v42 = vsel %vm1792_vm8, %v1785_v41, %v1789_v32  ;;  %v1796_v44 = vsel %vm1792_vm8, %v1789_v32, %v1785_v41 }
 0x5f5   : > { %v1787_v36 = vpop.permute.xlu0 %1786  ;;  %v1811_v17 = vmul.f32 %v1802_v11, %v1796_v44  ;;  %v1812_v2 = vmul.f32 %v1806_v31, %v1794_v42 }
 0x5f6   : > { %v1793_v56 = vsel %vm1792_vm8, %v1783_v47, %v1787_v36  ;;  %v1795_v57 = vsel %vm1792_vm8, %v1787_v36, %v1783_v47 }
 0x5f7   : > { %v1809_v23 = vmul.f32 %v1802_v11, %v1795_v57  ;;  %v1810_v12 = vmul.f32 %v1806_v31, %v1793_v56  ;;  %v1820_v53 = vpop.permute.xlu1 %1819 }
 0x5f8   : > { %v1823_v59 = vsel %vm1821_vm9, %v1816_v26, %v1820_v53  ;;  %v1825_v61 = vsel %vm1821_vm9, %v1820_v53, %v1816_v26 }
 0x5f9   : > { %v2716_v40 = vpack.c.bf16 %v1811_v17, %v1809_v23  ;;  %v1818_v22 = vpop.permute.xlu0 %1817  ;;  %v2714_v63 = vpack.c.bf16 %v1812_v2, %v1810_v12  ;;  %v1841_v8 = vmul.f32 %v1832_v29, %v1825_v61  ;;  %v1842_v35 = vmul.f32 %v1836_v16, %v1823_v59 }
 0x5fa   : > { %v1822_v5 = vsel %vm1821_vm9, %v1814_v30, %v1818_v22  ;;  %v1824_v38 = vsel %vm1821_vm9, %v1818_v22, %v1814_v30 }
 0x5fb   : > { %v1839_v0 = vmul.f32 %v1832_v29, %v1824_v38  ;;  %v1840_v14 = vmul.f32 %v1836_v16, %v1822_v5  ;;  %v1850_v52 = vpop.permute.xlu1 %1849  ;;  %2715 = vmatprep.subr.bf16.mxu0 %v2714_v63  ;;  %v2566_v16 = vld [vmem:[%s4242_s8 + $0x5] ss:$8 sm:$0x3] }
 0x5fc   : > { %v1853_v41 = vsel %vm1851_vm10, %v1846_v28, %v1850_v52  ;;  %v1855_v47 = vsel %vm1851_vm10, %v1850_v52, %v1846_v28  ;;  %2717 = vmatpush1.bf16.msra.mxu0 %v2716_v40  ;;  %v2565_v28 = vld [vmem:[%s4242_s8 + $0x4] ss:$8 sm:$0x3]  ;;  %v1939_v53 = vrot.slane %v2566_v16, %v3799_v37  ;;  %v1943_v4 = vrot.slane %v2566_v16, %v3787_v13 }
 0x5fd   : > { %v2720_v26 = vpack.c.bf16 %v1841_v8, %v1839_v0  ;;  %v1848_v20 = vpop.permute.xlu0 %1847  ;;  %v2718_v30 = vpack.c.bf16 %v1842_v35, %v1840_v14  ;;  %v1871_v31 = vmul.f32 %v1862_v48, %v1855_v47  ;;  %v1872_v32 = vmul.f32 %v1866_v58, %v1853_v41 }
 0x5fe   : > { %v1852_v24 = vsel %vm1851_vm10, %v1844_v45, %v1848_v20  ;;  %v1854_v11 = vsel %vm1851_vm10, %v1848_v20, %v1844_v45  ;;  %v1909_v29 = vrot.slane %v2565_v28, %v3799_v37  ;;  %v1913_v45 = vrot.slane %v2565_v28, %v3787_v13  ;;  %v1981_v28 = vld [vmem:[%s4241_s7 + $0x8] sm:$0xff] }
 0x5ff   : > { %v1869_v51 = vmul.f32 %v1862_v48, %v1854_v11  ;;  %v1870_v42 = vmul.f32 %v1866_v58, %v1852_v24  ;;  %v1897_v44 = vpop.permute.xlu1 %1896  ;;  %2719 = vmatprep.subr.bf16.mxu0 %v2718_v30  ;;  %v1969_v35 = vrot.slane %v2567_v15, %v3799_v37 }
 0x600   : > { %2721 = vmatpush1.bf16.msra.mxu0 %v2720_v26  ;;  %v1900_v2 = vsel %vm1898_vm11, %v3961_v25, %v1897_v44  ;;  %v1902_v23 = vsel %vm1898_vm11, %v1897_v44, %v3961_v25  ;;  %v1980_v44 = vld [vmem:[%s4241_s7] sm:$0xff] }
 0x601   : > { %v2724_v36 = vpack.c.bf16 %v1871_v31, %v1869_v51  ;;  %v1951_v56 = vpop.permute.xlu0 %1950  ;;  %v2722_v57 = vpack.c.bf16 %v1872_v32, %v1870_v42  ;;  %v1918_v61 = vmul.f32 %v1909_v29, %v1900_v2  ;;  %v1919_v40 = vmul.f32 %v1913_v45, %v1902_v23 }
 0x603   : > { %v1927_v17 = vpop.permute.xlu1 %1926  ;;  %2723 = vmatprep.subr.bf16.mxu0 %v2722_v57  ;;  %v1984_v57 = vld [vmem:[%s4241_s7 + $0x20] sm:$0xff] }
 0x604   : > { %2725 = vmatpush1.bf16.msra.mxu0 %v2724_v36  ;;  %v1930_v33 = vsel %vm1928_vm12, %v3968_v49, %v1927_v17  ;;  %v1982_v36 = vld [vmem:[%s4241_s7 + $0x10] sm:$0xff] }
 0x605   : > { %2727 = vmatprep.subr.bf16.mxu0 %v2726_v6  ;;  %v1895_v12 = vpop.permute.xlu0 %1894  ;;  %v1932_v6 = vsel %vm1928_vm12, %v1927_v17, %v3968_v49  ;;  %v1973_v49 = vrot.slane %v2567_v15, %v3787_v13  ;;  %v1948_v0 = vmul.f32 %v1939_v53, %v1930_v33 }
 0x606   : > { %v1899_v59 = vsel %vm1898_vm11, %v3963_v18, %v1895_v12  ;;  %v1901_v25 = vsel %vm1898_vm11, %v1895_v12, %v3963_v18  ;;  %v1949_v9 = vmul.f32 %v1943_v4, %v1932_v6 }
 0x607   : > { %v1916_v22 = vmul.f32 %v1909_v29, %v1899_v59  ;;  %v1917_v63 = vmul.f32 %v1913_v45, %v1901_v25  ;;  %v1953_v5 = vpop.permute.xlu1 %1952  ;;  %v1985_v29 = vld [vmem:[%s4241_s7 + $0x28] sm:$0xff]  ;;  %v1986_v45 = vld [vmem:[%s4241_s7 + $0x30] sm:$0xff] }
 0x608   : > { %2729 = vmatpush1.bf16.msra.mxu0 %v2728_v62 }
 0x609   : > { %v2732_v18 = vpack.c.bf16 %v1918_v61, %v1916_v22  ;;  %v1925_v38 = vpop.permute.xlu0 %1924  ;;  %v2730_v48 = vpack.c.bf16 %v1919_v40, %v1917_v63 }
 0x60a   : > { %v1929_v58 = vsel %vm1928_vm12, %v3973_v50, %v1925_v38  ;;  %v1931_v8 = vsel %vm1928_vm12, %v1925_v38, %v3973_v50  ;;  %v2123_v38 = vld [vmem:[%s4243_s9] ss:$8 sm:$0x3] }
 0x60b   : > { %v1946_v21 = vmul.f32 %v1939_v53, %v1929_v58  ;;  %v1947_v62 = vmul.f32 %v1943_v4, %v1931_v8  ;;  %v1957_v14 = vpop.permute.xlu1 %1956  ;;  %2731 = vmatprep.subr.bf16.mxu0 %v2730_v48  ;;  %v2576_v48 = vld [vmem:[%s4243_s9 + $0x2] ss:$8 sm:$0x3] }
 0x60c   : > { %v1960_v52 = vsel %vm1958_vm13, %v1953_v5, %v1957_v14  ;;  %v1962_v41 = vsel %vm1958_vm13, %v1957_v14, %v1953_v5  ;;  %2733 = vmatpush1.bf16.msra.mxu0 %v2732_v18  ;;  %v2575_v18 = vld [vmem:[%s4243_s9 + $0x1] ss:$8 sm:$0x3]  ;;  %v2176_v14 = vrot.slane %v2576_v48, %v3799_v37 }
 0x60d   : > { %v2736_v47 = vpack.c.bf16 %v1948_v0, %v1946_v21  ;;  %v1955_v26 = vpop.permute.xlu0 %1954  ;;  %v2734_v50 = vpack.c.bf16 %v1949_v9, %v1947_v62  ;;  %v1978_v24 = vmul.f32 %v1969_v35, %v1960_v52  ;;  %v1979_v11 = vmul.f32 %v1973_v49, %v1962_v41 }
 0x60e   : > { %v1959_v20 = vsel %vm1958_vm13, %v1951_v56, %v1955_v26  ;;  %v1961_v30 = vsel %vm1958_vm13, %v1955_v26, %v1951_v56  ;;  %v1983_v56 = vld [vmem:[%s4241_s7 + $0x18] sm:$0xff]  ;;  %v2152_v58 = vrot.slane %v2575_v18, %v3799_v37  ;;  %v2156_v8 = vrot.slane %v2575_v18, %v3787_v13 }
 0x60f   : > { %v1976_v31 = vmul.f32 %v1969_v35, %v1959_v20  ;;  %v1977_v32 = vmul.f32 %v1973_v49, %v1961_v30  ;;  %2735 = vmatprep.subr.bf16.mxu0 %v2734_v50  ;;  %v2128_v21 = vrot.slane %v2123_v38, %v3799_v37  ;;  %v2132_v62 = vrot.slane %v2123_v38, %v3787_v13  ;;  %v2577_v20 = vld [vmem:[%s4243_s9 + $0x3] ss:$8 sm:$0x3] }
 0x610   : > { %2737 = vmatpush1.bf16.msra.mxu0 %v2736_v47  ;;  %v2180_v52 = vrot.slane %v2576_v48, %v3787_v13 }
 0x611   : > { %v2740_v51 = vpack.c.bf16 %v1978_v24, %v1976_v31  ;;  %v2738_v42 = vpack.c.bf16 %v1979_v11, %v1977_v32  ;;  %v2578_v11 = vld [vmem:[%s4243_s9 + $0x4] ss:$8 sm:$0x3] }
 0x613   : > { %2739 = vmatprep.subr.bf16.mxu0 %v2738_v42 }
 0x614   : > { %2741 = vmatpush1.bf16.msra.mxu0 %v2740_v51 }
 0x617   : > { %2568 = vmatmul.mubr.msk.f32.vlgmr.msra.gmra.mrb[6].mxu0 %vm1987_vm14, %v1980_v44  ;;  %v2193_v44 = vrot.slane %v2577_v20, %v3799_v37 }
 0x618   : > { %2079 = vmatprep.mubr.f32.mxu0 %v4292_v34 }
 0x61b   : > { %2569 = vmatmul.mubr.msk.f32.gmra.mrb[8].mxu0 %vm1987_vm14, %v1981_v28  ;;  %v2197_v28 = vrot.slane %v2577_v20, %v3787_v13 }
 0x61c   : > { %2085 = vmatprep.mubr.f32.mxu0 %v4292_v34 }
 0x61f   : > { %2570 = vmatmul.mubr.msk.f32.gmra.mrb[10].mxu0 %vm1987_vm14, %v1982_v36 }
 0x620   : > { %2091 = vmatprep.mubr.f32.mxu0 %v4292_v34 }
 0x623   : > { %2571 = vmatmul.mubr.msk.f32.gmra.mrb[12].mxu0 %vm1987_vm14, %v1983_v56  ;;  %v2579_v56 = vld [vmem:[%s4243_s9 + $0x5] ss:$8 sm:$0x3] }
 0x624   : > { %2097 = vmatprep.mubr.f32.mxu0 %v4292_v34 }
 0x627   : > { %2572 = vmatmul.mubr.msk.f32.gmra.mrb[14].mxu0 %vm1987_vm14, %v1984_v57 }
 0x628   : > { %2103 = vmatprep.mubr.f32.mxu0 %v4292_v34 }
 0x62b   : > { %2573 = vmatmul.mubr.msk.f32.gmra.mrb[16].mxu0 %vm1987_vm14, %v1985_v29 }
 0x62c   : > { %2109 = vmatprep.mubr.f32.mxu0 %v4292_v34 }
 0x62f   : > { %2574 = vmatmul.mubr.msk.f32.gmra.mrb[18].mxu0 %vm1987_vm14, %v1986_v45  ;;  %v2217_v45 = vrot.slane %v2578_v11, %v3799_v37 }
 0x6ea   : > { %v2075_v16 = vpop.f32.mrb[6].mxu0 }
 0x6eb   : > { %v2077_v17 = vpop.f32.mrb[7].mxu0  ;;  %2116 = vrot.lane.b32.xlu0 %v2075_v16, %s2912_s24  ;;  %v2221_v16 = vrot.slane %v2578_v11, %v3787_v13 }
 0x6ec   : > { %2118 = vrot.lane.b32.xlu1 %v2077_v17, %s2912_s24 }
 0x6ee   : > { %v2081_v2 = vpop.f32.mrb[8].mxu0 }
 0x6ef   : > { %v2083_v23 = vpop.f32.mrb[9].mxu0  ;;  %2139 = vrot.lane.b32.xlu0 %v2081_v2, %s2913_s16 }
 0x6f0   : > { %2141 = vrot.lane.b32.xlu1 %v2083_v23, %s2913_s16 }
 0x6f2   : > { %v2087_v12 = vpop.f32.mrb[10].mxu0 }
 0x6f3   : > { %v2089_v53 = vpop.f32.mrb[11].mxu0  ;;  %2163 = vrot.lane.b32.xlu0 %v2087_v12, %s2914_s17 }
 0x6f4   : > { %2165 = vrot.lane.b32.xlu1 %v2089_v53, %s2914_s17  ;;  %s2276_s17 = sld [smem:[#allocation2]] }
 0x6f6   : > { %v4096_v34 = vpop.f32.mrb[12].mxu0 }
 0x6f7   : > { %v4098_v4 = vpop.f32.mrb[13].mxu0 }
 0x6fa   : > { %v2099_v59 = vpop.f32.mrb[14].mxu0 }
 0x6fb   : > { %v2101_v25 = vpop.f32.mrb[15].mxu0  ;;  %2204 = vrot.lane.b32.xlu0 %v2099_v59, %s2915_s18  ;;  %v2241_v59 = vrot.slane %v2579_v56, %v3799_v37 }
 0x6fc   : > { %2206 = vrot.lane.b32.xlu1 %v2101_v25, %s2915_s18  ;;  %v2245_v25 = vrot.slane %v2579_v56, %v3787_v13  ;;  %s2614_s18 = sshll.u32 %s4341_s21, 5  ;;  %v2361_v56 = vsub.s32 4, %v3772_v1 }
 0x6fd   : > { %s4163_s21 = scalar_lea.vmem %s4245_s11, %s2614_s18 }
 0x6fe   : > { %v2105_v61 = vpop.f32.mrb[16].mxu0 }
 0x6ff   : > { %v2107_v40 = vpop.f32.mrb[17].mxu0  ;;  %2228 = vrot.lane.b32.xlu0 %v2105_v61, %s2916_s20  ;;  %v2580_v61 = vld [vmem:[%s4243_s9 + $0x6] ss:$8 sm:$0x3] }
 0x700   : > { %2230 = vrot.lane.b32.xlu1 %v2107_v40, %s2916_s20  ;;  %v2265_v38 = vrot.slane %v2580_v61, %v3799_v37  ;;  %v2269_v48 = vrot.slane %v2580_v61, %v3787_v13 }
 0x702   : > { %v2111_v22 = vpop.f32.mrb[18].mxu0 }
 0x703   : > { %v2113_v63 = vpop.f32.mrb[19].mxu0  ;;  %2252 = vrot.lane.b32.xlu0 %v2111_v22, %s2917_s10  ;;  %v2200_v22 = vmul.f32 %v2193_v44, %v4096_v34 }
 0x704   : > { %2254 = vrot.lane.b32.xlu1 %v2113_v63, %s2917_s10  ;;  %v2201_v63 = vmul.f32 %v2197_v28, %v4098_v4  ;;  %v2344_v28 = vsub.s32 3, %v3772_v1 }
 0x75d   : > { %v2117_v5 = vpop.permute.xlu0 %2116 }
 0x75e   : > { %v2119_v15 = vpop.permute.xlu1 %2118 }
 0x75f   : > { %v2121_v41 = vsel %vm2120_vm0, %v2117_v5, %v2119_v15  ;;  %v2122_v47 = vsel %vm2120_vm0, %v2119_v15, %v2117_v5 }
 0x760   : > { %v2135_v31 = vmul.f32 %v2128_v21, %v2122_v47  ;;  %v2136_v32 = vmul.f32 %v2132_v62, %v2121_v41 }
 0x761   : > { %v2140_v33 = vpop.permute.xlu0 %2139 }
 0x762   : > { %v2142_v6 = vpop.permute.xlu1 %2141 }
 0x763   : > { %v2144_v0 = vsel %vm2143_vm15, %v2140_v33, %v2142_v6  ;;  %v2145_v9 = vsel %vm2143_vm15, %v2142_v6, %v2140_v33 }
 0x764   : > { %v2159_v30 = vmul.f32 %v2152_v58, %v2145_v9  ;;  %v2160_v24 = vmul.f32 %v2156_v8, %v2144_v0 }
 0x765   : > { %v2164_v35 = vpop.permute.xlu0 %2163 }
 0x766   : > { %v2166_v49 = vpop.permute.xlu1 %2165  ;;  %v2161_v57 = vadd.f32 %v2159_v30, %v2135_v31  ;;  %v2162_v29 = vadd.f32 %v2160_v24, %v2136_v32 }
 0x767   : > { %v2168_v26 = vsel %vm2167_vm1, %v2164_v35, %v2166_v49  ;;  %v2169_v50 = vsel %vm2167_vm1, %v2166_v49, %v2164_v35 }
 0x768   : > { %v2183_v51 = vmul.f32 %v2176_v14, %v2169_v50  ;;  %v2184_v42 = vmul.f32 %v2180_v52, %v2168_v26  ;;  %v2277_v26 = vstv %s2276_s17 }
 0x76a   : > { %v2185_v12 = vadd.f32 %v2183_v51, %v2161_v57  ;;  %v2186_v53 = vadd.f32 %v2184_v42, %v2162_v29  ;;  %v2378_v57 = vsub.s32 5, %v3772_v1  ;;  %v2395_v29 = vsub.s32 6, %v3772_v1 }
 0x76c   : > { %v2202_v58 = vadd.f32 %v2200_v22, %v2185_v12  ;;  %v2203_v8 = vadd.f32 %v2201_v63, %v2186_v53 }
 0x76d   : > { %v2205_v36 = vpop.permute.xlu0 %2204 }
 0x76e   : > { %v2207_v17 = vpop.permute.xlu1 %2206 }
 0x76f   : > { %v2209_v2 = vsel %vm2208_vm2, %v2205_v36, %v2207_v17  ;;  %v2210_v23 = vsel %vm2208_vm2, %v2207_v17, %v2205_v36 }
 0x770   : > { %v2224_v5 = vmul.f32 %v2217_v45, %v2209_v2  ;;  %v2225_v15 = vmul.f32 %v2221_v16, %v2210_v23  ;;  %v2412_v45 = vsub.s32 7, %v3772_v1 }
 0x771   : > { %v2229_v40 = vpop.permute.xlu0 %2228 }
 0x772   : > { %v2231_v33 = vpop.permute.xlu1 %2230  ;;  %v2226_v9 = vadd.f32 %v2224_v5, %v2202_v58  ;;  %v2227_v21 = vadd.f32 %v2225_v15, %v2203_v8  ;;  %v4318_v15 = vld [vmem:[#allocation4_spill] sm:$0xff] }
 0x773   : > { %v2233_v6 = vsel %vm2232_vm3, %v2229_v40, %v2231_v33  ;;  %v2234_v18 = vsel %vm2232_vm3, %v2231_v33, %v2229_v40  ;;  %v4319_v33 = vld [vmem:[#allocation6_spill] sm:$0xff]  ;;  %v4325_v8 = vld [vmem:[#allocation12_spill] sm:$0xff] }
 0x774   : > { %v2248_v35 = vmul.f32 %v2241_v59, %v2233_v6  ;;  %v2249_v49 = vmul.f32 %v2245_v25, %v2234_v18  ;;  %v4322_v18 = vld [vmem:[#allocation8_spill] sm:$0xff] }
 0x775   : > { %v2253_v0 = vpop.permute.xlu0 %2252 }
 0x776   : > { %v2255_v62 = vpop.permute.xlu1 %2254  ;;  %v2250_v14 = vadd.f32 %v2248_v35, %v2226_v9  ;;  %v2251_v52 = vadd.f32 %v2249_v49, %v2227_v21  ;;  %v4326_v49 = vld [vmem:[#allocation10_spill] sm:$0xff]  ;;  %v4327_v9 = vld [vmem:[#allocation11_spill] sm:$0xff] }
 0x777   : > { %v2257_v34 = vsel %vm2256_vm4, %v2253_v0, %v2255_v62  ;;  %v2258_v4 = vsel %vm2256_vm4, %v2255_v62, %v2253_v0 }
 0x778   : > { %v2272_v41 = vmul.f32 %v2265_v38, %v2257_v34  ;;  %v2273_v47 = vmul.f32 %v2269_v48, %v2258_v4  ;;  %v4323_v38 = vld [vmem:[#allocation7_spill] sm:$0xff]  ;;  %v4324_v48 = vld [vmem:[#allocation9_spill] sm:$0xff] }
 0x77a   : > { %v2274_v50 = vadd.f32 %v2272_v41, %v2250_v14  ;;  %v2275_v20 = vadd.f32 %v2273_v47, %v2251_v52 }
 0x77c   : > { %v2278_v30 = vadd.f32 %v2277_v26, %v2274_v50  ;;  %v2279_v24 = vadd.f32 %v2277_v26, %v2275_v20  ;;  %v4328_v50 = vld [vmem:[#allocation13_spill] sm:$0xff] }
 0x77e   : > { %v2581_v11 = vmul.f32 -1.442695, %v2278_v30  ;;  %v2582_v31 = vmul.f32 -1.442695, %v2279_v24  ;;  %v4329_v30 = vld [vmem:[#allocation15_spill] sm:$0xff] }
 0x780   : > { %2818 = vpow2.f32 %v2581_v11  ;;  %v4330_v11 = vld [vmem:[#allocation14_spill] sm:$0xff] }
 0x781   : > { %2820 = vpow2.f32 %v2582_v31 }
 0x78a   : > { %v2819_v32 = vpop.eup %2818 }
 0x78b   : > { %v2821_v51 = vpop.eup %2820  ;;  %v2286_v42 = vadd.f32 1.0, %v2819_v32  ;;  %v4331_v32 = vld [vmem:[#allocation16_spill] sm:$0xff] }
 0x78c   : > { %v2287_v44 = vadd.f32 1.0, %v2821_v51 }
 0x78d   : > { %2822 = vrcp.f32 %v2286_v42  ;;  %v4332_v42 = vld [vmem:[#allocation17_spill] sm:$0xff] }
 0x78e   : > { %2824 = vrcp.f32 %v2287_v44 }
 0x797   : > { %v2823_v36 = vpop.eup %2822 }
 0x798   : > { %v2825_v16 = vpop.eup %2824  ;;  %v2295_v17 = vrot.slane %v2823_v36, %v3799_v37  ;;  %v2311_v2 = vrot.slane %v2823_v36, %v3787_v13  ;;  %v2328_v23 = vrot.slane %v2823_v36, %v2327_v55  ;;  %v2345_v12 = vrot.slane %v2823_v36, %v2344_v28 }
 0x799   : > { %v2299_v53 = vrot.slane %v2825_v16, %v3799_v37  ;;  %v2315_v1 = vrot.slane %v2825_v16, %v3787_v13  ;;  %v2332_v59 = vrot.slane %v2825_v16, %v2327_v55  ;;  %v2349_v25 = vrot.slane %v2825_v16, %v2344_v28  ;;  %v4333_v55 = vld [vmem:[#allocation20_spill] sm:$0xff] }
 0x79a   : > { %v2300_v61 = vmul.f32 %v2295_v17, %v3739_v19  ;;  %v2302_v40 = vmul.f32 %v2295_v17, %v3741_v27  ;;  %v2316_v22 = vmul.f32 %v2311_v2, %v3755_v46  ;;  %v2318_v63 = vmul.f32 %v2311_v2, %v3757_v3  ;;  %v4320_v19 = vld [vmem:[#allocation5_spill] sm:$0xff]  ;;  %v4321_v46 = vld [vmem:[#allocation3_spill] sm:$0xff] }
 0x79b   : > { %v2301_v5 = vmul.f32 %v2299_v53, %v3745_v60  ;;  %v2303_v37 = vmul.f32 %v2299_v53, %v3743_v39  ;;  %v2317_v13 = vmul.f32 %v2315_v1, %v4318_v15  ;;  %v2319_v6 = vmul.f32 %v2315_v1, %v4319_v33  ;;  %v4337_v17 = vld [vmem:[#allocation23_spill] sm:$0xff]  ;;  %v4339_v53 = vld [vmem:[#allocation24_spill] sm:$0xff] }
 0x79c   : > { %2304 = vst [vmem:[%s4163_s21] sm:$0xff] %v2300_v61  ;;  %2306 = vst [vmem:[%s4163_s21 + $0x10] sm:$0xff] %v2302_v40  ;;  %v2333_v27 = vmul.f32 %v2328_v23, %v4320_v19  ;;  %v2334_v3 = vmul.f32 %v2332_v59, %v4321_v46  ;;  %v2335_v60 = vmul.f32 %v2328_v23, %v4322_v18  ;;  %v4338_v23 = vld [vmem:[#allocation22_spill] sm:$0xff] }
 0x79d   : > { %2583 = vst [vmem:[%s4163_s21 + $0x20] sm:$0xff] %v2316_v22  ;;  %2585 = vst [vmem:[%s4163_s21 + $0x30] sm:$0xff] %v2318_v63  ;;  %v2336_v39 = vmul.f32 %v2332_v59, %v4323_v38  ;;  %v2350_v58 = vmul.f32 %v2345_v12, %v4324_v48  ;;  %v2351_v35 = vmul.f32 %v2349_v25, %v4325_v8 }
 0x79e   : > { %2305 = vst [vmem:[%s4163_s21 + $0x8] sm:$0xff] %v2301_v5  ;;  %2307 = vst [vmem:[%s4163_s21 + $0x18] sm:$0xff] %v2303_v37  ;;  %v2352_v0 = vmul.f32 %v2345_v12, %v4326_v49  ;;  %v2353_v21 = vmul.f32 %v2349_v25, %v4327_v9  ;;  %v2362_v62 = vrot.slane %v2823_v36, %v2361_v56 }
 0x79f   : > { %2584 = vst [vmem:[%s4163_s21 + $0x28] sm:$0xff] %v2317_v13  ;;  %2586 = vst [vmem:[%s4163_s21 + $0x38] sm:$0xff] %v2319_v6  ;;  %v2366_v34 = vrot.slane %v2825_v16, %v2361_v56  ;;  %v2379_v4 = vrot.slane %v2823_v36, %v2378_v57  ;;  %v2383_v14 = vrot.slane %v2825_v16, %v2378_v57  ;;  %v4334_v56 = vld [vmem:[#allocation18_spill] sm:$0xff] }
 0x7a0   : > { %2587 = vst [vmem:[%s4163_s21 + $0x40] sm:$0xff] %v2333_v27  ;;  %2588 = vst [vmem:[%s4163_s21 + $0x48] sm:$0xff] %v2334_v3  ;;  %v2396_v52 = vrot.slane %v2823_v36, %v2395_v29  ;;  %v2400_v41 = vrot.slane %v2825_v16, %v2395_v29  ;;  %v2413_v47 = vrot.slane %v2823_v36, %v2412_v45  ;;  %v4335_v36 = vld [vmem:[#allocation19_spill] sm:$0xff] }
 0x7a1   : > { %2589 = vst [vmem:[%s4163_s21 + $0x50] sm:$0xff] %v2335_v60  ;;  %2590 = vst [vmem:[%s4163_s21 + $0x58] sm:$0xff] %v2336_v39  ;;  %v2417_v26 = vrot.slane %v2825_v16, %v2412_v45  ;;  %v2367_v20 = vmul.f32 %v2362_v62, %v4328_v50  ;;  %v2368_v24 = vmul.f32 %v2366_v34, %v4329_v30  ;;  %v4336_v45 = vld [vmem:[#allocation21_spill] sm:$0xff] }
 0x7a2   : > { %2591 = vst [vmem:[%s4163_s21 + $0x60] sm:$0xff] %v2350_v58  ;;  %2592 = vst [vmem:[%s4163_s21 + $0x68] sm:$0xff] %v2351_v35  ;;  %v2369_v31 = vmul.f32 %v2362_v62, %v4330_v11  ;;  %v2370_v51 = vmul.f32 %v2366_v34, %v4331_v32  ;;  %v2384_v44 = vmul.f32 %v2379_v4, %v4332_v42 }
 0x7a3   : > { %2593 = vst [vmem:[%s4163_s21 + $0x70] sm:$0xff] %v2352_v0  ;;  %2594 = vst [vmem:[%s4163_s21 + $0x78] sm:$0xff] %v2353_v21  ;;  %v2385_v28 = vmul.f32 %v2383_v14, %v4333_v55  ;;  %v2386_v57 = vmul.f32 %v2379_v4, %v4334_v56  ;;  %v2387_v29 = vmul.f32 %v2383_v14, %v4335_v36 }
 0x7a4   : > { %2595 = vst [vmem:[%s4163_s21 + $0x80] sm:$0xff] %v2367_v20  ;;  %2596 = vst [vmem:[%s4163_s21 + $0x88] sm:$0xff] %v2368_v24  ;;  %v2401_v16 = vmul.f32 %v2396_v52, %v4336_v45  ;;  %v2402_v2 = vmul.f32 %v2400_v41, %v4337_v17  ;;  %v2403_v12 = vmul.f32 %v2396_v52, %v4338_v23 }
 0x7a5   : > { %2597 = vst [vmem:[%s4163_s21 + $0x90] sm:$0xff] %v2369_v31  ;;  %2598 = vst [vmem:[%s4163_s21 + $0x98] sm:$0xff] %v2370_v51  ;;  %v2404_v1 = vmul.f32 %v2400_v41, %v4339_v53  ;;  %v2418_v59 = vmul.f32 %v2413_v47, %v3912_v10  ;;  %v2419_v25 = vmul.f32 %v2417_v26, %v3915_v43 }
 0x7a6   : > { %2599 = vst [vmem:[%s4163_s21 + $0xa0] sm:$0xff] %v2384_v44  ;;  %2600 = vst [vmem:[%s4163_s21 + $0xa8] sm:$0xff] %v2385_v28  ;;  %v2420_v61 = vmul.f32 %v2413_v47, %v3917_v7  ;;  %v2421_v40 = vmul.f32 %v2417_v26, %v3919_v54 }
 0x7a7   : > { %2601 = vst [vmem:[%s4163_s21 + $0xb0] sm:$0xff] %v2386_v57  ;;  %2602 = vst [vmem:[%s4163_s21 + $0xb8] sm:$0xff] %v2387_v29 }
 0x7a8   : > { %2603 = vst [vmem:[%s4163_s21 + $0xc0] sm:$0xff] %v2401_v16  ;;  %2604 = vst [vmem:[%s4163_s21 + $0xc8] sm:$0xff] %v2402_v2 }
 0x7a9   : > { %2605 = vst [vmem:[%s4163_s21 + $0xd0] sm:$0xff] %v2403_v12  ;;  %2606 = vst [vmem:[%s4163_s21 + $0xd8] sm:$0xff] %v2404_v1 }
 0x7aa   : > { %2607 = vst [vmem:[%s4163_s21 + $0xe0] sm:$0xff] %v2418_v59  ;;  %2608 = vst [vmem:[%s4163_s21 + $0xe8] sm:$0xff] %v2419_v25 }
 0x7ab   : > { %2609 = vst [vmem:[%s4163_s21 + $0xf0] sm:$0xff] %v2420_v61  ;;  %2610 = vst [vmem:[%s4163_s21 + $0xf8] sm:$0xff] %v2421_v40 }
 0x7ac PF: > { %s22_s19 = sadd.s32 1, %s2892_s19  }
 0x7ad   : > { %p19_p4 = scmp.ge.s32.totalorder %s22_s19, 4  }
 0x7af   :  { %21 = sbr.rel (!%p19_p4) target bundleno = 2 (0x2), region = 120 }

</bundles_post_ra>
